<compile_context>
chip_gen: v7x
topology: tpu7x:2x2x1
jax: 0.10.0
libtpu: 0.0.40
codegen_flags: <defaults>
</compile_context>

<pallas_src>
import functools

import jax
import jax.numpy as jnp
from jax.experimental import pallas as pl
from jax.experimental.pallas import tpu as pltpu


def _round_up(x, m):
    return ((x + m - 1) // m) * m


def _lstm_kernel(preact_ref, wh_ref, h0_ref, c0_ref,
                 out_ref, hN_ref, cN_ref, h_scr, c_scr,
                 *, hidden_pad, ts, seq_len, mask_tail):
    """One grid step = one (batch_tile, time_block).

    preact_ref : (TB, Ts, 4*Hp) f32  -- x @ Wi + b, precomputed in bulk
    wh_ref     : (Hp, 4*Hp)          -- fused recurrent weights [i|f|g|o]
    h0/c0_ref  : (TB, Hp)            -- initial state for this batch tile
    out_ref    : (TB, Ts, Hp)        -- h_t for every step of this block
    hN/cN_ref  : (TB, Hp)            -- final state (written on last block)
    h_scr/c_scr: (TB, Hp) f32        -- recurrent carry across time blocks
    """
    t_blk = pl.program_id(1)

    # Initialize the recurrent carry from (h0, c0) at the first time block.
    @pl.when(t_blk == 0)
    def _():
        h_scr[...] = h0_ref[...].astype(jnp.float32)
        c_scr[...] = c0_ref[...].astype(jnp.float32)

    h = h_scr[...]                    # (TB, Hp) f32
    c = c_scr[...]                    # (TB, Hp) f32
    wh = wh_ref[...]                  # (Hp, 4Hp), f32 or bf16
    Hp = hidden_pad

    # Unrolled serial recurrence over the Ts timesteps of this block.
    for i in range(ts):
        gates = preact_ref[:, i, :] + jnp.dot(
            h.astype(wh.dtype), wh, preferred_element_type=jnp.float32)

        # 128-lane-aligned gate slabs (Hp is a multiple of 128).
        it = jax.nn.sigmoid(gates[:, 0 * Hp:1 * Hp])
        ft = jax.nn.sigmoid(gates[:, 1 * Hp:2 * Hp])
        gt = jnp.tanh(gates[:, 2 * Hp:3 * Hp])
        ot = jax.nn.sigmoid(gates[:, 3 * Hp:4 * Hp])

        c_new = ft * c + it * gt
        h_new = ot * jnp.tanh(c_new)

        if mask_tail:
            # Padded timesteps (beyond the real sequence) must not advance the
            # carry; their outputs are sliced off in the wrapper.
            valid = (t_blk * ts + i) < seq_len
            c = jnp.where(valid, c_new, c)
            h = jnp.where(valid, h_new, h)
        else:
            c = c_new
            h = h_new

        out_ref[:, i, :] = h.astype(out_ref.dtype)   # lane-dense (TB,1,Hp) store

    h_scr[...] = h
    c_scr[...] = c

    # Only emit the final-state writes on the last time block.
    @pl.when(t_blk == pl.num_programs(1) - 1)
    def _():
        hN_ref[...] = h.astype(hN_ref.dtype)
        cN_ref[...] = c.astype(cN_ref.dtype)


def lstm_forward(inputs, hidden_states, params, *,
                 time_block=32, batch_block=8, use_bf16=False):
    """inputs: (B, S, D); hidden_states: (h0, c0) each (1, B, H)."""
    h0, c0 = hidden_states
    B, S, D = inputs.shape
    H = params["w_hi"].shape[0]

    # ---- padded / tiled geometry ---------------------------------------
    Hp = _round_up(H, 128)                 # lane-aligned gate slabs
    Dp = _round_up(D, 128)
    TB = batch_block                       # batch tile (sublane multiple)
    Bp = _round_up(B, TB)
    Ts = max(8, min(_round_up(time_block, 8), _round_up(S, 8)))
    Sp = _round_up(S, Ts)

    # ---- fuse + pad weights: [i | f | g | o] along the 4*Hp lane axis ----
    def pad2(w, rows, cols):
        return jnp.pad(w, ((0, rows - w.shape[0]), (0, cols - w.shape[1])))

    wi = jnp.concatenate(
        [pad2(params[n].T, Dp, Hp) for n in ("w_ii", "w_if", "w_ig", "w_io")],
        axis=1)                                            # (Dp, 4Hp)
    wh = jnp.concatenate(
        [pad2(params[n].T, Hp, Hp) for n in ("w_hi", "w_hf", "w_hg", "w_ho")],
        axis=1)                                            # (Hp, 4Hp)
    bias = jnp.concatenate(
        [jnp.pad(params[bi] + params[bh], (0, Hp - H))
         for bi, bh in (("b_ii", "b_hi"), ("b_if", "b_hf"),
                        ("b_ig", "b_hg"), ("b_io", "b_ho"))])  # (4Hp,)

    # ---- pad activations (stay batch-major; no HBM transpose passes) ----
    x_pad = jnp.pad(inputs, ((0, Bp - B), (0, Sp - S), (0, Dp - D)))
    h0_pad = jnp.pad(h0[0], ((0, Bp - B), (0, Hp - H)))
    c0_pad = jnp.pad(c0[0], ((0, Bp - B), (0, Hp - H)))

    mm_dtype = jnp.bfloat16 if use_bf16 else inputs.dtype
    wi_c = wi.astype(mm_dtype)
    wh_c = wh.astype(mm_dtype)
    x_c = x_pad.astype(mm_dtype)

    # Hoisted bulk input projection: one big MXU matmul, bias folded in.
    preact = jnp.einsum("bsd,dg->bsg", x_c, wi_c,
                        preferred_element_type=jnp.float32) + bias  # (Bp,Sp,4Hp)

    nb, nt = Bp // TB, Sp // Ts
    kernel = functools.partial(_lstm_kernel, hidden_pad=Hp, ts=Ts,
                               seq_len=S, mask_tail=(Sp != S))

    # Rough VMEM budget; only raise the scoped limit when actually needed.
    w_item = 2 if use_bf16 else 4
    vmem_need = (2 * Hp * 4 * Hp * w_item          # resident Wh (double-buffered)
                 + 2 * TB * Ts * 4 * Hp * 4        # preact block
                 + 2 * TB * Ts * Hp * 4            # out block
                 + 6 * 2 * TB * Hp * 4             # h0/c0/hN/cN blocks
                 + 2 * TB * Hp * 4)                # carry scratch
    vmem_limit = None
    if vmem_need > 16 * 1024 * 1024:
        vmem_limit = min(int(vmem_need * 3 // 2), 48 * 1024 * 1024)

    out_pad, hN_pad, cN_pad = pl.pallas_call(
        kernel,
        out_shape=(
            jax.ShapeDtypeStruct((Bp, Sp, Hp), inputs.dtype),
            jax.ShapeDtypeStruct((Bp, Hp), inputs.dtype),
            jax.ShapeDtypeStruct((Bp, Hp), inputs.dtype),
        ),
        grid_spec=pltpu.PrefetchScalarGridSpec(
            num_scalar_prefetch=0,
            grid=(nb, nt),
            in_specs=[
                pl.BlockSpec((TB, Ts, 4 * Hp), lambda b, t: (b, t, 0)),  # preact
                pl.BlockSpec((Hp, 4 * Hp), lambda b, t: (0, 0)),         # Wh
                pl.BlockSpec((TB, Hp), lambda b, t: (b, 0)),             # h0
                pl.BlockSpec((TB, Hp), lambda b, t: (b, 0)),             # c0
            ],
            out_specs=[
                pl.BlockSpec((TB, Ts, Hp), lambda b, t: (b, t, 0)),      # outputs
                pl.BlockSpec((TB, Hp), lambda b, t: (b, 0)),             # final h
                pl.BlockSpec((TB, Hp), lambda b, t: (b, 0)),             # final c
            ],
            scratch_shapes=[
                pltpu.VMEM((TB, Hp), jnp.float32),   # h carry
                pltpu.VMEM((TB, Hp), jnp.float32),   # c carry
            ],
        ),
        compiler_params=pltpu.CompilerParams(
            dimension_semantics=("parallel", "arbitrary"),  # batch ||, time seq
            vmem_limit_bytes=vmem_limit),
    )(preact, wh_c, h0_pad, c0_pad)

    outputs = out_pad[:B, :S, :H]
    hN = hN_pad[:B, :H][None]     # (1, B, H)
    cN = cN_pad[:B, :H][None]     # (1, B, H)
    return outputs, (hN, cN)


def lstm_reference(inputs, hidden_states, p):
    """Plain-JAX mirror of the PyTorch forward, for verification."""
    h, c = hidden_states
    outs = []
    for i in range(inputs.shape[1]):
        x = inputs[:, i, :]
        it = jax.nn.sigmoid(x @ p["w_ii"].T + p["b_ii"] + h @ p["w_hi"].T + p["b_hi"])
        ft = jax.nn.sigmoid(x @ p["w_if"].T + p["b_if"] + h @ p["w_hf"].T + p["b_hf"])
        gt = jnp.tanh(x @ p["w_ig"].T + p["b_ig"] + h @ p["w_hg"].T + p["b_hg"])
        ot = jax.nn.sigmoid(x @ p["w_io"].T + p["b_io"] + h @ p["w_ho"].T + p["b_ho"])
        c = ft * c + it * gt
        h = ot * jnp.tanh(c)
        outs.append(h)
    outputs = jnp.concatenate(outs, 0).swapaxes(0, 1)
    return outputs, (h, c)


def init_params(key, input_size, hidden_size):
    bound = (1.0 / hidden_size) ** 0.5
    names_shapes = [
        ("w_ii", (hidden_size, input_size)), ("w_if", (hidden_size, input_size)),
        ("w_ig", (hidden_size, input_size)), ("w_io", (hidden_size, input_size)),
        ("b_ii", (hidden_size,)), ("b_if", (hidden_size,)),
        ("b_ig", (hidden_size,)), ("b_io", (hidden_size,)),
        ("w_hi", (hidden_size, hidden_size)), ("w_hf", (hidden_size, hidden_size)),
        ("w_hg", (hidden_size, hidden_size)), ("w_ho", (hidden_size, hidden_size)),
        ("b_hi", (hidden_size,)), ("b_hf", (hidden_size,)),
        ("b_hg", (hidden_size,)), ("b_ho", (hidden_size,)),
    ]
    params = {}
    keys = jax.random.split(key, len(names_shapes))
    for k, (name, shape) in zip(keys, names_shapes):
        params[name] = jax.random.uniform(
            k, shape, dtype=jnp.float32, minval=-bound, maxval=bound)
    return params


if __name__ == "__main__":
    B, S, D, H = 2, 8, 32, 32   # input_size == hidden_size (docstring convention)

    root = jax.random.PRNGKey(0)
    k_param, k_x, k_h, k_c = jax.random.split(root, 4)

    params = init_params(k_param, D, H)
    inputs = jax.random.normal(k_x, (B, S, D), dtype=jnp.float32)
    h0 = jax.random.normal(k_h, (1, B, H), dtype=jnp.float32)
    c0 = jax.random.normal(k_c, (1, B, H), dtype=jnp.float32)

    out_ref, (h_ref, c_ref) = lstm_reference(inputs, (h0, c0), params)

    # f32 path — tight tolerance.
    fwd_f32 = jax.jit(functools.partial(lstm_forward, use_bf16=False))
    out, (hN, cN) = fwd_f32(inputs, (h0, c0), params)
    out = jax.block_until_ready(out)
    hN = jax.block_until_ready(hN)
    cN = jax.block_until_ready(cN)

    assert out.shape == (B, S, H) and hN.shape == (1, B, H) and cN.shape == (1, B, H)
    assert jnp.allclose(out, out_ref, atol=1e-4, rtol=1e-4)
    assert jnp.allclose(hN, h_ref, atol=1e-4, rtol=1e-4)
    assert jnp.allclose(cN, c_ref, atol=1e-4, rtol=1e-4)

    # Ragged-sequence path (exercises the padded-timestep carry mask).
    S2 = 10
    inputs2 = jax.random.normal(jax.random.PRNGKey(1), (B, S2, D), dtype=jnp.float32)
    out2_ref, (h2_ref, c2_ref) = lstm_reference(inputs2, (h0, c0), params)
    out2, (hN2, cN2) = fwd_f32(inputs2, (h0, c0), params)
    out2 = jax.block_until_ready(out2)
    assert jnp.allclose(out2, out2_ref, atol=1e-4, rtol=1e-4)
    assert jnp.allclose(hN2, h2_ref, atol=1e-4, rtol=1e-4)
    assert jnp.allclose(cN2, c2_ref, atol=1e-4, rtol=1e-4)

    # bf16-matmul path (f32 accumulation + f32 carry) — loose tolerance.
    fwd_bf16 = jax.jit(functools.partial(lstm_forward, use_bf16=True))
    out_b, (hN_b, cN_b) = fwd_bf16(inputs, (h0, c0), params)
    out_b = jax.block_until_ready(out_b)
    assert jnp.allclose(out_b, out_ref, atol=5e-2, rtol=5e-2)
    assert jnp.allclose(hN_b, h_ref, atol=5e-2, rtol=5e-2)
    assert jnp.allclose(cN_b, c_ref, atol=5e-2, rtol=5e-2)

    print("KERNEL_OK")
</pallas_src>

<mosaic_0001>
module attributes {stable_mosaic.version = 11 : i64} {
  func.func @_lstm_kernel(%arg0: i32, %arg1: i32, %arg2: memref<8x8x512xf32, #tpu.memory_space<vmem>>, %arg3: memref<128x512xf32, #tpu.memory_space<vmem>>, %arg4: memref<8x128xf32, #tpu.memory_space<vmem>>, %arg5: memref<8x128xf32, #tpu.memory_space<vmem>>, %arg6: memref<8x8x128xf32, #tpu.memory_space<vmem>>, %arg7: memref<8x128xf32, #tpu.memory_space<vmem>>, %arg8: memref<8x128xf32, #tpu.memory_space<vmem>>, %arg9: memref<8x128xf32, #tpu.memory_space<vmem>>, %arg10: memref<8x128xf32, #tpu.memory_space<vmem>>) attributes {dimension_semantics = [#tpu.dimension_semantics<parallel>, #tpu.dimension_semantics<arbitrary>], iteration_bounds = array<i64: 1, 1>, scalar_prefetch = 0 : i64, scratch_operands = 2 : i64, tpu.core_type = #tpu.core_type<tc>, window_params = [{transform_indices = @transform_0, window_bounds = array<i64: 8, 8, 512>}, {pipeline_mode = #tpu.pipeline_mode<synchronous>, transform_indices = @transform_1, window_bounds = array<i64: 128, 512>}, {transform_indices = @transform_2, window_bounds = array<i64: 8, 128>}, {transform_indices = @transform_3, window_bounds = array<i64: 8, 128>}, {transform_indices = @transform_4, window_bounds = array<i64: 8, 8, 128>}, {transform_indices = @transform_5, window_bounds = array<i64: 8, 128>}, {transform_indices = @transform_6, window_bounds = array<i64: 8, 128>}]} {
    %c0_i32 = arith.constant 0 : i32
    %0 = arith.cmpi eq, %arg1, %c0_i32 : i32
    %1 = arith.extui %0 : i1 to i32
    %c0_i32_0 = arith.constant 0 : i32
    %2 = arith.cmpi ne, %1, %c0_i32_0 : i32
    scf.if %2 {
      %c0_84 = arith.constant 0 : index
      %c0_85 = arith.constant 0 : index
      %267 = vector.load %arg4[%c0_84, %c0_85] : memref<8x128xf32, #tpu.memory_space<vmem>>, vector<8x128xf32>
      %c0_86 = arith.constant 0 : index
      %c0_87 = arith.constant 0 : index
      %268 = vector.load %arg9[%c0_86, %c0_87] : memref<8x128xf32, #tpu.memory_space<vmem>>, vector<8x128xf32>
      tpu.vector_store %arg9[%c0_86, %c0_87], %267 {strides = array<i32>} : memref<8x128xf32, #tpu.memory_space<vmem>>, vector<8x128xf32>,
      %c0_88 = arith.constant 0 : index
      %c0_89 = arith.constant 0 : index
      %269 = vector.load %arg5[%c0_88, %c0_89] : memref<8x128xf32, #tpu.memory_space<vmem>>, vector<8x128xf32>
      %c0_90 = arith.constant 0 : index
      %c0_91 = arith.constant 0 : index
      %270 = vector.load %arg10[%c0_90, %c0_91] : memref<8x128xf32, #tpu.memory_space<vmem>>, vector<8x128xf32>
      tpu.vector_store %arg10[%c0_90, %c0_91], %269 {strides = array<i32>} : memref<8x128xf32, #tpu.memory_space<vmem>>, vector<8x128xf32>,
    } else {
    }
    %c0 = arith.constant 0 : index
    %c0_1 = arith.constant 0 : index
    %3 = vector.load %arg9[%c0, %c0_1] : memref<8x128xf32, #tpu.memory_space<vmem>>, vector<8x128xf32>
    %c0_2 = arith.constant 0 : index
    %c0_3 = arith.constant 0 : index
    %4 = vector.load %arg10[%c0_2, %c0_3] : memref<8x128xf32, #tpu.memory_space<vmem>>, vector<8x128xf32>
    %c0_4 = arith.constant 0 : index
    %c0_5 = arith.constant 0 : index
    %5 = vector.load %arg3[%c0_4, %c0_5] : memref<128x512xf32, #tpu.memory_space<vmem>>, vector<128x512xf32>
    %c0_6 = arith.constant 0 : index
    %c0_7 = arith.constant 0 : index
    %c0_8 = arith.constant 0 : index
    %6 = vector.load %arg2[%c0_6, %c0_7, %c0_8] : memref<8x8x512xf32, #tpu.memory_space<vmem>>, vector<8x1x512xf32>
    %7 = vector.shape_cast %6 : vector<8x1x512xf32> to vector<8x512xf32>
    %cst = arith.constant dense<0.000000e+00> : vector<8x512xf32>
    %8 = tpu.matmul %3, %5, %cst {dimension_numbers = #tpu.dot_dimension_numbers<[1], [0], [0], [1], [0, 0, 1, 1], [], []>} : vector<8x128xf32>, vector<128x512xf32>, vector<8x512xf32> -> vector<8x512xf32>
    %9 = arith.addf %7, %8 : vector<8x512xf32>
    %10 = vector.extract_strided_slice %9 {offsets = [0, 0], sizes = [8, 128], strides = [1, 1]} : vector<8x512xf32> to vector<8x128xf32>
    %11 = arith.negf %10 : vector<8x128xf32>
    %12 = math.exp %11 : vector<8x128xf32>
    %cst_9 = arith.constant 1.000000e+00 : f32
    %13 = vector.broadcast %cst_9 : f32 to vector<8x128xf32>
    %14 = arith.addf %13, %12 : vector<8x128xf32>
    %15 = arith.divf %13, %14 : vector<8x128xf32>
    %16 = vector.extract_strided_slice %9 {offsets = [0, 128], sizes = [8, 128], strides = [1, 1]} : vector<8x512xf32> to vector<8x128xf32>
    %17 = arith.negf %16 : vector<8x128xf32>
    %18 = math.exp %17 : vector<8x128xf32>
    %cst_10 = arith.constant 1.000000e+00 : f32
    %19 = vector.broadcast %cst_10 : f32 to vector<8x128xf32>
    %20 = arith.addf %19, %18 : vector<8x128xf32>
    %21 = arith.divf %19, %20 : vector<8x128xf32>
    %22 = vector.extract_strided_slice %9 {offsets = [0, 256], sizes = [8, 128], strides = [1, 1]} : vector<8x512xf32> to vector<8x128xf32>
    %23 = math.tanh %22 : vector<8x128xf32>
    %24 = vector.extract_strided_slice %9 {offsets = [0, 384], sizes = [8, 128], strides = [1, 1]} : vector<8x512xf32> to vector<8x128xf32>
    %25 = arith.negf %24 : vector<8x128xf32>
    %26 = math.exp %25 : vector<8x128xf32>
    %cst_11 = arith.constant 1.000000e+00 : f32
    %27 = vector.broadcast %cst_11 : f32 to vector<8x128xf32>
    %28 = arith.addf %27, %26 : vector<8x128xf32>
    %29 = arith.divf %27, %28 : vector<8x128xf32>
    %30 = arith.mulf %21, %4 : vector<8x128xf32>
    %31 = arith.mulf %15, %23 : vector<8x128xf32>
    %32 = arith.addf %30, %31 : vector<8x128xf32>
    %33 = math.tanh %32 : vector<8x128xf32>
    %34 = arith.mulf %29, %33 : vector<8x128xf32>
    %c0_12 = arith.constant 0 : index
    %c0_13 = arith.constant 0 : index
    %c0_14 = arith.constant 0 : index
    %35 = vector.load %arg6[%c0_12, %c0_13, %c0_14] : memref<8x8x128xf32, #tpu.memory_space<vmem>>, vector<8x1x128xf32>
    %36 = vector.shape_cast %35 : vector<8x1x128xf32> to vector<8x128xf32>
    %37 = vector.shape_cast %34 : vector<8x128xf32> to vector<8x1x128xf32>
    tpu.vector_store %arg6[%c0_12, %c0_13, %c0_14], %37 {strides = array<i32>} : memref<8x8x128xf32, #tpu.memory_space<vmem>>, vector<8x1x128xf32>,
    %c0_15 = arith.constant 0 : index
    %c1 = arith.constant 1 : index
    %c0_16 = arith.constant 0 : index
    %38 = vector.load %arg2[%c0_15, %c1, %c0_16] : memref<8x8x512xf32, #tpu.memory_space<vmem>>, vector<8x1x512xf32>
    %39 = vector.shape_cast %38 : vector<8x1x512xf32> to vector<8x512xf32>
    %cst_17 = arith.constant dense<0.000000e+00> : vector<8x512xf32>
    %40 = tpu.matmul %34, %5, %cst_17 {dimension_numbers = #tpu.dot_dimension_numbers<[1], [0], [0], [1], [0, 0, 1, 1], [], []>} : vector<8x128xf32>, vector<128x512xf32>, vector<8x512xf32> -> vector<8x512xf32>
    %41 = arith.addf %39, %40 : vector<8x512xf32>
    %42 = vector.extract_strided_slice %41 {offsets = [0, 0], sizes = [8, 128], strides = [1, 1]} : vector<8x512xf32> to vector<8x128xf32>
    %43 = arith.negf %42 : vector<8x128xf32>
    %44 = math.exp %43 : vector<8x128xf32>
    %cst_18 = arith.constant 1.000000e+00 : f32
    %45 = vector.broadcast %cst_18 : f32 to vector<8x128xf32>
    %46 = arith.addf %45, %44 : vector<8x128xf32>
    %47 = arith.divf %45, %46 : vector<8x128xf32>
    %48 = vector.extract_strided_slice %41 {offsets = [0, 128], sizes = [8, 128], strides = [1, 1]} : vector<8x512xf32> to vector<8x128xf32>
    %49 = arith.negf %48 : vector<8x128xf32>
    %50 = math.exp %49 : vector<8x128xf32>
    %cst_19 = arith.constant 1.000000e+00 : f32
    %51 = vector.broadcast %cst_19 : f32 to vector<8x128xf32>
    %52 = arith.addf %51, %50 : vector<8x128xf32>
    %53 = arith.divf %51, %52 : vector<8x128xf32>
    %54 = vector.extract_strided_slice %41 {offsets = [0, 256], sizes = [8, 128], strides = [1, 1]} : vector<8x512xf32> to vector<8x128xf32>
    %55 = math.tanh %54 : vector<8x128xf32>
    %56 = vector.extract_strided_slice %41 {offsets = [0, 384], sizes = [8, 128], strides = [1, 1]} : vector<8x512xf32> to vector<8x128xf32>
    %57 = arith.negf %56 : vector<8x128xf32>
    %58 = math.exp %57 : vector<8x128xf32>
    %cst_20 = arith.constant 1.000000e+00 : f32
    %59 = vector.broadcast %cst_20 : f32 to vector<8x128xf32>
    %60 = arith.addf %59, %58 : vector<8x128xf32>
    %61 = arith.divf %59, %60 : vector<8x128xf32>
    %62 = arith.mulf %53, %32 : vector<8x128xf32>
    %63 = arith.mulf %47, %55 : vector<8x128xf32>
    %64 = arith.addf %62, %63 : vector<8x128xf32>
    %65 = math.tanh %64 : vector<8x128xf32>
    %66 = arith.mulf %61, %65 : vector<8x128xf32>
    %c0_21 = arith.constant 0 : index
    %c1_22 = arith.constant 1 : index
    %c0_23 = arith.constant 0 : index
    %67 = vector.load %arg6[%c0_21, %c1_22, %c0_23] : memref<8x8x128xf32, #tpu.memory_space<vmem>>, vector<8x1x128xf32>
    %68 = vector.shape_cast %67 : vector<8x1x128xf32> to vector<8x128xf32>
    %69 = vector.shape_cast %66 : vector<8x128xf32> to vector<8x1x128xf32>
    tpu.vector_store %arg6[%c0_21, %c1_22, %c0_23], %69 {strides = array<i32>} : memref<8x8x128xf32, #tpu.memory_space<vmem>>, vector<8x1x128xf32>,
    %c0_24 = arith.constant 0 : index
    %c2 = arith.constant 2 : index
    %c0_25 = arith.constant 0 : index
    %70 = vector.load %arg2[%c0_24, %c2, %c0_25] : memref<8x8x512xf32, #tpu.memory_space<vmem>>, vector<8x1x512xf32>
    %71 = vector.shape_cast %70 : vector<8x1x512xf32> to vector<8x512xf32>
    %cst_26 = arith.constant dense<0.000000e+00> : vector<8x512xf32>
    %72 = tpu.matmul %66, %5, %cst_26 {dimension_numbers = #tpu.dot_dimension_numbers<[1], [0], [0], [1], [0, 0, 1, 1], [], []>} : vector<8x128xf32>, vector<128x512xf32>, vector<8x512xf32> -> vector<8x512xf32>
    %73 = arith.addf %71, %72 : vector<8x512xf32>
    %74 = vector.extract_strided_slice %73 {offsets = [0, 0], sizes = [8, 128], strides = [1, 1]} : vector<8x512xf32> to vector<8x128xf32>
    %75 = arith.negf %74 : vector<8x128xf32>
    %76 = math.exp %75 : vector<8x128xf32>
    %cst_27 = arith.constant 1.000000e+00 : f32
    %77 = vector.broadcast %cst_27 : f32 to vector<8x128xf32>
    %78 = arith.addf %77, %76 : vector<8x128xf32>
    %79 = arith.divf %77, %78 : vector<8x128xf32>
    %80 = vector.extract_strided_slice %73 {offsets = [0, 128], sizes = [8, 128], strides = [1, 1]} : vector<8x512xf32> to vector<8x128xf32>
    %81 = arith.negf %80 : vector<8x128xf32>
    %82 = math.exp %81 : vector<8x128xf32>
    %cst_28 = arith.constant 1.000000e+00 : f32
    %83 = vector.broadcast %cst_28 : f32 to vector<8x128xf32>
    %84 = arith.addf %83, %82 : vector<8x128xf32>
    %85 = arith.divf %83, %84 : vector<8x128xf32>
    %86 = vector.extract_strided_slice %73 {offsets = [0, 256], sizes = [8, 128], strides = [1, 1]} : vector<8x512xf32> to vector<8x128xf32>
    %87 = math.tanh %86 : vector<8x128xf32>
    %88 = vector.extract_strided_slice %73 {offsets = [0, 384], sizes = [8, 128], strides = [1, 1]} : vector<8x512xf32> to vector<8x128xf32>
    %89 = arith.negf %88 : vector<8x128xf32>
    %90 = math.exp %89 : vector<8x128xf32>
    %cst_29 = arith.constant 1.000000e+00 : f32
    %91 = vector.broadcast %cst_29 : f32 to vector<8x128xf32>
    %92 = arith.addf %91, %90 : vector<8x128xf32>
    %93 = arith.divf %91, %92 : vector<8x128xf32>
    %94 = arith.mulf %85, %64 : vector<8x128xf32>
    %95 = arith.mulf %79, %87 : vector<8x128xf32>
    %96 = arith.addf %94, %95 : vector<8x128xf32>
    %97 = math.tanh %96 : vector<8x128xf32>
    %98 = arith.mulf %93, %97 : vector<8x128xf32>
    %c0_30 = arith.constant 0 : index
    %c2_31 = arith.constant 2 : index
    %c0_32 = arith.constant 0 : index
    %99 = vector.load %arg6[%c0_30, %c2_31, %c0_32] : memref<8x8x128xf32, #tpu.memory_space<vmem>>, vector<8x1x128xf32>
    %100 = vector.shape_cast %99 : vector<8x1x128xf32> to vector<8x128xf32>
    %101 = vector.shape_cast %98 : vector<8x128xf32> to vector<8x1x128xf32>
    tpu.vector_store %arg6[%c0_30, %c2_31, %c0_32], %101 {strides = array<i32>} : memref<8x8x128xf32, #tpu.memory_space<vmem>>, vector<8x1x128xf32>,
    %c0_33 = arith.constant 0 : index
    %c3 = arith.constant 3 : index
    %c0_34 = arith.constant 0 : index
    %102 = vector.load %arg2[%c0_33, %c3, %c0_34] : memref<8x8x512xf32, #tpu.memory_space<vmem>>, vector<8x1x512xf32>
    %103 = vector.shape_cast %102 : vector<8x1x512xf32> to vector<8x512xf32>
    %cst_35 = arith.constant dense<0.000000e+00> : vector<8x512xf32>
    %104 = tpu.matmul %98, %5, %cst_35 {dimension_numbers = #tpu.dot_dimension_numbers<[1], [0], [0], [1], [0, 0, 1, 1], [], []>} : vector<8x128xf32>, vector<128x512xf32>, vector<8x512xf32> -> vector<8x512xf32>
    %105 = arith.addf %103, %104 : vector<8x512xf32>
    %106 = vector.extract_strided_slice %105 {offsets = [0, 0], sizes = [8, 128], strides = [1, 1]} : vector<8x512xf32> to vector<8x128xf32>
    %107 = arith.negf %106 : vector<8x128xf32>
    %108 = math.exp %107 : vector<8x128xf32>
    %cst_36 = arith.constant 1.000000e+00 : f32
    %109 = vector.broadcast %cst_36 : f32 to vector<8x128xf32>
    %110 = arith.addf %109, %108 : vector<8x128xf32>
    %111 = arith.divf %109, %110 : vector<8x128xf32>
    %112 = vector.extract_strided_slice %105 {offsets = [0, 128], sizes = [8, 128], strides = [1, 1]} : vector<8x512xf32> to vector<8x128xf32>
    %113 = arith.negf %112 : vector<8x128xf32>
    %114 = math.exp %113 : vector<8x128xf32>
    %cst_37 = arith.constant 1.000000e+00 : f32
    %115 = vector.broadcast %cst_37 : f32 to vector<8x128xf32>
    %116 = arith.addf %115, %114 : vector<8x128xf32>
    %117 = arith.divf %115, %116 : vector<8x128xf32>
    %118 = vector.extract_strided_slice %105 {offsets = [0, 256], sizes = [8, 128], strides = [1, 1]} : vector<8x512xf32> to vector<8x128xf32>
    %119 = math.tanh %118 : vector<8x128xf32>
    %120 = vector.extract_strided_slice %105 {offsets = [0, 384], sizes = [8, 128], strides = [1, 1]} : vector<8x512xf32> to vector<8x128xf32>
    %121 = arith.negf %120 : vector<8x128xf32>
    %122 = math.exp %121 : vector<8x128xf32>
    %cst_38 = arith.constant 1.000000e+00 : f32
    %123 = vector.broadcast %cst_38 : f32 to vector<8x128xf32>
    %124 = arith.addf %123, %122 : vector<8x128xf32>
    %125 = arith.divf %123, %124 : vector<8x128xf32>
    %126 = arith.mulf %117, %96 : vector<8x128xf32>
    %127 = arith.mulf %111, %119 : vector<8x128xf32>
    %128 = arith.addf %126, %127 : vector<8x128xf32>
    %129 = math.tanh %128 : vector<8x128xf32>
    %130 = arith.mulf %125, %129 : vector<8x128xf32>
    %c0_39 = arith.constant 0 : index
    %c3_40 = arith.constant 3 : index
    %c0_41 = arith.constant 0 : index
    %131 = vector.load %arg6[%c0_39, %c3_40, %c0_41] : memref<8x8x128xf32, #tpu.memory_space<vmem>>, vector<8x1x128xf32>
    %132 = vector.shape_cast %131 : vector<8x1x128xf32> to vector<8x128xf32>
    %133 = vector.shape_cast %130 : vector<8x128xf32> to vector<8x1x128xf32>
    tpu.vector_store %arg6[%c0_39, %c3_40, %c0_41], %133 {strides = array<i32>} : memref<8x8x128xf32, #tpu.memory_space<vmem>>, vector<8x1x128xf32>,
    %c0_42 = arith.constant 0 : index
    %c4 = arith.constant 4 : index
    %c0_43 = arith.constant 0 : index
    %134 = vector.load %arg2[%c0_42, %c4, %c0_43] : memref<8x8x512xf32, #tpu.memory_space<vmem>>, vector<8x1x512xf32>
    %135 = vector.shape_cast %134 : vector<8x1x512xf32> to vector<8x512xf32>
    %cst_44 = arith.constant dense<0.000000e+00> : vector<8x512xf32>
    %136 = tpu.matmul %130, %5, %cst_44 {dimension_numbers = #tpu.dot_dimension_numbers<[1], [0], [0], [1], [0, 0, 1, 1], [], []>} : vector<8x128xf32>, vector<128x512xf32>, vector<8x512xf32> -> vector<8x512xf32>
    %137 = arith.addf %135, %136 : vector<8x512xf32>
    %138 = vector.extract_strided_slice %137 {offsets = [0, 0], sizes = [8, 128], strides = [1, 1]} : vector<8x512xf32> to vector<8x128xf32>
    %139 = arith.negf %138 : vector<8x128xf32>
    %140 = math.exp %139 : vector<8x128xf32>
    %cst_45 = arith.constant 1.000000e+00 : f32
    %141 = vector.broadcast %cst_45 : f32 to vector<8x128xf32>
    %142 = arith.addf %141, %140 : vector<8x128xf32>
    %143 = arith.divf %141, %142 : vector<8x128xf32>
    %144 = vector.extract_strided_slice %137 {offsets = [0, 128], sizes = [8, 128], strides = [1, 1]} : vector<8x512xf32> to vector<8x128xf32>
    %145 = arith.negf %144 : vector<8x128xf32>
    %146 = math.exp %145 : vector<8x128xf32>
    %cst_46 = arith.constant 1.000000e+00 : f32
    %147 = vector.broadcast %cst_46 : f32 to vector<8x128xf32>
    %148 = arith.addf %147, %146 : vector<8x128xf32>
    %149 = arith.divf %147, %148 : vector<8x128xf32>
    %150 = vector.extract_strided_slice %137 {offsets = [0, 256], sizes = [8, 128], strides = [1, 1]} : vector<8x512xf32> to vector<8x128xf32>
    %151 = math.tanh %150 : vector<8x128xf32>
    %152 = vector.extract_strided_slice %137 {offsets = [0, 384], sizes = [8, 128], strides = [1, 1]} : vector<8x512xf32> to vector<8x128xf32>
    %153 = arith.negf %152 : vector<8x128xf32>
    %154 = math.exp %153 : vector<8x128xf32>
    %cst_47 = arith.constant 1.000000e+00 : f32
    %155 = vector.broadcast %cst_47 : f32 to vector<8x128xf32>
    %156 = arith.addf %155, %154 : vector<8x128xf32>
    %157 = arith.divf %155, %156 : vector<8x128xf32>
    %158 = arith.mulf %149, %128 : vector<8x128xf32>
    %159 = arith.mulf %143, %151 : vector<8x128xf32>
    %160 = arith.addf %158, %159 : vector<8x128xf32>
    %161 = math.tanh %160 : vector<8x128xf32>
    %162 = arith.mulf %157, %161 : vector<8x128xf32>
    %c0_48 = arith.constant 0 : index
    %c4_49 = arith.constant 4 : index
    %c0_50 = arith.constant 0 : index
    %163 = vector.load %arg6[%c0_48, %c4_49, %c0_50] : memref<8x8x128xf32, #tpu.memory_space<vmem>>, vector<8x1x128xf32>
    %164 = vector.shape_cast %163 : vector<8x1x128xf32> to vector<8x128xf32>
    %165 = vector.shape_cast %162 : vector<8x128xf32> to vector<8x1x128xf32>
    tpu.vector_store %arg6[%c0_48, %c4_49, %c0_50], %165 {strides = array<i32>} : memref<8x8x128xf32, #tpu.memory_space<vmem>>, vector<8x1x128xf32>,
    %c0_51 = arith.constant 0 : index
    %c5 = arith.constant 5 : index
    %c0_52 = arith.constant 0 : index
    %166 = vector.load %arg2[%c0_51, %c5, %c0_52] : memref<8x8x512xf32, #tpu.memory_space<vmem>>, vector<8x1x512xf32>
    %167 = vector.shape_cast %166 : vector<8x1x512xf32> to vector<8x512xf32>
    %cst_53 = arith.constant dense<0.000000e+00> : vector<8x512xf32>
    %168 = tpu.matmul %162, %5, %cst_53 {dimension_numbers = #tpu.dot_dimension_numbers<[1], [0], [0], [1], [0, 0, 1, 1], [], []>} : vector<8x128xf32>, vector<128x512xf32>, vector<8x512xf32> -> vector<8x512xf32>
    %169 = arith.addf %167, %168 : vector<8x512xf32>
    %170 = vector.extract_strided_slice %169 {offsets = [0, 0], sizes = [8, 128], strides = [1, 1]} : vector<8x512xf32> to vector<8x128xf32>
    %171 = arith.negf %170 : vector<8x128xf32>
    %172 = math.exp %171 : vector<8x128xf32>
    %cst_54 = arith.constant 1.000000e+00 : f32
    %173 = vector.broadcast %cst_54 : f32 to vector<8x128xf32>
    %174 = arith.addf %173, %172 : vector<8x128xf32>
    %175 = arith.divf %173, %174 : vector<8x128xf32>
    %176 = vector.extract_strided_slice %169 {offsets = [0, 128], sizes = [8, 128], strides = [1, 1]} : vector<8x512xf32> to vector<8x128xf32>
    %177 = arith.negf %176 : vector<8x128xf32>
    %178 = math.exp %177 : vector<8x128xf32>
    %cst_55 = arith.constant 1.000000e+00 : f32
    %179 = vector.broadcast %cst_55 : f32 to vector<8x128xf32>
    %180 = arith.addf %179, %178 : vector<8x128xf32>
    %181 = arith.divf %179, %180 : vector<8x128xf32>
    %182 = vector.extract_strided_slice %169 {offsets = [0, 256], sizes = [8, 128], strides = [1, 1]} : vector<8x512xf32> to vector<8x128xf32>
    %183 = math.tanh %182 : vector<8x128xf32>
    %184 = vector.extract_strided_slice %169 {offsets = [0, 384], sizes = [8, 128], strides = [1, 1]} : vector<8x512xf32> to vector<8x128xf32>
    %185 = arith.negf %184 : vector<8x128xf32>
    %186 = math.exp %185 : vector<8x128xf32>
    %cst_56 = arith.constant 1.000000e+00 : f32
    %187 = vector.broadcast %cst_56 : f32 to vector<8x128xf32>
    %188 = arith.addf %187, %186 : vector<8x128xf32>
    %189 = arith.divf %187, %188 : vector<8x128xf32>
    %190 = arith.mulf %181, %160 : vector<8x128xf32>
    %191 = arith.mulf %175, %183 : vector<8x128xf32>
    %192 = arith.addf %190, %191 : vector<8x128xf32>
    %193 = math.tanh %192 : vector<8x128xf32>
    %194 = arith.mulf %189, %193 : vector<8x128xf32>
    %c0_57 = arith.constant 0 : index
    %c5_58 = arith.constant 5 : index
    %c0_59 = arith.constant 0 : index
    %195 = vector.load %arg6[%c0_57, %c5_58, %c0_59] : memref<8x8x128xf32, #tpu.memory_space<vmem>>, vector<8x1x128xf32>
    %196 = vector.shape_cast %195 : vector<8x1x128xf32> to vector<8x128xf32>
    %197 = vector.shape_cast %194 : vector<8x128xf32> to vector<8x1x128xf32>
    tpu.vector_store %arg6[%c0_57, %c5_58, %c0_59], %197 {strides = array<i32>} : memref<8x8x128xf32, #tpu.memory_space<vmem>>, vector<8x1x128xf32>,
    %c0_60 = arith.constant 0 : index
    %c6 = arith.constant 6 : index
    %c0_61 = arith.constant 0 : index
    %198 = vector.load %arg2[%c0_60, %c6, %c0_61] : memref<8x8x512xf32, #tpu.memory_space<vmem>>, vector<8x1x512xf32>
    %199 = vector.shape_cast %198 : vector<8x1x512xf32> to vector<8x512xf32>
    %cst_62 = arith.constant dense<0.000000e+00> : vector<8x512xf32>
    %200 = tpu.matmul %194, %5, %cst_62 {dimension_numbers = #tpu.dot_dimension_numbers<[1], [0], [0], [1], [0, 0, 1, 1], [], []>} : vector<8x128xf32>, vector<128x512xf32>, vector<8x512xf32> -> vector<8x512xf32>
    %201 = arith.addf %199, %200 : vector<8x512xf32>
    %202 = vector.extract_strided_slice %201 {offsets = [0, 0], sizes = [8, 128], strides = [1, 1]} : vector<8x512xf32> to vector<8x128xf32>
    %203 = arith.negf %202 : vector<8x128xf32>
    %204 = math.exp %203 : vector<8x128xf32>
    %cst_63 = arith.constant 1.000000e+00 : f32
    %205 = vector.broadcast %cst_63 : f32 to vector<8x128xf32>
    %206 = arith.addf %205, %204 : vector<8x128xf32>
    %207 = arith.divf %205, %206 : vector<8x128xf32>
    %208 = vector.extract_strided_slice %201 {offsets = [0, 128], sizes = [8, 128], strides = [1, 1]} : vector<8x512xf32> to vector<8x128xf32>
    %209 = arith.negf %208 : vector<8x128xf32>
    %210 = math.exp %209 : vector<8x128xf32>
    %cst_64 = arith.constant 1.000000e+00 : f32
    %211 = vector.broadcast %cst_64 : f32 to vector<8x128xf32>
    %212 = arith.addf %211, %210 : vector<8x128xf32>
    %213 = arith.divf %211, %212 : vector<8x128xf32>
    %214 = vector.extract_strided_slice %201 {offsets = [0, 256], sizes = [8, 128], strides = [1, 1]} : vector<8x512xf32> to vector<8x128xf32>
    %215 = math.tanh %214 : vector<8x128xf32>
    %216 = vector.extract_strided_slice %201 {offsets = [0, 384], sizes = [8, 128], strides = [1, 1]} : vector<8x512xf32> to vector<8x128xf32>
    %217 = arith.negf %216 : vector<8x128xf32>
    %218 = math.exp %217 : vector<8x128xf32>
    %cst_65 = arith.constant 1.000000e+00 : f32
    %219 = vector.broadcast %cst_65 : f32 to vector<8x128xf32>
    %220 = arith.addf %219, %218 : vector<8x128xf32>
    %221 = arith.divf %219, %220 : vector<8x128xf32>
    %222 = arith.mulf %213, %192 : vector<8x128xf32>
    %223 = arith.mulf %207, %215 : vector<8x128xf32>
    %224 = arith.addf %222, %223 : vector<8x128xf32>
    %225 = math.tanh %224 : vector<8x128xf32>
    %226 = arith.mulf %221, %225 : vector<8x128xf32>
    %c0_66 = arith.constant 0 : index
    %c6_67 = arith.constant 6 : index
    %c0_68 = arith.constant 0 : index
    %227 = vector.load %arg6[%c0_66, %c6_67, %c0_68] : memref<8x8x128xf32, #tpu.memory_space<vmem>>, vector<8x1x128xf32>
    %228 = vector.shape_cast %227 : vector<8x1x128xf32> to vector<8x128xf32>
    %229 = vector.shape_cast %226 : vector<8x128xf32> to vector<8x1x128xf32>
    tpu.vector_store %arg6[%c0_66, %c6_67, %c0_68], %229 {strides = array<i32>} : memref<8x8x128xf32, #tpu.memory_space<vmem>>, vector<8x1x128xf32>,
    %c0_69 = arith.constant 0 : index
    %c7 = arith.constant 7 : index
    %c0_70 = arith.constant 0 : index
    %230 = vector.load %arg2[%c0_69, %c7, %c0_70] : memref<8x8x512xf32, #tpu.memory_space<vmem>>, vector<8x1x512xf32>
    %231 = vector.shape_cast %230 : vector<8x1x512xf32> to vector<8x512xf32>
    %cst_71 = arith.constant dense<0.000000e+00> : vector<8x512xf32>
    %232 = tpu.matmul %226, %5, %cst_71 {dimension_numbers = #tpu.dot_dimension_numbers<[1], [0], [0], [1], [0, 0, 1, 1], [], []>} : vector<8x128xf32>, vector<128x512xf32>, vector<8x512xf32> -> vector<8x512xf32>
    %233 = arith.addf %231, %232 : vector<8x512xf32>
    %234 = vector.extract_strided_slice %233 {offsets = [0, 0], sizes = [8, 128], strides = [1, 1]} : vector<8x512xf32> to vector<8x128xf32>
    %235 = arith.negf %234 : vector<8x128xf32>
    %236 = math.exp %235 : vector<8x128xf32>
    %cst_72 = arith.constant 1.000000e+00 : f32
    %237 = vector.broadcast %cst_72 : f32 to vector<8x128xf32>
    %238 = arith.addf %237, %236 : vector<8x128xf32>
    %239 = arith.divf %237, %238 : vector<8x128xf32>
    %240 = vector.extract_strided_slice %233 {offsets = [0, 128], sizes = [8, 128], strides = [1, 1]} : vector<8x512xf32> to vector<8x128xf32>
    %241 = arith.negf %240 : vector<8x128xf32>
    %242 = math.exp %241 : vector<8x128xf32>
    %cst_73 = arith.constant 1.000000e+00 : f32
    %243 = vector.broadcast %cst_73 : f32 to vector<8x128xf32>
    %244 = arith.addf %243, %242 : vector<8x128xf32>
    %245 = arith.divf %243, %244 : vector<8x128xf32>
    %246 = vector.extract_strided_slice %233 {offsets = [0, 256], sizes = [8, 128], strides = [1, 1]} : vector<8x512xf32> to vector<8x128xf32>
    %247 = math.tanh %246 : vector<8x128xf32>
    %248 = vector.extract_strided_slice %233 {offsets = [0, 384], sizes = [8, 128], strides = [1, 1]} : vector<8x512xf32> to vector<8x128xf32>
    %249 = arith.negf %248 : vector<8x128xf32>
    %250 = math.exp %249 : vector<8x128xf32>
    %cst_74 = arith.constant 1.000000e+00 : f32
    %251 = vector.broadcast %cst_74 : f32 to vector<8x128xf32>
    %252 = arith.addf %251, %250 : vector<8x128xf32>
    %253 = arith.divf %251, %252 : vector<8x128xf32>
    %254 = arith.mulf %245, %224 : vector<8x128xf32>
    %255 = arith.mulf %239, %247 : vector<8x128xf32>
    %256 = arith.addf %254, %255 : vector<8x128xf32>
    %257 = math.tanh %256 : vector<8x128xf32>
    %258 = arith.mulf %253, %257 : vector<8x128xf32>
    %c0_75 = arith.constant 0 : index
    %c7_76 = arith.constant 7 : index
    %c0_77 = arith.constant 0 : index
    %259 = vector.load %arg6[%c0_75, %c7_76, %c0_77] : memref<8x8x128xf32, #tpu.memory_space<vmem>>, vector<8x1x128xf32>
    %260 = vector.shape_cast %259 : vector<8x1x128xf32> to vector<8x128xf32>
    %261 = vector.shape_cast %258 : vector<8x128xf32> to vector<8x1x128xf32>
    tpu.vector_store %arg6[%c0_75, %c7_76, %c0_77], %261 {strides = array<i32>} : memref<8x8x128xf32, #tpu.memory_space<vmem>>, vector<8x1x128xf32>,
    %c0_78 = arith.constant 0 : index
    %c0_79 = arith.constant 0 : index
    %262 = vector.load %arg9[%c0_78, %c0_79] : memref<8x128xf32, #tpu.memory_space<vmem>>, vector<8x128xf32>
    tpu.vector_store %arg9[%c0_78, %c0_79], %258 {strides = array<i32>} : memref<8x128xf32, #tpu.memory_space<vmem>>, vector<8x128xf32>,
    %c0_80 = arith.constant 0 : index
    %c0_81 = arith.constant 0 : index
    %263 = vector.load %arg10[%c0_80, %c0_81] : memref<8x128xf32, #tpu.memory_space<vmem>>, vector<8x128xf32>
    tpu.vector_store %arg10[%c0_80, %c0_81], %256 {strides = array<i32>} : memref<8x128xf32, #tpu.memory_space<vmem>>, vector<8x128xf32>,
    %c0_i32_82 = arith.constant 0 : i32
    %264 = arith.cmpi eq, %arg1, %c0_i32_82 : i32
    %265 = arith.extui %264 : i1 to i32
    %c0_i32_83 = arith.constant 0 : i32
    %266 = arith.cmpi ne, %265, %c0_i32_83 : i32
    scf.if %266 {
      %c0_84 = arith.constant 0 : index
      %c0_85 = arith.constant 0 : index
      %267 = vector.load %arg7[%c0_84, %c0_85] : memref<8x128xf32, #tpu.memory_space<vmem>>, vector<8x128xf32>
      tpu.vector_store %arg7[%c0_84, %c0_85], %258 {strides = array<i32>} : memref<8x128xf32, #tpu.memory_space<vmem>>, vector<8x128xf32>,
      %c0_86 = arith.constant 0 : index
      %c0_87 = arith.constant 0 : index
      %268 = vector.load %arg8[%c0_86, %c0_87] : memref<8x128xf32, #tpu.memory_space<vmem>>, vector<8x128xf32>
      tpu.vector_store %arg8[%c0_86, %c0_87], %256 {strides = array<i32>} : memref<8x128xf32, #tpu.memory_space<vmem>>, vector<8x128xf32>,
    } else {
    }
    return
  }
  func.func @transform_0(%arg0: i32, %arg1: i32) -> (i32, i32, i32) {
    %c0_i32 = arith.constant 0 : i32
    %c0_i32_0 = arith.constant 0 : i32
    return %arg0, %arg1, %c0_i32 : i32, i32, i32
  }
  func.func @transform_1(%arg0: i32, %arg1: i32) -> (i32, i32) {
    %c0_i32 = arith.constant 0 : i32
    %c0_i32_0 = arith.constant 0 : i32
    %c0_i32_1 = arith.constant 0 : i32
    return %c0_i32, %c0_i32_0 : i32, i32
  }
  func.func @transform_2(%arg0: i32, %arg1: i32) -> (i32, i32) {
    %c0_i32 = arith.constant 0 : i32
    %c0_i32_0 = arith.constant 0 : i32
    return %arg0, %c0_i32 : i32, i32
  }
  func.func @transform_3(%arg0: i32, %arg1: i32) -> (i32, i32) {
    %c0_i32 = arith.constant 0 : i32
    %c0_i32_0 = arith.constant 0 : i32
    return %arg0, %c0_i32 : i32, i32
  }
  func.func @transform_4(%arg0: i32, %arg1: i32) -> (i32, i32, i32) {
    %c0_i32 = arith.constant 0 : i32
    %c0_i32_0 = arith.constant 0 : i32
    return %arg0, %arg1, %c0_i32 : i32, i32, i32
  }
  func.func @transform_5(%arg0: i32, %arg1: i32) -> (i32, i32) {
    %c0_i32 = arith.constant 0 : i32
    %c0_i32_0 = arith.constant 0 : i32
    return %arg0, %c0_i32 : i32, i32
  }
  func.func @transform_6(%arg0: i32, %arg1: i32) -> (i32, i32) {
    %c0_i32 = arith.constant 0 : i32
    %c0_i32_0 = arith.constant 0 : i32
    return %arg0, %c0_i32 : i32, i32
  }
}

</mosaic_0001>

<bundles_post_ra>
// kernel: lstm_forward.1
= control target key start
LH: loop header
LB: loop body
LE: loop exit
PB: predicated region body
PF: predicated region fallthrough
CT: control target
= control target key end

     0   :  { %v8396_v3 = vmov 0.0   ;;  %s8389_s1 = inlined_call_operand.vmem [shape: f32[128,512], index: 1, kind: input, shape index: {}]   ;;  %s8390_s2 = inlined_call_operand.vmem [shape: f32[8,128], index: 2, kind: input, shape index: {}]   ;;  %s8391_s0 = inlined_call_operand.vmem [shape: f32[8,8,512], index: 0, kind: input, shape index: {}]   ;;  %s8392_s3 = inlined_call_operand.vmem [shape: f32[8,128], index: 3, kind: input, shape index: {}]   ;;  %s8393_s4 = inlined_call_operand.vmem [shape: f32[8,8,128], index: 4, kind: output, shape index: {0}]   ;;  %s8394_s6 = inlined_call_operand.vmem [shape: f32[8,128], index: 6, kind: output, shape index: {2}]   ;;  %s8395_s5 = inlined_call_operand.vmem [shape: f32[8,128], index: 5, kind: output, shape index: {1}]  }
   0x1   :  { %v31_v0 = vld [vmem:[%s8389_s1 + $0x8] sm:$0xff]  ;;  %v33_v2 = vld [vmem:[%s8389_s1 + $0x18] sm:$0xff]  ;;  %173 = vmatprep.mubr.f32.mxu0 %v8396_v3  ;;  %244 = vmatprep.mubr.f32.mxu1 %v8396_v3  ;;  %v30_v6 = vld [vmem:[%s8389_s1] sm:$0xff] }
   0x2   :  { %v35_v1 = vld [vmem:[%s8389_s1 + $0x28] sm:$0xff]  ;;  %v37_v5 = vld [vmem:[%s8389_s1 + $0x38] sm:$0xff]  ;;  %v34_v7 = vld [vmem:[%s8389_s1 + $0x20] sm:$0xff] }
   0x3   :  { %v6550_v4 = vpack.c.bf16 %v35_v1, %v31_v0  ;;  %v6561_v8 = vpack.c.bf16 %v37_v5, %v33_v2  ;;  %v6563_v9 = vpack.c.bf16 %v34_v7, %v30_v6  ;;  %v32_v10 = vld [vmem:[%s8389_s1 + $0x10] sm:$0xff]  ;;  %v39_v12 = vld [vmem:[%s8389_s1 + $0x48] sm:$0xff]  ;;  %v41_v15 = vld [vmem:[%s8389_s1 + $0x58] sm:$0xff] }
   0x4   :  { %v36_v11 = vld [vmem:[%s8389_s1 + $0x30] sm:$0xff]  ;;  %v43_v14 = vld [vmem:[%s8389_s1 + $0x68] sm:$0xff]  ;;  %v45_v16 = vld [vmem:[%s8389_s1 + $0x78] sm:$0xff] }
   0x5   :  { %8424 = vst [vmem:[#allocation4_spill] sm:$0xff] %v6550_v4  ;;  %8425 = vst [vmem:[#allocation5_spill] sm:$0xff] %v6561_v8  ;;  %4964 = vmatprep.subr.bf16.mxu0 %v6550_v4  ;;  %v6575_v13 = vpack.c.bf16 %v36_v11, %v32_v10  ;;  %4996 = vmatprep.subr.bf16.mxu1 %v6561_v8  ;;  %v6588_v17 = vpack.c.bf16 %v43_v14, %v39_v12  ;;  %v38_v19 = vld [vmem:[%s8389_s1 + $0x40] sm:$0xff]  ;;  %v40_v21 = vld [vmem:[%s8389_s1 + $0x50] sm:$0xff] }
   0x6   :  { %4966 = vmatpush1.bf16.msra.mxu0 %v6563_v9  ;;  %v6590_v18 = vpack.c.bf16 %v45_v16, %v41_v15  ;;  %v42_v20 = vld [vmem:[%s8389_s1 + $0x60] sm:$0xff]  ;;  %v44_v23 = vld [vmem:[%s8389_s1 + $0x70] sm:$0xff]  ;;  %v47_v24 = vld [vmem:[%s8389_s1 + $0x88] sm:$0xff] }
   0x7   :  { %4998 = vmatpush1.bf16.msra.mxu1 %v6575_v13  ;;  %v6602_v22 = vpack.c.bf16 %v42_v20, %v38_v19  ;;  %v51_v25 = vld [vmem:[%s8389_s1 + $0xa8] sm:$0xff]  ;;  %4968 = vmatprep.subr.bf16.mxu0 %v6588_v17  ;;  %v6615_v26 = vpack.c.bf16 %v44_v23, %v40_v21  ;;  %v49_v28 = vld [vmem:[%s8389_s1 + $0x98] sm:$0xff]  ;;  %v46_v30 = vld [vmem:[%s8389_s1 + $0x80] sm:$0xff] }
   0x8   :  { %5000 = vmatprep.subr.bf16.mxu1 %v6590_v18  ;;  %v6617_v27 = vpack.c.bf16 %v51_v25, %v47_v24  ;;  %v53_v29 = vld [vmem:[%s8389_s1 + $0xb8] sm:$0xff]  ;;  %v50_v32 = vld [vmem:[%s8389_s1 + $0xa0] sm:$0xff]  ;;  %v48_v33 = vld [vmem:[%s8389_s1 + $0x90] sm:$0xff] }
   0x9   :  { %v6628_v31 = vpack.c.bf16 %v53_v29, %v49_v28  ;;  %v52_v34 = vld [vmem:[%s8389_s1 + $0xb0] sm:$0xff]  ;;  %v6640_v35 = vpack.c.bf16 %v50_v32, %v46_v30  ;;  %v55_v36 = vld [vmem:[%s8389_s1 + $0xc8] sm:$0xff]  ;;  %v57_v38 = vld [vmem:[%s8389_s1 + $0xd8] sm:$0xff] }
   0xa   :  { %4970 = vmatpush1.bf16.msra.mxu0 %v6602_v22  ;;  %v59_v37 = vld [vmem:[%s8389_s1 + $0xe8] sm:$0xff]  ;;  %v6653_v39 = vpack.c.bf16 %v52_v34, %v48_v33  ;;  %v61_v41 = vld [vmem:[%s8389_s1 + $0xf8] sm:$0xff]  ;;  %v54_v42 = vld [vmem:[%s8389_s1 + $0xc0] sm:$0xff] }
   0xb   :  { %5002 = vmatpush1.bf16.msra.mxu1 %v6615_v26  ;;  %4972 = vmatprep.subr.bf16.mxu0 %v6617_v27  ;;  %v6655_v40 = vpack.c.bf16 %v59_v37, %v55_v36  ;;  %v58_v43 = vld [vmem:[%s8389_s1 + $0xe0] sm:$0xff]  ;;  %v6667_v44 = vpack.c.bf16 %v61_v41, %v57_v38  ;;  %v56_v45 = vld [vmem:[%s8389_s1 + $0xd0] sm:$0xff]  ;;  %v63_v47 = vld [vmem:[%s8389_s1 + $0x108] sm:$0xff] }
   0xc   :  { %5004 = vmatprep.subr.bf16.mxu1 %v6628_v31  ;;  %v60_v46 = vld [vmem:[%s8389_s1 + $0xf0] sm:$0xff]  ;;  %v67_v48 = vld [vmem:[%s8389_s1 + $0x128] sm:$0xff]  ;;  %v65_v49 = vld [vmem:[%s8389_s1 + $0x118] sm:$0xff]  ;;  %v6688_v51 = vpack.c.bf16 %v58_v43, %v54_v42 }
   0xd   :  { %v69_v50 = vld [vmem:[%s8389_s1 + $0x138] sm:$0xff]  ;;  %v6692_v52 = vpack.c.bf16 %v60_v46, %v56_v45  ;;  %v6694_v53 = vpack.c.bf16 %v67_v48, %v63_v47  ;;  %v62_v54 = vld [vmem:[%s8389_s1 + $0x100] sm:$0xff]  ;;  %v64_v56 = vld [vmem:[%s8389_s1 + $0x110] sm:$0xff] }
   0xe   :  { %4974 = vmatpush1.bf16.msra.mxu0 %v6640_v35  ;;  %v66_v55 = vld [vmem:[%s8389_s1 + $0x120] sm:$0xff]  ;;  %v6706_v57 = vpack.c.bf16 %v69_v50, %v65_v49  ;;  %v68_v58 = vld [vmem:[%s8389_s1 + $0x130] sm:$0xff]  ;;  %v71_v59 = vld [vmem:[%s8389_s1 + $0x148] sm:$0xff]  ;;  %v6503_v49 = vmov 1966171168  }
   0xf   :  { %5006 = vmatpush1.bf16.msra.mxu1 %v6653_v39  ;;  %4976 = vmatprep.subr.bf16.mxu0 %v6655_v40  ;;  %v75_v60 = vld [vmem:[%s8389_s1 + $0x168] sm:$0xff]  ;;  %v73_v61 = vld [vmem:[%s8389_s1 + $0x158] sm:$0xff]  ;;  %v6724_v63 = vpack.c.bf16 %v66_v55, %v62_v54  ;;  %v6728_v0 = vpack.c.bf16 %v68_v58, %v64_v56  ;;  %v70_v2 = vld [vmem:[%s8389_s1 + $0x140] sm:$0xff]  ;;  %v260_v50 = vunpack.c.l.s4 %v6503_v49  ;;  %v262_v54 = vlaneseq }
  0x10   :  { %5008 = vmatprep.subr.bf16.mxu1 %v6667_v44  ;;  %v77_v62 = vld [vmem:[%s8389_s1 + $0x178] sm:$0xff]  ;;  %v6730_v1 = vpack.c.bf16 %v75_v60, %v71_v59  ;;  %v74_v5 = vld [vmem:[%s8389_s1 + $0x160] sm:$0xff]  ;;  %v72_v6 = vld [vmem:[%s8389_s1 + $0x150] sm:$0xff] }
  0x11   :  { %v6742_v7 = vpack.c.bf16 %v77_v62, %v73_v61  ;;  %v76_v10 = vld [vmem:[%s8389_s1 + $0x170] sm:$0xff]  ;;  %v79_v11 = vld [vmem:[%s8389_s1 + $0x188] sm:$0xff]  ;;  %v81_v14 = vld [vmem:[%s8389_s1 + $0x198] sm:$0xff]  ;;  %v6760_v16 = vpack.c.bf16 %v74_v5, %v70_v2  ;;  %v261_v55 = vunpack.c.0.s8 %v260_v50  ;;  %v263_v56 = vshrl.u32 %v262_v54, 7 }
  0x12   :  { %4978 = vmatpush1.bf16.msra.mxu0 %v6688_v51  ;;  %v83_v12 = vld [vmem:[%s8389_s1 + $0x1a8] sm:$0xff]  ;;  %v85_v15 = vld [vmem:[%s8389_s1 + $0x1b8] sm:$0xff]  ;;  %v6764_v19 = vpack.c.bf16 %v76_v10, %v72_v6  ;;  %v78_v21 = vld [vmem:[%s8389_s1 + $0x180] sm:$0xff] }
  0x13   :  { %5010 = vmatpush1.bf16.msra.mxu1 %v6692_v52  ;;  %4980 = vmatprep.subr.bf16.mxu0 %v6694_v53  ;;  %8426 = vst [vmem:[#allocation6_spill] sm:$0xff] %v6742_v7  ;;  %8427 = vst [vmem:[#allocation7_spill] sm:$0xff] %v6760_v16  ;;  %v6766_v20 = vpack.c.bf16 %v83_v12, %v79_v11  ;;  %v82_v23 = vld [vmem:[%s8389_s1 + $0x1a0] sm:$0xff]  ;;  %v80_v24 = vld [vmem:[%s8389_s1 + $0x190] sm:$0xff]  ;;  %v6778_v25 = vpack.c.bf16 %v85_v15, %v81_v14 }
  0x14   :  { %5012 = vmatprep.subr.bf16.mxu1 %v6706_v57  ;;  %8428 = vst [vmem:[#allocation8_spill] sm:$0xff] %v6764_v19  ;;  %v84_v28 = vld [vmem:[%s8389_s1 + $0x1b0] sm:$0xff]  ;;  %v87_v29 = vld [vmem:[%s8389_s1 + $0x1c8] sm:$0xff]  ;;  %v89_v32 = vld [vmem:[%s8389_s1 + $0x1d8] sm:$0xff]  ;;  %v6796_v34 = vpack.c.bf16 %v82_v23, %v78_v21  ;;  %v6868_v59 = vsub.s32 %v261_v55, %v263_v56 }
  0x15   :  { %8429 = vst [vmem:[#allocation9_spill] sm:$0xff] %v6766_v20  ;;  %8430 = vst [vmem:[#allocation10_spill] sm:$0xff] %v6778_v25  ;;  %v91_v30 = vld [vmem:[%s8389_s1 + $0x1e8] sm:$0xff]  ;;  %v93_v33 = vld [vmem:[%s8389_s1 + $0x1f8] sm:$0xff]  ;;  %v6800_v36 = vpack.c.bf16 %v84_v28, %v80_v24 }
  0x16   :  { %4982 = vmatpush1.bf16.msra.mxu0 %v6724_v63  ;;  %8431 = vst [vmem:[#allocation11_spill] sm:$0xff] %v6796_v34  ;;  %v6802_v37 = vpack.c.bf16 %v91_v30, %v87_v29  ;;  %v86_v38 = vld [vmem:[%s8389_s1 + $0x1c0] sm:$0xff]  ;;  %v6811_v42 = vpack.c.bf16 %v93_v33, %v89_v32  ;;  %v88_v43 = vld [vmem:[%s8389_s1 + $0x1d0] sm:$0xff] }
  0x17   :  { %5014 = vmatpush1.bf16.msra.mxu1 %v6728_v0  ;;  %4984 = vmatprep.subr.bf16.mxu0 %v6730_v1  ;;  %8432 = vst [vmem:[#allocation12_spill] sm:$0xff] %v6800_v36  ;;  %v90_v41 = vld [vmem:[%s8389_s1 + $0x1e0] sm:$0xff]  ;;  %v92_v45 = vld [vmem:[%s8389_s1 + $0x1f0] sm:$0xff] }
  0x18   :  { %5016 = vmatprep.subr.bf16.mxu1 %v6742_v7  ;;  %8433 = vst [vmem:[#allocation13_spill] sm:$0xff] %v6802_v37  ;;  %8434 = vst [vmem:[#allocation14_spill] sm:$0xff] %v6811_v42  ;;  %v6820_v46 = vpack.c.bf16 %v90_v41, %v86_v38  ;;  %v6824_v47 = vpack.c.bf16 %v92_v45, %v88_v43  ;;  %v24_v48 = vld [vmem:[%s8390_s2] sm:$0xff] }
  0x19   :  { %v94_v29 = vld [vmem:[%s8391_s0] ss:$8 sm:$0xf] }
  0x1a   :  { %4986 = vmatpush1.bf16.msra.mxu0 %v6760_v16  ;;  %8435 = vst [vmem:[#allocation15_spill] sm:$0xff] %v6820_v46  ;;  %8436 = vst [vmem:[#allocation16_spill] sm:$0xff] %v6824_v47  ;;  %v4708_v30 = vld [vmem:[%s8391_s0 + $0x20] ss:$8 sm:$0xf] }
  0x1b   :  { %5018 = vmatpush1.bf16.msra.mxu1 %v6764_v19  ;;  %4988 = vmatprep.subr.bf16.mxu0 %v6766_v20  ;;  %v4709_v32 = vld [vmem:[%s8391_s0 + $0x40] ss:$8 sm:$0xf] }
  0x1c   :  { %5020 = vmatprep.subr.bf16.mxu1 %v6778_v25  ;;  %v4711_v33 = vld [vmem:[%s8391_s0 + $0x80] ss:$8 sm:$0xf] }
  0x1d   :  { %v4712_v49 = vld [vmem:[%s8391_s0 + $0xa0] ss:$8 sm:$0xf] }
  0x1e   :  { %4990 = vmatpush1.bf16.msra.mxu0 %v6796_v34  ;;  %v4713_v50 = vld [vmem:[%s8391_s0 + $0xc0] ss:$8 sm:$0xf] }
  0x1f   :  { %5022 = vmatpush1.bf16.msra.mxu1 %v6800_v36  ;;  %4992 = vmatprep.subr.bf16.mxu0 %v6802_v37 }
  0x20   :  { %5024 = vmatprep.subr.bf16.mxu1 %v6811_v42 }
  0x22   :  { %4994 = vmatpush1.bf16.msra.mxu0 %v6820_v46 }
  0x23   :  { %5026 = vmatpush1.bf16.msra.mxu1 %v6824_v47  ;;  %5028 = vmatprep.subr.bf16.mxu0 %v6550_v4 }
  0x24   :  { %5060 = vmatprep.subr.bf16.mxu1 %v6561_v8 }
  0x25   :  { %174 = vmatmul.mubr.f32.vlgmr.msra.gmra.mrb[0].mxu0 %v24_v48 }
  0x26   :  { %245 = vmatmul.mubr.f32.vlgmr.msra.gmra.mrb[0].mxu1 %v24_v48  ;;  %5030 = vmatpush1.bf16.msra.mxu0 %v6563_v9  ;;  %v4710_v48 = vld [vmem:[%s8391_s0 + $0x60] ss:$8 sm:$0xf] }
  0x27   :  { %5062 = vmatpush1.bf16.msra.mxu1 %v6575_v13  ;;  %5032 = vmatprep.subr.bf16.mxu0 %v6588_v17 }
  0x28   :  { %5064 = vmatprep.subr.bf16.mxu1 %v6590_v18  ;;  %791 = vmatprep.mubr.f32.mxu0 %v8396_v3 }
  0x29   :  { %862 = vmatprep.mubr.f32.mxu1 %v8396_v3 }
  0x2a   :  { %5034 = vmatpush1.bf16.msra.mxu0 %v6602_v22 }
  0x2b   :  { %5066 = vmatpush1.bf16.msra.mxu1 %v6615_v26  ;;  %5036 = vmatprep.subr.bf16.mxu0 %v6617_v27 }
  0x2c   :  { %5068 = vmatprep.subr.bf16.mxu1 %v6628_v31 }
  0x2e   :  { %5038 = vmatpush1.bf16.msra.mxu0 %v6640_v35 }
  0x2f   :  { %5070 = vmatpush1.bf16.msra.mxu1 %v6653_v39  ;;  %5040 = vmatprep.subr.bf16.mxu0 %v6655_v40 }
  0x30   :  { %5072 = vmatprep.subr.bf16.mxu1 %v6667_v44 }
  0x32   :  { %5042 = vmatpush1.bf16.msra.mxu0 %v6688_v51 }
  0x33   :  { %5074 = vmatpush1.bf16.msra.mxu1 %v6692_v52  ;;  %5044 = vmatprep.subr.bf16.mxu0 %v6694_v53 }
  0x34   :  { %5076 = vmatprep.subr.bf16.mxu1 %v6706_v57 }
  0x36   :  { %5046 = vmatpush1.bf16.msra.mxu0 %v6724_v63 }
  0x37   :  { %5078 = vmatpush1.bf16.msra.mxu1 %v6728_v0  ;;  %5048 = vmatprep.subr.bf16.mxu0 %v6730_v1 }
  0x38   :  { %5080 = vmatprep.subr.bf16.mxu1 %v6742_v7 }
  0x3a   :  { %5050 = vmatpush1.bf16.msra.mxu0 %v6760_v16 }
  0x3b   :  { %5082 = vmatpush1.bf16.msra.mxu1 %v6764_v19  ;;  %5052 = vmatprep.subr.bf16.mxu0 %v6766_v20 }
  0x3c   :  { %5084 = vmatprep.subr.bf16.mxu1 %v6778_v25 }
  0x3e   :  { %5054 = vmatpush1.bf16.msra.mxu0 %v6796_v34 }
  0x3f   :  { %5086 = vmatpush1.bf16.msra.mxu1 %v6800_v36  ;;  %5056 = vmatprep.subr.bf16.mxu0 %v6802_v37 }
  0x40   :  { %5088 = vmatprep.subr.bf16.mxu1 %v6811_v42 }
  0x42   :  { %5058 = vmatpush1.bf16.msra.mxu0 %v6820_v46 }
  0x43   :  { %5090 = vmatpush1.bf16.msra.mxu1 %v6824_v47  ;;  %5092 = vmatprep.subr.bf16.mxu0 %v6550_v4 }
  0x44   :  { %5124 = vmatprep.subr.bf16.mxu1 %v6561_v8 }
  0xf8   :  { %v175_v58 = vpop.f32.mrb[0].mxu0 }
  0xf9   :  { %v246_v60 = vpop.f32.mrb[0].mxu1  ;;  %v177_v61 = vpop.f32.mrb[1].mxu0 }
  0xfa   :  { %v255_v62 = vcombine.low %v175_v58, %v177_v61  ;;  %v256_v2 = vcombine.high %v175_v58, %v177_v61  ;;  %v248_v5 = vpop.f32.mrb[1].mxu1 }
  0xfb   :  { %v257_v6 = vcombine.low %v246_v60, %v248_v5  ;;  %v258_v10 = vcombine.high %v246_v60, %v248_v5  ;;  %v4714_v60 = vld [vmem:[%s8391_s0 + $0xe0] ss:$8 sm:$0xf] }
  0xfc   :  { %v265_v11 = vrot.slane %v255_v62, %v6868_v59  ;;  %v272_v12 = vrot.slane %v256_v2, %v6868_v59 }
  0xfd   :  { %v279_v14 = vrot.slane %v257_v6, %v6868_v59  ;;  %v286_v15 = vrot.slane %v258_v10, %v6868_v59 }
  0xff   :  { %v287_v21 = vcombine.low %v265_v11, %v279_v14  ;;  %v288_v23 = vcombine.high %v265_v11, %v279_v14  ;;  %v289_v24 = vcombine.low %v272_v12, %v286_v15  ;;  %v290_v28 = vcombine.high %v272_v12, %v286_v15 }
 0x101   :  { %v297_v38 = vrot.slane %v287_v21, %v6868_v59  ;;  %v304_v41 = vrot.slane %v289_v24, %v6868_v59  ;;  %v311_v43 = vrot.slane %v288_v23, %v6868_v59  ;;  %v318_v45 = vrot.slane %v290_v28, %v6868_v59 }
 0x103   :  { %v319_v54 = vcombine.high %v297_v38, %v297_v38  ;;  %v320_v55 = vcombine.high %v304_v41, %v304_v41  ;;  %v321_v56 = vcombine.high %v311_v43, %v311_v43  ;;  %v322_v58 = vcombine.high %v318_v45, %v318_v45 }
 0x104   :  { %v6902_v61 = vadd.f32 %v297_v38, %v94_v29  ;;  %v6904_v62 = vadd.f32 %v4708_v30, %v311_v43  ;;  %v6906_v2 = vadd.f32 %v4711_v33, %v304_v41  ;;  %v6912_v10 = vadd.f32 %v4712_v49, %v318_v45 }
 0x105   :  { %v6908_v5 = vadd.f32 %v4709_v32, %v319_v54  ;;  %v6910_v6 = vadd.f32 %v4710_v48, %v321_v56  ;;  %v6914_v11 = vadd.f32 %v4713_v50, %v320_v55  ;;  %v6918_v15 = vadd.f32 %v4714_v60, %v322_v58 }
 0x106   :  { %v4715_v12 = vmul.f32 -1.442695, %v6902_v61  ;;  %v4716_v14 = vmul.f32 -1.442695, %v6904_v62  ;;  %v4719_v24 = vmul.f32 -1.442695, %v6906_v2 }
 0x107   :  { %v4717_v21 = vmul.f32 -1.442695, %v6908_v5  ;;  %v4718_v23 = vmul.f32 -1.442695, %v6910_v6  ;;  %v395_v28 = vrot.slane %v6902_v61, 1  ;;  %v396_v30 = vrot.slane %v6904_v62, 1 }
 0x108   :  { %5478 = vpow2.f32 %v4715_v12  ;;  %v4720_v29 = vmul.f32 -1.442695, %v6912_v10  ;;  %v4721_v32 = vmul.f32 -1.442695, %v6914_v11  ;;  %v397_v33 = vrot.slane %v6908_v5, 1 }
 0x109   :  { %5480 = vpow2.f32 %v4716_v14  ;;  %v4722_v38 = vmul.f32 -1.442695, %v6918_v15  ;;  %v398_v41 = vrot.slane %v6910_v6, 1  ;;  %v399_v43 = vrot.slane %v6906_v2, 1 }
 0x10a   :  { %5482 = vpow2.f32 %v4717_v21  ;;  %v4723_v45 = vmul.f32 -1.442695, %v395_v28  ;;  %v4724_v48 = vmul.f32 -1.442695, %v396_v30  ;;  %v4725_v49 = vmul.f32 -1.442695, %v397_v33 }
 0x10b   :  { %5484 = vpow2.f32 %v4718_v23  ;;  %v4726_v50 = vmul.f32 -1.442695, %v398_v41  ;;  %v4727_v54 = vmul.f32 -1.442695, %v399_v43  ;;  %v400_v23 = vrot.slane %v6912_v10, 1 }
 0x10c   :  { %5486 = vpow2.f32 %v4719_v24  ;;  %v402_v33 = vrot.slane %v6918_v15, 1  ;;  %v464_v4 = vrot.slane %v6912_v10, 2 }
 0x10d   :  { %5488 = vpow2.f32 %v4720_v29  ;;  %v401_v29 = vrot.slane %v6914_v11, 1 }
 0x10e   :  { %5490 = vpow2.f32 %v4721_v32 }
 0x10f   :  { %5492 = vpow2.f32 %v4722_v38 }
 0x110   :  { %5494 = vpow2.f32 %v4723_v45 }
 0x111   :  { %5496 = vpow2.f32 %v4724_v48  ;;  %v4728_v48 = vmul.f32 -1.442695, %v400_v23 }
 0x112   :  { %v5479_v55 = vpop.eup %5478  ;;  %5498 = vpow2.f32 %v4725_v49 }
 0x113   :  { %v5481_v56 = vpop.eup %5480  ;;  %v363_v58 = vadd.f32 1.0, %v5479_v55  ;;  %5500 = vpow2.f32 %v4726_v50 }
 0x114   :  { %v5483_v60 = vpop.eup %5482  ;;  %v364_v12 = vadd.f32 1.0, %v5481_v56  ;;  %5502 = vpow2.f32 %v4727_v54  ;;  %v4729_v54 = vmul.f32 -1.442695, %v401_v29  ;;  %v4730_v56 = vmul.f32 -1.442695, %v402_v33 }
 0x115   :  { %v5485_v14 = vpop.eup %5484  ;;  %v365_v21 = vadd.f32 1.0, %v5483_v60  ;;  %5504 = vrcp.f32 %v363_v58  ;;  %v459_v33 = vrot.slane %v6902_v61, 2 }
 0x116   :  { %v5487_v24 = vpop.eup %5486  ;;  %v366_v28 = vadd.f32 1.0, %v5485_v14  ;;  %5506 = vrcp.f32 %v364_v12 }
 0x117   :  { %v5489_v30 = vpop.eup %5488  ;;  %v367_v32 = vadd.f32 1.0, %v5487_v24  ;;  %5508 = vrcp.f32 %v365_v21 }
 0x118   :  { %v5491_v38 = vpop.eup %5490  ;;  %v368_v41 = vadd.f32 1.0, %v5489_v30  ;;  %5510 = vrcp.f32 %v366_v28 }
 0x119   :  { %v5493_v43 = vpop.eup %5492  ;;  %v369_v45 = vadd.f32 1.0, %v5491_v38  ;;  %5512 = vrcp.f32 %v367_v32 }
 0x11a   :  { %v5495_v49 = vpop.eup %5494  ;;  %v370_v50 = vadd.f32 1.0, %v5493_v43  ;;  %5514 = vrcp.f32 %v368_v41  ;;  %v460_v41 = vrot.slane %v6904_v62, 2  ;;  %v26_v43 = vld [vmem:[%s8392_s3] sm:$0xff] }
 0x11b   :  { %v5497_v55 = vpop.eup %5496  ;;  %5516 = vrcp.f32 %v369_v45  ;;  %v435_v60 = vadd.f32 1.0, %v5495_v49  ;;  %v555_v49 = vrot.slane %v26_v43, %v6868_v59 }
 0x11c   :  { %v5499_v58 = vpop.eup %5498  ;;  %5518 = vrcp.f32 %v370_v50  ;;  %v436_v14 = vadd.f32 1.0, %v5497_v55 }
 0x11d   :  { %v5501_v12 = vpop.eup %5500  ;;  %5520 = vpow2.f32 %v4728_v48  ;;  %v437_v24 = vadd.f32 1.0, %v5499_v58  ;;  %v461_v48 = vrot.slane %v6908_v5, 2 }
 0x11e   :  { %v5503_v21 = vpop.eup %5502  ;;  %5522 = vpow2.f32 %v4729_v54  ;;  %v438_v23 = vadd.f32 1.0, %v5501_v12  ;;  %v462_v54 = vrot.slane %v6910_v6, 2  ;;  %v548_v12 = vcombine.high %v26_v43, %v26_v43 }
 0x11f   :  { %v6934_v28 = vpop.eup %5504  ;;  %5524 = vpow2.f32 %v4730_v56  ;;  %v439_v32 = vadd.f32 1.0, %v5503_v21  ;;  %v463_v56 = vrot.slane %v6906_v2, 2  ;;  %v465_v43 = vrot.slane %v6914_v11, 2 }
 0x120   :  { %v6936_v30 = vpop.eup %5506  ;;  %5526 = vrcp.f32 %v435_v60 }
 0x121   :  { %v6938_v29 = vpop.eup %5508  ;;  %5528 = vrcp.f32 %v436_v14  ;;  %v563_v14 = vcombine.high %v555_v49, %v555_v49 }
 0x122   :  { %v6941_v38 = vpop.eup %5510  ;;  %5530 = vrcp.f32 %v437_v24 }
 0x123   :  { %v6947_v45 = vpop.eup %5512  ;;  %5532 = vrcp.f32 %v438_v23  ;;  %v483_v23 = vrot.slane %v6902_v61, 3  ;;  %v466_v61 = vrot.slane %v6918_v15, 2 }
 0x124   :  { %v6951_v50 = vpop.eup %5514  ;;  %5534 = vrcp.f32 %v439_v32  ;;  %v571_v32 = vrot.slane %v555_v49, %v6868_v59  ;;  %v486_v49 = vrot.slane %v6910_v6, 3 }
 0x125   :  { %v6954_v55 = vpop.eup %5516  ;;  %5536 = vtanh.f32 %v459_v33  ;;  %v484_v33 = vrot.slane %v6904_v62, 3  ;;  %v4731_v62 = vmul.f32 -1.442695, %v483_v23 }
 0x126   :  { %v6957_v58 = vpop.eup %5518  ;;  %5538 = vtanh.f32 %v460_v41  ;;  %v593_v6 = vcombine.high %v571_v32, %v571_v32 }
 0x127   :  { %v5521_v60 = vpop.eup %5520  ;;  %5540 = vtanh.f32 %v461_v48  ;;  %v485_v48 = vrot.slane %v6908_v5, 3  ;;  %v562_v5 = vrot.slane %v548_v12, %v6868_v59 }
 0x128   :  { %v5523_v21 = vpop.eup %5522  ;;  %v440_v24 = vadd.f32 1.0, %v5521_v60  ;;  %5542 = vtanh.f32 %v462_v54  ;;  %v585_v54 = vrot.slane %v563_v14, %v6868_v59  ;;  %v490_v14 = vrot.slane %v6918_v15, 3 }
 0x129   :  { %v5525_v3 = vpop.eup %5524  ;;  %v441_v8 = vadd.f32 1.0, %v5523_v21  ;;  %5544 = vtanh.f32 %v463_v56  ;;  %v487_v56 = vrot.slane %v6906_v2, 3  ;;  %v4733_v37 = vmul.f32 -1.442695, %v485_v48 }
 0x12a   :  { %v5527_v47 = vpop.eup %5526  ;;  %v442_v41 = vadd.f32 1.0, %v5525_v3  ;;  %5546 = vrcp.f32 %v440_v24  ;;  %v488_v3 = vrot.slane %v6912_v10, 3  ;;  %v4732_v24 = vmul.f32 -1.442695, %v484_v33 }
 0x12b   :  { %v5529_v60 = vpop.eup %5528  ;;  %5548 = vrcp.f32 %v441_v8  ;;  %v489_v8 = vrot.slane %v6914_v11, 3  ;;  %v595_v2 = vcombine.high %v585_v54, %v585_v54  ;;  %v578_v10 = vrot.slane %v562_v5, %v6868_v59 }
 0x12c   :  { %v5531_v21 = vpop.eup %5530  ;;  %5550 = vrcp.f32 %v442_v41  ;;  %v4734_v41 = vmul.f32 -1.442695, %v486_v49  ;;  %v605_v33 = vmul.f32 %v5527_v47, %v571_v32  ;;  %v4736_v12 = vmul.f32 -1.442695, %v488_v3 }
 0x12d   :  { %v5533_v46 = vpop.eup %5532  ;;  %5552 = vtanh.f32 %v464_v4  ;;  %v4735_v4 = vmul.f32 -1.442695, %v487_v56  ;;  %v606_v25 = vmul.f32 %v5529_v60, %v585_v54  ;;  %v4737_v48 = vmul.f32 -1.442695, %v489_v8 }
 0x12e   :  { %v5535_v42 = vpop.eup %5534  ;;  %5554 = vtanh.f32 %v465_v43  ;;  %v564_v43 = vcombine.high %v562_v5, %v562_v5  ;;  %v607_v20 = vmul.f32 %v5531_v21, %v593_v6  ;;  %v4738_v49 = vmul.f32 -1.442695, %v490_v14 }
 0x12f   :  { %v5537_v36 = vpop.eup %5536  ;;  %5556 = vtanh.f32 %v466_v61  ;;  %v608_v56 = vmul.f32 %v5533_v46, %v595_v2  ;;  %v609_v32 = vmul.f32 %v5535_v42, %v578_v10 }
 0x130   :  { %v5539_v23 = vpop.eup %5538  ;;  %5558 = vpow2.f32 %v4731_v62  ;;  %v613_v61 = vmul.f32 %v5537_v36, %v6934_v28 }
 0x131   :  { %v5541_v34 = vpop.eup %5540  ;;  %5560 = vpow2.f32 %v4732_v24  ;;  %v614_v62 = vmul.f32 %v5539_v23, %v6936_v30  ;;  %v592_v30 = vrot.slane %v564_v43, %v6868_v59  ;;  %v594_v24 = vcombine.high %v578_v10, %v578_v10 }
 0x132   :  { %v5543_v11 = vpop.eup %5542  ;;  %5562 = vpow2.f32 %v4733_v37  ;;  %v615_v47 = vmul.f32 %v5541_v34, %v6938_v29  ;;  %v6977_v3 = vadd.f32 %v613_v61, %v605_v33 }
 0x133   :  { %v5545_v15 = vpop.eup %5544  ;;  %5564 = vpow2.f32 %v4734_v41  ;;  %v616_v37 = vmul.f32 %v5543_v11, %v6941_v38  ;;  %v6980_v54 = vadd.f32 %v614_v62, %v606_v25  ;;  %v596_v5 = vcombine.high %v592_v30, %v592_v30 }
 0x134   :  { %v5547_v19 = vpop.eup %5546  ;;  %5566 = vpow2.f32 %v4735_v4  ;;  %v617_v28 = vmul.f32 %v5545_v15, %v6947_v45  ;;  %v6983_v21 = vadd.f32 %v615_v47, %v607_v20 }
 0x135   :  { %v5549_v60 = vpop.eup %5548  ;;  %5568 = vpow2.f32 %v4736_v12  ;;  %v6986_v34 = vadd.f32 %v616_v37, %v608_v56  ;;  %v610_v2 = vmul.f32 %v5547_v19, %v592_v30 }
 0x136   :  { %v5551_v36 = vpop.eup %5550  ;;  %5570 = vpow2.f32 %v4737_v48  ;;  %v6988_v29 = vadd.f32 %v617_v28, %v609_v32  ;;  %v611_v33 = vmul.f32 %v5549_v60, %v594_v24 }
 0x137   :  { %v5553_v46 = vpop.eup %5552  ;;  %5572 = vpow2.f32 %v4738_v49  ;;  %v612_v11 = vmul.f32 %v5551_v36, %v596_v5 }
 0x138   :  { %v5555_v42 = vpop.eup %5554  ;;  %5574 = vtanh.f32 %v6977_v3  ;;  %v618_v43 = vmul.f32 %v5553_v46, %v6951_v50 }
 0x139   :  { %v5557_v38 = vpop.eup %5556  ;;  %5576 = vtanh.f32 %v6980_v54  ;;  %v619_v15 = vmul.f32 %v5555_v42, %v6954_v55 }
 0x13a   :  { %v5559_v25 = vpop.eup %5558  ;;  %5578 = vtanh.f32 %v6983_v21  ;;  %v620_v19 = vmul.f32 %v5557_v38, %v6957_v58  ;;  %v6998_v56 = vadd.f32 %v618_v43, %v610_v2 }
 0x13b   :  { %v5561_v20 = vpop.eup %5560  ;;  %v523_v45 = vadd.f32 1.0, %v5559_v25  ;;  %5580 = vtanh.f32 %v6986_v34  ;;  %v7000_v60 = vadd.f32 %v619_v15, %v611_v33 }
 0x13c   :  { %v5563_v8 = vpop.eup %5562  ;;  %v524_v6 = vadd.f32 1.0, %v5561_v20  ;;  %5582 = vtanh.f32 %v6988_v29  ;;  %v7002_v50 = vadd.f32 %v620_v19, %v612_v11 }
 0x13d   :  { %v5565_v14 = vpop.eup %5564  ;;  %v525_v41 = vadd.f32 1.0, %v5563_v8  ;;  %5584 = vrcp.f32 %v523_v45 }
 0x13e   :  { %v5567_v23 = vpop.eup %5566  ;;  %v526_v4 = vadd.f32 1.0, %v5565_v14  ;;  %5586 = vrcp.f32 %v524_v6 }
 0x13f   :  { %v5569_v10 = vpop.eup %5568  ;;  %v527_v12 = vadd.f32 1.0, %v5567_v23  ;;  %5588 = vrcp.f32 %v525_v41 }
 0x140   :  { %v5571_v48 = vpop.eup %5570  ;;  %v528_v61 = vadd.f32 1.0, %v5569_v10  ;;  %5590 = vrcp.f32 %v526_v4 }
 0x141   :  { %v5573_v49 = vpop.eup %5572  ;;  %v529_v62 = vadd.f32 1.0, %v5571_v48  ;;  %5592 = vrcp.f32 %v527_v12 }
 0x142   :  { %v5575_v47 = vpop.eup %5574  ;;  %v530_v32 = vadd.f32 1.0, %v5573_v49  ;;  %5594 = vrcp.f32 %v528_v61 }
 0x143   :  { %v5577_v37 = vpop.eup %5576  ;;  %5596 = vrcp.f32 %v529_v62 }
 0x144   :  { %v5579_v36 = vpop.eup %5578  ;;  %5598 = vrcp.f32 %v530_v32 }
 0x145   :  { %v5581_v28 = vpop.eup %5580  ;;  %5600 = vtanh.f32 %v6998_v56 }
 0x146   :  { %v5583_v55 = vpop.eup %5582  ;;  %5602 = vtanh.f32 %v7000_v60 }
 0x147   :  { %v5585_v58 = vpop.eup %5584  ;;  %5604 = vtanh.f32 %v7002_v50 }
 0x148   :  { %v5587_v46 = vpop.eup %5586  ;;  %v637_v30 = vmul.f32 %v5585_v58, %v5575_v47  ;;  %v8439_v58 = vld [vmem:[#allocation9_spill] sm:$0xff] }
 0x149   :  { %v5589_v42 = vpop.eup %5588  ;;  %v638_v38 = vmul.f32 %v5587_v46, %v5577_v37  ;;  %v8440_v46 = vld [vmem:[#allocation10_spill] sm:$0xff] }
 0x14a   :  { %v5591_v25 = vpop.eup %5590  ;;  %v639_v24 = vmul.f32 %v5589_v42, %v5579_v36  ;;  %645 = vst [vmem:[%s8393_s4] sm:$0x1] %v637_v30  ;;  %v8442_v42 = vld [vmem:[#allocation12_spill] sm:$0xff] }
 0x14b   :  { %v5593_v20 = vpop.eup %5592  ;;  %v640_v45 = vmul.f32 %v5591_v25, %v5581_v28  ;;  %646 = vst [vmem:[%s8393_s4 + $0x8] sm:$0x1] %v638_v38  ;;  %v677_v5 = vcombine.low %v637_v30, %v638_v38  ;;  %v8437_v28 = vmov 0.0   ;;  %v8441_v30 = vld [vmem:[#allocation11_spill] sm:$0xff]  ;;  %v8443_v38 = vld [vmem:[#allocation13_spill] sm:$0xff]  ;;  %v8444_v25 = vld [vmem:[#allocation14_spill] sm:$0xff] }
 0x14c   :  { %v5595_v8 = vpop.eup %5594  ;;  %v641_v6 = vmul.f32 %v5593_v20, %v5583_v55  ;;  %647 = vst [vmem:[%s8393_s4 + $0x10] sm:$0x1] %v639_v24  ;;  %v8438_v55 = vld [vmem:[#allocation8_spill] sm:$0xff] }
 0x14d   :  { %v5597_v14 = vpop.eup %5596  ;;  %648 = vst [vmem:[%s8393_s4 + $0x18] sm:$0x1] %v640_v45  ;;  %v678_v41 = vcombine.low %v639_v24, %v640_v45  ;;  %v687_v4 = vrot.slane %v677_v5, %v6868_v59  ;;  %v8445_v24 = vld [vmem:[#allocation15_spill] sm:$0xff]  ;;  %v8446_v20 = vld [vmem:[#allocation16_spill] sm:$0xff]  ;;  %v8448_v5 = vld [vmem:[#allocation5_spill] sm:$0xff] }
 0x14e   :  { %v5599_v2 = vpop.eup %5598  ;;  %649 = vst [vmem:[%s8393_s4 + $0x20] sm:$0x1] %v641_v6  ;;  %v8447_v45 = vld [vmem:[#allocation4_spill] sm:$0xff] }
 0x14f   :  { %v5601_v23 = vpop.eup %5600  ;;  %v694_v33 = vrot.slane %v678_v41, %v6868_v59 }
 0x150   :  { %v5603_v10 = vpop.eup %5602  ;;  %v642_v12 = vmul.f32 %v5601_v23, %v5595_v8 }
 0x151   :  { %v5605_v43 = vpop.eup %5604  ;;  %v643_v11 = vmul.f32 %v5603_v10, %v5597_v14  ;;  %v709_v48 = vcombine.low %v687_v4, %v694_v33 }
 0x152   :  { %v644_v61 = vmul.f32 %v5605_v43, %v5599_v2  ;;  %650 = vst [vmem:[%s8393_s4 + $0x28] sm:$0x1] %v642_v12  ;;  %v679_v15 = vcombine.low %v641_v6, %v642_v12 }
 0x153   :  { %651 = vst [vmem:[%s8393_s4 + $0x30] sm:$0x1] %v643_v11  ;;  %v717_v32 = vrot.slane %v709_v48, %v6868_v59 }
 0x154   :  { %652 = vst [vmem:[%s8393_s4 + $0x38] sm:$0x1] %v644_v61  ;;  %v680_v49 = vcombine.low %v643_v11, %v644_v61  ;;  %v701_v62 = vrot.slane %v679_v15, %v6868_v59 }
 0x156   :  { %v708_v19 = vrot.slane %v680_v49, %v6868_v59 }
 0x158   :  { %v710_v47 = vcombine.low %v701_v62, %v708_v19  ;;  %v4739_v62 = vld [vmem:[%s8391_s0 + $0x1] ss:$8 sm:$0xf] }
 0x159   :  { %v4740_v19 = vld [vmem:[%s8391_s0 + $0x21] ss:$8 sm:$0xf] }
 0x15a   :  { %v724_v37 = vrot.slane %v710_v47, %v6868_v59  ;;  %v4741_v47 = vld [vmem:[%s8391_s0 + $0x41] ss:$8 sm:$0xf] }
 0x15c   :  { %v725_v36 = vcombine.low %v717_v32, %v724_v37  ;;  %v4743_v32 = vld [vmem:[%s8391_s0 + $0x81] ss:$8 sm:$0xf] }
 0x15e   :  { %792 = vmatmul.mubr.f32.vlgmr.msra.gmra.mrb[2].mxu0 %v725_v36  ;;  %863 = vmatmul.mubr.f32.vlgmr.msra.gmra.mrb[2].mxu1 %v725_v36 }
 0x15f   :  { %5094 = vmatpush1.bf16.msra.mxu0 %v6563_v9  ;;  %5126 = vmatpush1.bf16.msra.mxu1 %v6575_v13 }
 0x160   :  { %5096 = vmatprep.subr.bf16.mxu0 %v6588_v17  ;;  %5128 = vmatprep.subr.bf16.mxu1 %v6590_v18 }
 0x161   :  { %1351 = vmatprep.mubr.f32.mxu0 %v8437_v28  ;;  %1422 = vmatprep.mubr.f32.mxu1 %v8437_v28 }
 0x163   :  { %5098 = vmatpush1.bf16.msra.mxu0 %v6602_v22  ;;  %5130 = vmatpush1.bf16.msra.mxu1 %v6615_v26 }
 0x164   :  { %5100 = vmatprep.subr.bf16.mxu0 %v6617_v27  ;;  %5132 = vmatprep.subr.bf16.mxu1 %v6628_v31 }
 0x167   :  { %5102 = vmatpush1.bf16.msra.mxu0 %v6640_v35  ;;  %5134 = vmatpush1.bf16.msra.mxu1 %v6653_v39 }
 0x168   :  { %5104 = vmatprep.subr.bf16.mxu0 %v6655_v40  ;;  %5136 = vmatprep.subr.bf16.mxu1 %v6667_v44 }
 0x16b   :  { %5106 = vmatpush1.bf16.msra.mxu0 %v6688_v51  ;;  %5138 = vmatpush1.bf16.msra.mxu1 %v6692_v52 }
 0x16c   :  { %5108 = vmatprep.subr.bf16.mxu0 %v6694_v53  ;;  %5140 = vmatprep.subr.bf16.mxu1 %v6706_v57 }
 0x16f   :  { %5110 = vmatpush1.bf16.msra.mxu0 %v6724_v63  ;;  %5142 = vmatpush1.bf16.msra.mxu1 %v6728_v0 }
 0x170   :  { %5112 = vmatprep.subr.bf16.mxu0 %v6730_v1  ;;  %5144 = vmatprep.subr.bf16.mxu1 %v6742_v7 }
 0x173   :  { %5114 = vmatpush1.bf16.msra.mxu0 %v6760_v16  ;;  %5146 = vmatpush1.bf16.msra.mxu1 %v8438_v55 }
 0x174   :  { %5116 = vmatprep.subr.bf16.mxu0 %v8439_v58  ;;  %5148 = vmatprep.subr.bf16.mxu1 %v8440_v46 }
 0x177   :  { %5118 = vmatpush1.bf16.msra.mxu0 %v8441_v30  ;;  %5150 = vmatpush1.bf16.msra.mxu1 %v8442_v42 }
 0x178   :  { %5120 = vmatprep.subr.bf16.mxu0 %v8443_v38  ;;  %5152 = vmatprep.subr.bf16.mxu1 %v8444_v25 }
 0x17b   :  { %5122 = vmatpush1.bf16.msra.mxu0 %v8445_v24  ;;  %5154 = vmatpush1.bf16.msra.mxu1 %v8446_v20 }
 0x17c   :  { %5156 = vmatprep.subr.bf16.mxu0 %v8447_v45  ;;  %5188 = vmatprep.subr.bf16.mxu1 %v8448_v5 }
 0x231   :  { %v793_v8 = vpop.f32.mrb[2].mxu0  ;;  %v864_v6 = vpop.f32.mrb[2].mxu1 }
 0x232   :  { %v795_v14 = vpop.f32.mrb[3].mxu0  ;;  %v866_v41 = vpop.f32.mrb[3].mxu1 }
 0x233   :  { %v873_v2 = vcombine.low %v793_v8, %v795_v14  ;;  %v874_v23 = vcombine.high %v793_v8, %v795_v14  ;;  %v875_v4 = vcombine.low %v864_v6, %v866_v41  ;;  %v876_v33 = vcombine.high %v864_v6, %v866_v41  ;;  %v4742_v14 = vld [vmem:[%s8391_s0 + $0x61] ss:$8 sm:$0xf] }
 0x234   :  { %v4744_v41 = vld [vmem:[%s8391_s0 + $0xa1] ss:$8 sm:$0xf] }
 0x235   :  { %v883_v10 = vrot.slane %v873_v2, %v6868_v59  ;;  %v890_v12 = vrot.slane %v874_v23, %v6868_v59  ;;  %v897_v43 = vrot.slane %v875_v4, %v6868_v59  ;;  %v904_v11 = vrot.slane %v876_v33, %v6868_v59  ;;  %v4745_v2 = vld [vmem:[%s8391_s0 + $0xc1] ss:$8 sm:$0xf] }
 0x237   :  { %v905_v48 = vcombine.low %v883_v10, %v897_v43  ;;  %v906_v61 = vcombine.high %v883_v10, %v897_v43  ;;  %v907_v15 = vcombine.low %v890_v12, %v904_v11  ;;  %v908_v49 = vcombine.high %v890_v12, %v904_v11  ;;  %v4746_v12 = vld [vmem:[%s8391_s0 + $0xe1] ss:$8 sm:$0xf] }
 0x239   :  { %v915_v37 = vrot.slane %v905_v48, %v6868_v59  ;;  %v922_v36 = vrot.slane %v907_v15, %v6868_v59  ;;  %v929_v8 = vrot.slane %v906_v61, %v6868_v59  ;;  %v936_v6 = vrot.slane %v908_v49, %v6868_v59 }
 0x23b   :  { %v937_v23 = vcombine.high %v915_v37, %v915_v37  ;;  %v938_v4 = vcombine.high %v922_v36, %v922_v36  ;;  %v939_v33 = vcombine.high %v929_v8, %v929_v8  ;;  %v940_v10 = vcombine.high %v936_v6, %v936_v6 }
 0x23c   :  { %v7103_v43 = vadd.f32 %v4739_v62, %v915_v37  ;;  %v7105_v11 = vadd.f32 %v4740_v19, %v929_v8  ;;  %v7107_v48 = vadd.f32 %v4743_v32, %v922_v36  ;;  %v7113_v49 = vadd.f32 %v4744_v41, %v936_v6 }
 0x23d   :  { %v7109_v61 = vadd.f32 %v4741_v47, %v937_v23  ;;  %v7111_v15 = vadd.f32 %v4742_v14, %v939_v33  ;;  %v7115_v5 = vadd.f32 %v4745_v2, %v938_v4  ;;  %v7119_v24 = vadd.f32 %v4746_v12, %v940_v10 }
 0x23e   :  { %v4747_v45 = vmul.f32 -1.442695, %v7103_v43  ;;  %v4748_v20 = vmul.f32 -1.442695, %v7105_v11  ;;  %v4751_v47 = vmul.f32 -1.442695, %v7107_v48 }
 0x23f   :  { %v4749_v62 = vmul.f32 -1.442695, %v7109_v61  ;;  %v4750_v19 = vmul.f32 -1.442695, %v7111_v15  ;;  %v1013_v32 = vrot.slane %v7103_v43, 1  ;;  %v1014_v36 = vrot.slane %v7105_v11, 1 }
 0x240   :  { %5606 = vpow2.f32 %v4747_v45  ;;  %v4752_v37 = vmul.f32 -1.442695, %v7113_v49  ;;  %v4753_v8 = vmul.f32 -1.442695, %v7115_v5  ;;  %v1015_v6 = vrot.slane %v7109_v61, 1 }
 0x241   :  { %5608 = vpow2.f32 %v4748_v20  ;;  %v4754_v14 = vmul.f32 -1.442695, %v7119_v24  ;;  %v1016_v41 = vrot.slane %v7111_v15, 1  ;;  %v1017_v45 = vrot.slane %v7107_v48, 1 }
 0x242   :  { %5610 = vpow2.f32 %v4749_v62  ;;  %v4755_v2 = vmul.f32 -1.442695, %v1013_v32  ;;  %v4756_v20 = vmul.f32 -1.442695, %v1014_v36  ;;  %v4757_v23 = vmul.f32 -1.442695, %v1015_v6 }
 0x243   :  { %5612 = vpow2.f32 %v4750_v19  ;;  %v4758_v4 = vmul.f32 -1.442695, %v1016_v41  ;;  %v4759_v33 = vmul.f32 -1.442695, %v1017_v45  ;;  %v1018_v32 = vrot.slane %v7113_v49, 1 }
 0x244   :  { %5614 = vpow2.f32 %v4751_v47  ;;  %v1020_v41 = vrot.slane %v7119_v24, 1  ;;  %v1108_v16 = vrot.slane %v7119_v24, 3 }
 0x245   :  { %5616 = vpow2.f32 %v4752_v37 }
 0x246   :  { %5618 = vpow2.f32 %v4753_v8  ;;  %v1019_v8 = vrot.slane %v7115_v5, 1 }
 0x247   :  { %5620 = vpow2.f32 %v4754_v14 }
 0x248   :  { %5622 = vpow2.f32 %v4755_v2 }
 0x249   :  { %5624 = vpow2.f32 %v4756_v20 }
 0x24a   :  { %v5607_v10 = vpop.eup %5606  ;;  %5626 = vpow2.f32 %v4757_v23 }
 0x24b   :  { %v5609_v12 = vpop.eup %5608  ;;  %v981_v62 = vadd.f32 1.0, %v5607_v10  ;;  %5628 = vpow2.f32 %v4758_v4  ;;  %v4760_v4 = vmul.f32 -1.442695, %v1018_v32 }
 0x24c   :  { %v5611_v19 = vpop.eup %5610  ;;  %v982_v25 = vadd.f32 1.0, %v5609_v12  ;;  %5630 = vpow2.f32 %v4759_v33  ;;  %v4761_v12 = vmul.f32 -1.442695, %v1019_v8 }
 0x24d   :  { %v5613_v47 = vpop.eup %5612  ;;  %v983_v38 = vadd.f32 1.0, %v5611_v19  ;;  %5632 = vrcp.f32 %v981_v62 }
 0x24e   :  { %v5615_v37 = vpop.eup %5614  ;;  %v984_v36 = vadd.f32 1.0, %v5613_v47  ;;  %5634 = vrcp.f32 %v982_v25  ;;  %v4762_v25 = vmul.f32 -1.442695, %v1020_v41  ;;  %v1077_v41 = vrot.slane %v7103_v43, 2 }
 0x24f   :  { %v5617_v6 = vpop.eup %5616  ;;  %v985_v14 = vadd.f32 1.0, %v5615_v37  ;;  %5636 = vrcp.f32 %v983_v38 }
 0x250   :  { %v5619_v45 = vpop.eup %5618  ;;  %v986_v2 = vadd.f32 1.0, %v5617_v6  ;;  %5638 = vrcp.f32 %v984_v36 }
 0x251   :  { %v5621_v20 = vpop.eup %5620  ;;  %v987_v23 = vadd.f32 1.0, %v5619_v45  ;;  %5640 = vrcp.f32 %v985_v14 }
 0x252   :  { %v5623_v33 = vpop.eup %5622  ;;  %v988_v10 = vadd.f32 1.0, %v5621_v20  ;;  %5642 = vrcp.f32 %v986_v2  ;;  %v1078_v20 = vrot.slane %v7105_v11, 2 }
 0x253   :  { %v5625_v62 = vpop.eup %5624  ;;  %5644 = vrcp.f32 %v987_v23  ;;  %v1053_v47 = vadd.f32 1.0, %v5623_v33 }
 0x254   :  { %v5627_v19 = vpop.eup %5626  ;;  %5646 = vrcp.f32 %v988_v10  ;;  %v1054_v37 = vadd.f32 1.0, %v5625_v62 }
 0x255   :  { %v5629_v38 = vpop.eup %5628  ;;  %5648 = vpow2.f32 %v4760_v4  ;;  %v1055_v36 = vadd.f32 1.0, %v5627_v19  ;;  %v1079_v4 = vrot.slane %v7109_v61, 2 }
 0x256   :  { %v5631_v42 = vpop.eup %5630  ;;  %5650 = vpow2.f32 %v4761_v12  ;;  %v1056_v32 = vadd.f32 1.0, %v5629_v38  ;;  %v1081_v12 = vrot.slane %v7107_v48, 2  ;;  %v1101_v38 = vrot.slane %v7103_v43, 3 }
 0x257   :  { %v7135_v6 = vpop.eup %5632  ;;  %5652 = vpow2.f32 %v4762_v25  ;;  %v1057_v45 = vadd.f32 1.0, %v5631_v42  ;;  %v1080_v42 = vrot.slane %v7111_v15, 2  ;;  %v1104_v43 = vrot.slane %v7111_v15, 3 }
 0x258   :  { %v7137_v14 = vpop.eup %5634  ;;  %5654 = vrcp.f32 %v1053_v47 }
 0x259   :  { %v7139_v8 = vpop.eup %5636  ;;  %5656 = vrcp.f32 %v1054_v37  ;;  %v4766_v15 = vmul.f32 -1.442695, %v1104_v43 }
 0x25a   :  { %v7142_v2 = vpop.eup %5638  ;;  %5658 = vrcp.f32 %v1055_v36 }
 0x25b   :  { %v7145_v23 = vpop.eup %5640  ;;  %5660 = vrcp.f32 %v1056_v32  ;;  %v1082_v32 = vrot.slane %v7113_v49, 2 }
 0x25c   :  { %v7148_v33 = vpop.eup %5642  ;;  %5662 = vrcp.f32 %v1057_v45  ;;  %v1102_v45 = vrot.slane %v7105_v11, 3  ;;  %v1106_v11 = vrot.slane %v7113_v49, 3 }
 0x25d   :  { %v7151_v10 = vpop.eup %5644  ;;  %5664 = vtanh.f32 %v1077_v41  ;;  %v1083_v41 = vrot.slane %v7115_v5, 2 }
 0x25e   :  { %v7154_v62 = vpop.eup %5646  ;;  %5666 = vtanh.f32 %v1078_v20  ;;  %v1103_v20 = vrot.slane %v7109_v61, 3  ;;  %v1107_v61 = vrot.slane %v7115_v5, 3 }
 0x25f   :  { %v5649_v25 = vpop.eup %5648  ;;  %5668 = vtanh.f32 %v1079_v4 }
 0x260   :  { %v5651_v19 = vpop.eup %5650  ;;  %v1058_v47 = vadd.f32 1.0, %v5649_v25  ;;  %5670 = vtanh.f32 %v1080_v42  ;;  %v1084_v42 = vrot.slane %v7119_v24, 2  ;;  %v4765_v55 = vmul.f32 -1.442695, %v1103_v20 }
 0x261   :  { %v5653_v37 = vpop.eup %5652  ;;  %v1059_v36 = vadd.f32 1.0, %v5651_v19  ;;  %5672 = vtanh.f32 %v1081_v12  ;;  %v1105_v19 = vrot.slane %v7107_v48, 3  ;;  %v4763_v12 = vmul.f32 -1.442695, %v1101_v38 }
 0x262   :  { %v5655_v30 = vpop.eup %5654  ;;  %v1060_v46 = vadd.f32 1.0, %v5653_v37  ;;  %5674 = vrcp.f32 %v1058_v47  ;;  %v4764_v47 = vmul.f32 -1.442695, %v1102_v45  ;;  %v4770_v24 = vmul.f32 -1.442695, %v1108_v16 }
 0x263   :  { %v5657_v4 = vpop.eup %5656  ;;  %5676 = vrcp.f32 %v1059_v36  ;;  %v1165_v48 = vmul.f32 %v5655_v30, %v6977_v3 }
 0x264   :  { %v5659_v25 = vpop.eup %5658  ;;  %5678 = vrcp.f32 %v1060_v46  ;;  %v4767_v46 = vmul.f32 -1.442695, %v1105_v19  ;;  %v1166_v49 = vmul.f32 %v5657_v4, %v6980_v54 }
 0x265   :  { %v5661_v58 = vpop.eup %5660  ;;  %5680 = vtanh.f32 %v1082_v32  ;;  %v4768_v32 = vmul.f32 -1.442695, %v1106_v11  ;;  %v1167_v20 = vmul.f32 %v5659_v25, %v6983_v21 }
 0x266   :  { %v5663_v37 = vpop.eup %5662  ;;  %5682 = vtanh.f32 %v1083_v41  ;;  %v4769_v41 = vmul.f32 -1.442695, %v1107_v61  ;;  %v1168_v19 = vmul.f32 %v5661_v58, %v6986_v34 }
 0x267   :  { %v5665_v36 = vpop.eup %5664  ;;  %5684 = vtanh.f32 %v1084_v42  ;;  %v1169_v54 = vmul.f32 %v5663_v37, %v6988_v29 }
 0x268   :  { %v5667_v7 = vpop.eup %5666  ;;  %5686 = vpow2.f32 %v4763_v12  ;;  %v1173_v5 = vmul.f32 %v5665_v36, %v7135_v6 }
 0x269   :  { %v5669_v38 = vpop.eup %5668  ;;  %5688 = vpow2.f32 %v4764_v47  ;;  %v1174_v43 = vmul.f32 %v5667_v7, %v7137_v14 }
 0x26a   :  { %v5671_v45 = vpop.eup %5670  ;;  %5690 = vpow2.f32 %v4765_v55  ;;  %v1175_v30 = vmul.f32 %v5669_v38, %v7139_v8  ;;  %v7175_v4 = vadd.f32 %v1173_v5, %v1165_v48 }
 0x26b   :  { %v5673_v42 = vpop.eup %5672  ;;  %5692 = vpow2.f32 %v4766_v15  ;;  %v1176_v6 = vmul.f32 %v5671_v45, %v7142_v2  ;;  %v7178_v21 = vadd.f32 %v1174_v43, %v1166_v49 }
 0x26c   :  { %v5675_v3 = vpop.eup %5674  ;;  %5694 = vpow2.f32 %v4767_v46  ;;  %v1177_v7 = vmul.f32 %v5673_v42, %v7145_v23  ;;  %v7181_v16 = vadd.f32 %v1175_v30, %v1167_v20 }
 0x26d   :  { %v5677_v55 = vpop.eup %5676  ;;  %5696 = vpow2.f32 %v4768_v32  ;;  %v7183_v58 = vadd.f32 %v1176_v6, %v1168_v19  ;;  %v1170_v36 = vmul.f32 %v5675_v3, %v6998_v56 }
 0x26e   :  { %v5679_v25 = vpop.eup %5678  ;;  %5698 = vpow2.f32 %v4769_v41  ;;  %v7185_v29 = vadd.f32 %v1177_v7, %v1169_v54  ;;  %v1171_v48 = vmul.f32 %v5677_v55, %v7000_v60 }
 0x26f   :  { %v5681_v34 = vpop.eup %5680  ;;  %5700 = vpow2.f32 %v4770_v24  ;;  %v1172_v45 = vmul.f32 %v5679_v25, %v7002_v50 }
 0x270   :  { %v5683_v14 = vpop.eup %5682  ;;  %5702 = vtanh.f32 %v7175_v4  ;;  %v1178_v49 = vmul.f32 %v5681_v34, %v7148_v33 }
 0x271   :  { %v5685_v8 = vpop.eup %5684  ;;  %5704 = vtanh.f32 %v7178_v21  ;;  %v1179_v20 = vmul.f32 %v5683_v14, %v7151_v10 }
 0x272   :  { %v5687_v2 = vpop.eup %5686  ;;  %5706 = vtanh.f32 %v7181_v16  ;;  %v1180_v56 = vmul.f32 %v5685_v8, %v7154_v62  ;;  %v7198_v43 = vadd.f32 %v1178_v49, %v1170_v36 }
 0x273   :  { %v5689_v12 = vpop.eup %5688  ;;  %v1141_v11 = vadd.f32 1.0, %v5687_v2  ;;  %5708 = vtanh.f32 %v7183_v58  ;;  %v7200_v3 = vadd.f32 %v1179_v20, %v1171_v48 }
 0x274   :  { %v5691_v23 = vpop.eup %5690  ;;  %v1142_v47 = vadd.f32 1.0, %v5689_v12  ;;  %5710 = vtanh.f32 %v7185_v29  ;;  %v7202_v50 = vadd.f32 %v1180_v56, %v1172_v45 }
 0x275   :  { %v5693_v37 = vpop.eup %5692  ;;  %v1143_v61 = vadd.f32 1.0, %v5691_v23  ;;  %5712 = vrcp.f32 %v1141_v11 }
 0x276   :  { %v5695_v15 = vpop.eup %5694  ;;  %v1144_v46 = vadd.f32 1.0, %v5693_v37  ;;  %5714 = vrcp.f32 %v1142_v47 }
 0x277   :  { %v5697_v38 = vpop.eup %5696  ;;  %v1145_v32 = vadd.f32 1.0, %v5695_v15  ;;  %5716 = vrcp.f32 %v1143_v61 }
 0x278   :  { %v5699_v41 = vpop.eup %5698  ;;  %v1146_v5 = vadd.f32 1.0, %v5697_v38  ;;  %5718 = vrcp.f32 %v1144_v46 }
 0x279   :  { %v5701_v42 = vpop.eup %5700  ;;  %v1147_v24 = vadd.f32 1.0, %v5699_v41  ;;  %5720 = vrcp.f32 %v1145_v32 }
 0x27a   :  { %v5703_v60 = vpop.eup %5702  ;;  %v1148_v19 = vadd.f32 1.0, %v5701_v42  ;;  %5722 = vrcp.f32 %v1146_v5 }
 0x27b   :  { %v5705_v33 = vpop.eup %5704  ;;  %5724 = vrcp.f32 %v1147_v24 }
 0x27c   :  { %v5707_v30 = vpop.eup %5706  ;;  %5726 = vrcp.f32 %v1148_v19 }
 0x27d   :  { %v5709_v54 = vpop.eup %5708  ;;  %5728 = vtanh.f32 %v7198_v43 }
 0x27e   :  { %v5711_v10 = vpop.eup %5710  ;;  %5730 = vtanh.f32 %v7200_v3 }
 0x27f   :  { %v5713_v62 = vpop.eup %5712  ;;  %5732 = vtanh.f32 %v7202_v50 }
 0x280   :  { %v5715_v55 = vpop.eup %5714  ;;  %v1197_v6 = vmul.f32 %v5713_v62, %v5703_v60  ;;  %v8452_v62 = vld [vmem:[#allocation9_spill] sm:$0xff] }
 0x281   :  { %v5717_v25 = vpop.eup %5716  ;;  %v1198_v7 = vmul.f32 %v5715_v55, %v5705_v33  ;;  %v8453_v55 = vld [vmem:[#allocation10_spill] sm:$0xff] }
 0x282   :  { %v5719_v34 = vpop.eup %5718  ;;  %v1199_v14 = vmul.f32 %v5717_v25, %v5707_v30  ;;  %1205 = vst [vmem:[%s8393_s4 + $0x1] sm:$0x1] %v1197_v6  ;;  %v8449_v30 = vld [vmem:[#allocation6_spill] sm:$0xff]  ;;  %v8455_v25 = vld [vmem:[#allocation12_spill] sm:$0xff] }
 0x283   :  { %v5721_v8 = vpop.eup %5720  ;;  %v1200_v2 = vmul.f32 %v5719_v34, %v5709_v54  ;;  %1206 = vst [vmem:[%s8393_s4 + $0x9] sm:$0x1] %v1198_v7  ;;  %v1237_v12 = vcombine.low %v1197_v6, %v1198_v7  ;;  %v8450_v54 = vld [vmem:[#allocation7_spill] sm:$0xff]  ;;  %v8456_v7 = vld [vmem:[#allocation13_spill] sm:$0xff]  ;;  %v8457_v34 = vld [vmem:[#allocation14_spill] sm:$0xff] }
 0x284   :  { %v5723_v11 = vpop.eup %5722  ;;  %v1201_v23 = vmul.f32 %v5721_v8, %v5711_v10  ;;  %1207 = vst [vmem:[%s8393_s4 + $0x11] sm:$0x1] %v1199_v14  ;;  %v8451_v10 = vld [vmem:[#allocation8_spill] sm:$0xff]  ;;  %v8454_v6 = vld [vmem:[#allocation11_spill] sm:$0xff] }
 0x285   :  { %v5725_v47 = vpop.eup %5724  ;;  %1208 = vst [vmem:[%s8393_s4 + $0x19] sm:$0x1] %v1200_v2  ;;  %v1238_v37 = vcombine.low %v1199_v14, %v1200_v2  ;;  %v1247_v15 = vrot.slane %v1237_v12, %v6868_v59  ;;  %v8458_v14 = vld [vmem:[#allocation15_spill] sm:$0xff]  ;;  %v8459_v8 = vld [vmem:[#allocation16_spill] sm:$0xff]  ;;  %v8461_v12 = vld [vmem:[#allocation5_spill] sm:$0xff] }
 0x286   :  { %v5727_v61 = vpop.eup %5726  ;;  %1209 = vst [vmem:[%s8393_s4 + $0x21] sm:$0x1] %v1201_v23  ;;  %v8460_v2 = vld [vmem:[#allocation4_spill] sm:$0xff] }
 0x287   :  { %v5729_v36 = vpop.eup %5728  ;;  %v1254_v46 = vrot.slane %v1238_v37, %v6868_v59 }
 0x288   :  { %v5731_v48 = vpop.eup %5730  ;;  %v1202_v38 = vmul.f32 %v5729_v36, %v5723_v11 }
 0x289   :  { %v5733_v32 = vpop.eup %5732  ;;  %v1203_v49 = vmul.f32 %v5731_v48, %v5725_v47  ;;  %v1269_v45 = vcombine.low %v1247_v15, %v1254_v46 }
 0x28a   :  { %v1204_v41 = vmul.f32 %v5733_v32, %v5727_v61  ;;  %1210 = vst [vmem:[%s8393_s4 + $0x29] sm:$0x1] %v1202_v38  ;;  %v1239_v5 = vcombine.low %v1201_v23, %v1202_v38 }
 0x28b   :  { %1211 = vst [vmem:[%s8393_s4 + $0x31] sm:$0x1] %v1203_v49  ;;  %v1277_v60 = vrot.slane %v1269_v45, %v6868_v59 }
 0x28c   :  { %1212 = vst [vmem:[%s8393_s4 + $0x39] sm:$0x1] %v1204_v41  ;;  %v1240_v20 = vcombine.low %v1203_v49, %v1204_v41  ;;  %v1261_v42 = vrot.slane %v1239_v5, %v6868_v59 }
 0x28e   :  { %v1268_v24 = vrot.slane %v1240_v20, %v6868_v59 }
 0x290   :  { %v1270_v56 = vcombine.low %v1261_v42, %v1268_v24  ;;  %v4771_v42 = vld [vmem:[%s8391_s0 + $0x2] ss:$8 sm:$0xf] }
 0x291   :  { %v4772_v24 = vld [vmem:[%s8391_s0 + $0x22] ss:$8 sm:$0xf] }
 0x292   :  { %v1284_v19 = vrot.slane %v1270_v56, %v6868_v59  ;;  %v4773_v56 = vld [vmem:[%s8391_s0 + $0x42] ss:$8 sm:$0xf] }
 0x294   :  { %v1285_v33 = vcombine.low %v1277_v60, %v1284_v19  ;;  %v4775_v60 = vld [vmem:[%s8391_s0 + $0x82] ss:$8 sm:$0xf] }
 0x296   :  { %1352 = vmatmul.mubr.f32.vlgmr.msra.gmra.mrb[4].mxu0 %v1285_v33  ;;  %1423 = vmatmul.mubr.f32.vlgmr.msra.gmra.mrb[4].mxu1 %v1285_v33 }
 0x297   :  { %5158 = vmatpush1.bf16.msra.mxu0 %v6563_v9  ;;  %5190 = vmatpush1.bf16.msra.mxu1 %v6575_v13 }
 0x298   :  { %5160 = vmatprep.subr.bf16.mxu0 %v6588_v17  ;;  %5192 = vmatprep.subr.bf16.mxu1 %v6590_v18 }
 0x299   :  { %1911 = vmatprep.mubr.f32.mxu0 %v8437_v28  ;;  %1982 = vmatprep.mubr.f32.mxu1 %v8437_v28 }
 0x29b   :  { %5162 = vmatpush1.bf16.msra.mxu0 %v6602_v22  ;;  %5194 = vmatpush1.bf16.msra.mxu1 %v6615_v26 }
 0x29c   :  { %5164 = vmatprep.subr.bf16.mxu0 %v6617_v27  ;;  %5196 = vmatprep.subr.bf16.mxu1 %v6628_v31 }
 0x29f   :  { %5166 = vmatpush1.bf16.msra.mxu0 %v6640_v35  ;;  %5198 = vmatpush1.bf16.msra.mxu1 %v6653_v39 }
 0x2a0   :  { %5168 = vmatprep.subr.bf16.mxu0 %v6655_v40  ;;  %5200 = vmatprep.subr.bf16.mxu1 %v6667_v44 }
 0x2a3   :  { %5170 = vmatpush1.bf16.msra.mxu0 %v6688_v51  ;;  %5202 = vmatpush1.bf16.msra.mxu1 %v6692_v52 }
 0x2a4   :  { %5172 = vmatprep.subr.bf16.mxu0 %v6694_v53  ;;  %5204 = vmatprep.subr.bf16.mxu1 %v6706_v57 }
 0x2a7   :  { %5174 = vmatpush1.bf16.msra.mxu0 %v6724_v63  ;;  %5206 = vmatpush1.bf16.msra.mxu1 %v6728_v0 }
 0x2a8   :  { %5176 = vmatprep.subr.bf16.mxu0 %v6730_v1  ;;  %5208 = vmatprep.subr.bf16.mxu1 %v8449_v30 }
 0x2ab   :  { %5178 = vmatpush1.bf16.msra.mxu0 %v8450_v54  ;;  %5210 = vmatpush1.bf16.msra.mxu1 %v8451_v10 }
 0x2ac   :  { %5180 = vmatprep.subr.bf16.mxu0 %v8452_v62  ;;  %5212 = vmatprep.subr.bf16.mxu1 %v8453_v55 }
 0x2af   :  { %5182 = vmatpush1.bf16.msra.mxu0 %v8454_v6  ;;  %5214 = vmatpush1.bf16.msra.mxu1 %v8455_v25 }
 0x2b0   :  { %5184 = vmatprep.subr.bf16.mxu0 %v8456_v7  ;;  %5216 = vmatprep.subr.bf16.mxu1 %v8457_v34 }
 0x2b3   :  { %5186 = vmatpush1.bf16.msra.mxu0 %v8458_v14  ;;  %5218 = vmatpush1.bf16.msra.mxu1 %v8459_v8 }
 0x2b4   :  { %5220 = vmatprep.subr.bf16.mxu0 %v8460_v2  ;;  %5252 = vmatprep.subr.bf16.mxu1 %v8461_v12 }
 0x369   :  { %v1353_v11 = vpop.f32.mrb[4].mxu0  ;;  %v1424_v23 = vpop.f32.mrb[4].mxu1 }
 0x36a   :  { %v1355_v47 = vpop.f32.mrb[5].mxu0  ;;  %v1426_v37 = vpop.f32.mrb[5].mxu1 }
 0x36b   :  { %v1433_v61 = vcombine.low %v1353_v11, %v1355_v47  ;;  %v1434_v36 = vcombine.high %v1353_v11, %v1355_v47  ;;  %v1435_v15 = vcombine.low %v1424_v23, %v1426_v37  ;;  %v1436_v46 = vcombine.high %v1424_v23, %v1426_v37  ;;  %v4774_v47 = vld [vmem:[%s8391_s0 + $0x62] ss:$8 sm:$0xf] }
 0x36c   :  { %v4776_v37 = vld [vmem:[%s8391_s0 + $0xa2] ss:$8 sm:$0xf] }
 0x36d   :  { %v1443_v48 = vrot.slane %v1433_v61, %v6868_v59  ;;  %v1450_v38 = vrot.slane %v1434_v36, %v6868_v59  ;;  %v1457_v32 = vrot.slane %v1435_v15, %v6868_v59  ;;  %v1464_v49 = vrot.slane %v1436_v46, %v6868_v59  ;;  %v4777_v61 = vld [vmem:[%s8391_s0 + $0xc2] ss:$8 sm:$0xf] }
 0x36f   :  { %v1465_v45 = vcombine.low %v1443_v48, %v1457_v32  ;;  %v1466_v41 = vcombine.high %v1443_v48, %v1457_v32  ;;  %v1467_v5 = vcombine.low %v1450_v38, %v1464_v49  ;;  %v1468_v20 = vcombine.high %v1450_v38, %v1464_v49  ;;  %v4778_v38 = vld [vmem:[%s8391_s0 + $0xe2] ss:$8 sm:$0xf] }
 0x371   :  { %v1475_v19 = vrot.slane %v1465_v45, %v6868_v59  ;;  %v1482_v33 = vrot.slane %v1467_v5, %v6868_v59  ;;  %v1489_v11 = vrot.slane %v1466_v41, %v6868_v59  ;;  %v1496_v23 = vrot.slane %v1468_v20, %v6868_v59 }
 0x373   :  { %v1497_v36 = vcombine.high %v1475_v19, %v1475_v19  ;;  %v1498_v15 = vcombine.high %v1482_v33, %v1482_v33  ;;  %v1499_v46 = vcombine.high %v1489_v11, %v1489_v11  ;;  %v1500_v48 = vcombine.high %v1496_v23, %v1496_v23 }
 0x374   :  { %v7303_v32 = vadd.f32 %v4771_v42, %v1475_v19  ;;  %v7305_v49 = vadd.f32 %v4772_v24, %v1489_v11  ;;  %v7307_v45 = vadd.f32 %v4775_v60, %v1482_v33  ;;  %v7313_v20 = vadd.f32 %v4776_v37, %v1496_v23 }
 0x375   :  { %v7309_v41 = vadd.f32 %v4773_v56, %v1497_v36  ;;  %v7311_v5 = vadd.f32 %v4774_v47, %v1499_v46  ;;  %v7315_v12 = vadd.f32 %v4777_v61, %v1498_v15  ;;  %v7319_v14 = vadd.f32 %v4778_v38, %v1500_v48 }
 0x376   :  { %v4779_v2 = vmul.f32 -1.442695, %v7303_v32  ;;  %v4780_v8 = vmul.f32 -1.442695, %v7305_v49  ;;  %v4783_v56 = vmul.f32 -1.442695, %v7307_v45 }
 0x377   :  { %v4781_v42 = vmul.f32 -1.442695, %v7309_v41  ;;  %v4782_v24 = vmul.f32 -1.442695, %v7311_v5  ;;  %v1573_v60 = vrot.slane %v7303_v32, 1  ;;  %v1574_v33 = vrot.slane %v7305_v49, 1 }
 0x378   :  { %5734 = vpow2.f32 %v4779_v2  ;;  %v4784_v19 = vmul.f32 -1.442695, %v7313_v20  ;;  %v4785_v11 = vmul.f32 -1.442695, %v7315_v12  ;;  %v1575_v23 = vrot.slane %v7309_v41, 1 }
 0x379   :  { %5736 = vpow2.f32 %v4780_v8  ;;  %v4786_v47 = vmul.f32 -1.442695, %v7319_v14  ;;  %v1576_v37 = vrot.slane %v7311_v5, 1  ;;  %v1577_v2 = vrot.slane %v7307_v45, 1 }
 0x37a   :  { %5738 = vpow2.f32 %v4781_v42  ;;  %v4787_v61 = vmul.f32 -1.442695, %v1573_v60  ;;  %v4788_v8 = vmul.f32 -1.442695, %v1574_v33  ;;  %v4789_v36 = vmul.f32 -1.442695, %v1575_v23 }
 0x37b   :  { %5740 = vpow2.f32 %v4782_v24  ;;  %v4790_v15 = vmul.f32 -1.442695, %v1576_v37  ;;  %v4791_v46 = vmul.f32 -1.442695, %v1577_v2  ;;  %v1578_v60 = vrot.slane %v7313_v20, 1 }
 0x37c   :  { %5742 = vpow2.f32 %v4783_v56  ;;  %v1580_v37 = vrot.slane %v7319_v14, 1  ;;  %v1668_v54 = vrot.slane %v7319_v14, 3 }
 0x37d   :  { %5744 = vpow2.f32 %v4784_v19 }
 0x37e   :  { %5746 = vpow2.f32 %v4785_v11  ;;  %v1579_v11 = vrot.slane %v7315_v12, 1 }
 0x37f   :  { %5748 = vpow2.f32 %v4786_v47 }
 0x380   :  { %5750 = vpow2.f32 %v4787_v61 }
 0x381   :  { %5752 = vpow2.f32 %v4788_v8 }
 0x382   :  { %v5735_v48 = vpop.eup %5734  ;;  %5754 = vpow2.f32 %v4789_v36 }
 0x383   :  { %v5737_v38 = vpop.eup %5736  ;;  %v1541_v42 = vadd.f32 1.0, %v5735_v48  ;;  %5756 = vpow2.f32 %v4790_v15  ;;  %v4792_v15 = vmul.f32 -1.442695, %v1578_v60 }
 0x384   :  { %v5739_v24 = vpop.eup %5738  ;;  %v1542_v34 = vadd.f32 1.0, %v5737_v38  ;;  %5758 = vpow2.f32 %v4791_v46  ;;  %v4793_v38 = vmul.f32 -1.442695, %v1579_v11 }
 0x385   :  { %v5741_v56 = vpop.eup %5740  ;;  %v1543_v7 = vadd.f32 1.0, %v5739_v24  ;;  %5760 = vrcp.f32 %v1541_v42 }
 0x386   :  { %v5743_v19 = vpop.eup %5742  ;;  %v1544_v33 = vadd.f32 1.0, %v5741_v56  ;;  %5762 = vrcp.f32 %v1542_v34  ;;  %v4794_v34 = vmul.f32 -1.442695, %v1580_v37  ;;  %v1637_v37 = vrot.slane %v7303_v32, 2 }
 0x387   :  { %v5745_v23 = vpop.eup %5744  ;;  %v1545_v47 = vadd.f32 1.0, %v5743_v19  ;;  %5764 = vrcp.f32 %v1543_v7 }
 0x388   :  { %v5747_v2 = vpop.eup %5746  ;;  %v1546_v61 = vadd.f32 1.0, %v5745_v23  ;;  %5766 = vrcp.f32 %v1544_v33 }
 0x389   :  { %v5749_v8 = vpop.eup %5748  ;;  %v1547_v36 = vadd.f32 1.0, %v5747_v2  ;;  %5768 = vrcp.f32 %v1545_v47 }
 0x38a   :  { %v5751_v46 = vpop.eup %5750  ;;  %v1548_v48 = vadd.f32 1.0, %v5749_v8  ;;  %5770 = vrcp.f32 %v1546_v61  ;;  %v1638_v8 = vrot.slane %v7305_v49, 2 }
 0x38b   :  { %v5753_v42 = vpop.eup %5752  ;;  %5772 = vrcp.f32 %v1547_v36  ;;  %v1613_v56 = vadd.f32 1.0, %v5751_v46 }
 0x38c   :  { %v5755_v24 = vpop.eup %5754  ;;  %5774 = vrcp.f32 %v1548_v48  ;;  %v1614_v19 = vadd.f32 1.0, %v5753_v42 }
 0x38d   :  { %v5757_v7 = vpop.eup %5756  ;;  %5776 = vpow2.f32 %v4792_v15  ;;  %v1615_v33 = vadd.f32 1.0, %v5755_v24  ;;  %v1639_v15 = vrot.slane %v7309_v41, 2 }
 0x38e   :  { %v5759_v25 = vpop.eup %5758  ;;  %5778 = vpow2.f32 %v4793_v38  ;;  %v1616_v60 = vadd.f32 1.0, %v5757_v7  ;;  %v1641_v38 = vrot.slane %v7307_v45, 2  ;;  %v1661_v7 = vrot.slane %v7303_v32, 3 }
 0x38f   :  { %v7335_v23 = vpop.eup %5760  ;;  %5780 = vpow2.f32 %v4794_v34  ;;  %v1617_v2 = vadd.f32 1.0, %v5759_v25  ;;  %v1640_v25 = vrot.slane %v7311_v5, 2  ;;  %v1664_v32 = vrot.slane %v7311_v5, 3 }
 0x390   :  { %v7337_v47 = vpop.eup %5762  ;;  %5782 = vrcp.f32 %v1613_v56 }
 0x391   :  { %v7339_v11 = vpop.eup %5764  ;;  %5784 = vrcp.f32 %v1614_v19  ;;  %v4798_v5 = vmul.f32 -1.442695, %v1664_v32 }
 0x392   :  { %v7342_v61 = vpop.eup %5766  ;;  %5786 = vrcp.f32 %v1615_v33 }
 0x393   :  { %v7345_v36 = vpop.eup %5768  ;;  %5788 = vrcp.f32 %v1616_v60  ;;  %v1642_v60 = vrot.slane %v7313_v20, 2 }
 0x394   :  { %v7348_v46 = vpop.eup %5770  ;;  %5790 = vrcp.f32 %v1617_v2  ;;  %v1662_v2 = vrot.slane %v7305_v49, 3  ;;  %v1666_v49 = vrot.slane %v7313_v20, 3 }
 0x395   :  { %v7351_v48 = vpop.eup %5772  ;;  %5792 = vtanh.f32 %v1637_v37  ;;  %v1643_v37 = vrot.slane %v7315_v12, 2 }
 0x396   :  { %v7354_v42 = vpop.eup %5774  ;;  %5794 = vtanh.f32 %v1638_v8  ;;  %v1663_v8 = vrot.slane %v7309_v41, 3  ;;  %v1667_v41 = vrot.slane %v7315_v12, 3 }
 0x397   :  { %v5777_v34 = vpop.eup %5776  ;;  %5796 = vtanh.f32 %v1639_v15 }
 0x398   :  { %v5779_v24 = vpop.eup %5778  ;;  %v1618_v56 = vadd.f32 1.0, %v5777_v34  ;;  %5798 = vtanh.f32 %v1640_v25  ;;  %v1644_v25 = vrot.slane %v7319_v14, 2  ;;  %v4797_v10 = vmul.f32 -1.442695, %v1663_v8 }
 0x399   :  { %v5781_v19 = vpop.eup %5780  ;;  %v1619_v33 = vadd.f32 1.0, %v5779_v24  ;;  %5800 = vtanh.f32 %v1641_v38  ;;  %v1665_v24 = vrot.slane %v7307_v45, 3  ;;  %v4795_v38 = vmul.f32 -1.442695, %v1661_v7 }
 0x39a   :  { %v5783_v6 = vpop.eup %5782  ;;  %v1620_v55 = vadd.f32 1.0, %v5781_v19  ;;  %5802 = vrcp.f32 %v1618_v56  ;;  %v4796_v56 = vmul.f32 -1.442695, %v1662_v2  ;;  %v4802_v14 = vmul.f32 -1.442695, %v1668_v54 }
 0x39b   :  { %v5785_v15 = vpop.eup %5784  ;;  %5804 = vrcp.f32 %v1619_v33  ;;  %v1725_v45 = vmul.f32 %v5783_v6, %v7175_v4 }
 0x39c   :  { %v5787_v34 = vpop.eup %5786  ;;  %5806 = vrcp.f32 %v1620_v55  ;;  %v4799_v55 = vmul.f32 -1.442695, %v1665_v24  ;;  %v1726_v20 = vmul.f32 %v5785_v15, %v7178_v21 }
 0x39d   :  { %v5789_v62 = vpop.eup %5788  ;;  %5808 = vtanh.f32 %v1642_v60  ;;  %v4800_v60 = vmul.f32 -1.442695, %v1666_v49  ;;  %v1727_v8 = vmul.f32 %v5787_v34, %v7181_v16 }
 0x39e   :  { %v5791_v19 = vpop.eup %5790  ;;  %5810 = vtanh.f32 %v1643_v37  ;;  %v4801_v37 = vmul.f32 -1.442695, %v1667_v41  ;;  %v1728_v24 = vmul.f32 %v5789_v62, %v7183_v58 }
 0x39f   :  { %v5793_v33 = vpop.eup %5792  ;;  %5812 = vtanh.f32 %v1644_v25  ;;  %v1729_v21 = vmul.f32 %v5791_v19, %v7185_v29 }
 0x3a0   :  { %v5795_v30 = vpop.eup %5794  ;;  %5814 = vpow2.f32 %v4795_v38  ;;  %v1733_v12 = vmul.f32 %v5793_v33, %v7335_v23 }
 0x3a1   :  { %v5797_v7 = vpop.eup %5796  ;;  %5816 = vpow2.f32 %v4796_v56  ;;  %v1734_v32 = vmul.f32 %v5795_v30, %v7337_v47 }
 0x3a2   :  { %v5799_v2 = vpop.eup %5798  ;;  %5818 = vpow2.f32 %v4797_v10  ;;  %v1735_v6 = vmul.f32 %v5797_v7, %v7339_v11  ;;  %v7375_v15 = vadd.f32 %v1733_v12, %v1725_v45 }
 0x3a3   :  { %v5801_v25 = vpop.eup %5800  ;;  %5820 = vpow2.f32 %v4798_v5  ;;  %v1736_v23 = vmul.f32 %v5799_v2, %v7342_v61  ;;  %v7378_v16 = vadd.f32 %v1734_v32, %v1726_v20 }
 0x3a4   :  { %v5803_v4 = vpop.eup %5802  ;;  %5822 = vpow2.f32 %v4799_v55  ;;  %v1737_v30 = vmul.f32 %v5801_v25, %v7345_v36  ;;  %v7381_v54 = vadd.f32 %v1735_v6, %v1727_v8 }
 0x3a5   :  { %v5805_v10 = vpop.eup %5804  ;;  %5824 = vpow2.f32 %v4800_v60  ;;  %v7383_v62 = vadd.f32 %v1736_v23, %v1728_v24  ;;  %v1730_v33 = vmul.f32 %v5803_v4, %v7198_v43 }
 0x3a6   :  { %v5807_v34 = vpop.eup %5806  ;;  %5826 = vpow2.f32 %v4801_v37  ;;  %v7385_v29 = vadd.f32 %v1737_v30, %v1729_v21  ;;  %v1731_v45 = vmul.f32 %v5805_v10, %v7200_v3 }
 0x3a7   :  { %v5809_v58 = vpop.eup %5808  ;;  %5828 = vpow2.f32 %v4802_v14  ;;  %v1732_v2 = vmul.f32 %v5807_v34, %v7202_v50 }
 0x3a8   :  { %v5811_v47 = vpop.eup %5810  ;;  %5830 = vtanh.f32 %v7375_v15  ;;  %v1738_v20 = vmul.f32 %v5809_v58, %v7348_v46 }
 0x3a9   :  { %v5813_v11 = vpop.eup %5812  ;;  %5832 = vtanh.f32 %v7378_v16  ;;  %v1739_v8 = vmul.f32 %v5811_v47, %v7351_v48 }
 0x3aa   :  { %v5815_v61 = vpop.eup %5814  ;;  %5834 = vtanh.f32 %v7381_v54  ;;  %v1740_v43 = vmul.f32 %v5813_v11, %v7354_v42  ;;  %v7398_v32 = vadd.f32 %v1738_v20, %v1730_v33 }
 0x3ab   :  { %v5817_v38 = vpop.eup %5816  ;;  %v1701_v49 = vadd.f32 1.0, %v5815_v61  ;;  %5836 = vtanh.f32 %v7383_v62  ;;  %v7400_v4 = vadd.f32 %v1739_v8, %v1731_v45 }
 0x3ac   :  { %v5819_v36 = vpop.eup %5818  ;;  %v1702_v56 = vadd.f32 1.0, %v5817_v38  ;;  %5838 = vtanh.f32 %v7385_v29  ;;  %v7402_v50 = vadd.f32 %v1740_v43, %v1732_v2 }
 0x3ad   :  { %v5821_v19 = vpop.eup %5820  ;;  %v1703_v41 = vadd.f32 1.0, %v5819_v36  ;;  %5840 = vrcp.f32 %v1701_v49 }
 0x3ae   :  { %v5823_v5 = vpop.eup %5822  ;;  %v1704_v55 = vadd.f32 1.0, %v5821_v19  ;;  %5842 = vrcp.f32 %v1702_v56 }
 0x3af   :  { %v5825_v7 = vpop.eup %5824  ;;  %v1705_v60 = vadd.f32 1.0, %v5823_v5  ;;  %5844 = vrcp.f32 %v1703_v41 }
 0x3b0   :  { %v5827_v37 = vpop.eup %5826  ;;  %v1706_v12 = vadd.f32 1.0, %v5825_v7  ;;  %5846 = vrcp.f32 %v1704_v55 }
 0x3b1   :  { %v5829_v25 = vpop.eup %5828  ;;  %v1707_v14 = vadd.f32 1.0, %v5827_v37  ;;  %5848 = vrcp.f32 %v1705_v60 }
 0x3b2   :  { %v5831_v3 = vpop.eup %5830  ;;  %v1708_v24 = vadd.f32 1.0, %v5829_v25  ;;  %5850 = vrcp.f32 %v1706_v12 }
 0x3b3   :  { %v5833_v46 = vpop.eup %5832  ;;  %5852 = vrcp.f32 %v1707_v14 }
 0x3b4   :  { %v5835_v6 = vpop.eup %5834  ;;  %5854 = vrcp.f32 %v1708_v24 }
 0x3b5   :  { %v5837_v21 = vpop.eup %5836  ;;  %5856 = vtanh.f32 %v7398_v32 }
 0x3b6   :  { %v5839_v48 = vpop.eup %5838  ;;  %5858 = vtanh.f32 %v7400_v4 }
 0x3b7   :  { %v5841_v42 = vpop.eup %5840  ;;  %5860 = vtanh.f32 %v7402_v50 }
 0x3b8   :  { %v5843_v10 = vpop.eup %5842  ;;  %v1757_v23 = vmul.f32 %v5841_v42, %v5831_v3  ;;  %v8465_v42 = vld [vmem:[#allocation9_spill] sm:$0xff] }
 0x3b9   :  { %v5845_v34 = vpop.eup %5844  ;;  %v1758_v30 = vmul.f32 %v5843_v10, %v5833_v46  ;;  %v8466_v10 = vld [vmem:[#allocation10_spill] sm:$0xff] }
 0x3ba   :  { %v5847_v58 = vpop.eup %5846  ;;  %v1759_v47 = vmul.f32 %v5845_v34, %v5835_v6  ;;  %1765 = vst [vmem:[%s8393_s4 + $0x2] sm:$0x1] %v1757_v23  ;;  %v8462_v6 = vld [vmem:[#allocation6_spill] sm:$0xff]  ;;  %v8468_v34 = vld [vmem:[#allocation12_spill] sm:$0xff] }
 0x3bb   :  { %v5849_v11 = vpop.eup %5848  ;;  %v1760_v61 = vmul.f32 %v5847_v58, %v5837_v21  ;;  %1766 = vst [vmem:[%s8393_s4 + $0xa] sm:$0x1] %v1758_v30  ;;  %v1797_v38 = vcombine.low %v1757_v23, %v1758_v30  ;;  %v8463_v21 = vld [vmem:[#allocation7_spill] sm:$0xff]  ;;  %v8469_v30 = vld [vmem:[#allocation13_spill] sm:$0xff]  ;;  %v8470_v58 = vld [vmem:[#allocation14_spill] sm:$0xff] }
 0x3bc   :  { %v5851_v49 = vpop.eup %5850  ;;  %v1761_v36 = vmul.f32 %v5849_v11, %v5839_v48  ;;  %1767 = vst [vmem:[%s8393_s4 + $0x12] sm:$0x1] %v1759_v47  ;;  %v8464_v48 = vld [vmem:[#allocation8_spill] sm:$0xff]  ;;  %v8467_v23 = vld [vmem:[#allocation11_spill] sm:$0xff] }
 0x3bd   :  { %v5853_v56 = vpop.eup %5852  ;;  %1768 = vst [vmem:[%s8393_s4 + $0x1a] sm:$0x1] %v1760_v61  ;;  %v1798_v19 = vcombine.low %v1759_v47, %v1760_v61  ;;  %v1807_v5 = vrot.slane %v1797_v38, %v6868_v59  ;;  %v8471_v47 = vld [vmem:[#allocation15_spill] sm:$0xff]  ;;  %v8472_v11 = vld [vmem:[#allocation16_spill] sm:$0xff]  ;;  %v8474_v38 = vld [vmem:[#allocation5_spill] sm:$0xff] }
 0x3be   :  { %v5855_v41 = vpop.eup %5854  ;;  %1769 = vst [vmem:[%s8393_s4 + $0x22] sm:$0x1] %v1761_v36  ;;  %v8473_v61 = vld [vmem:[#allocation4_spill] sm:$0xff] }
 0x3bf   :  { %v5857_v33 = vpop.eup %5856  ;;  %v1814_v55 = vrot.slane %v1798_v19, %v6868_v59 }
 0x3c0   :  { %v5859_v45 = vpop.eup %5858  ;;  %v1762_v7 = vmul.f32 %v5857_v33, %v5851_v49 }
 0x3c1   :  { %v5861_v60 = vpop.eup %5860  ;;  %v1763_v20 = vmul.f32 %v5859_v45, %v5853_v56  ;;  %v1829_v2 = vcombine.low %v1807_v5, %v1814_v55 }
 0x3c2   :  { %v1764_v37 = vmul.f32 %v5861_v60, %v5855_v41  ;;  %1770 = vst [vmem:[%s8393_s4 + $0x2a] sm:$0x1] %v1762_v7  ;;  %v1799_v12 = vcombine.low %v1761_v36, %v1762_v7 }
 0x3c3   :  { %1771 = vst [vmem:[%s8393_s4 + $0x32] sm:$0x1] %v1763_v20  ;;  %v1837_v3 = vrot.slane %v1829_v2, %v6868_v59 }
 0x3c4   :  { %1772 = vst [vmem:[%s8393_s4 + $0x3a] sm:$0x1] %v1764_v37  ;;  %v1800_v8 = vcombine.low %v1763_v20, %v1764_v37  ;;  %v1821_v25 = vrot.slane %v1799_v12, %v6868_v59 }
 0x3c6   :  { %v1828_v14 = vrot.slane %v1800_v8, %v6868_v59 }
 0x3c8   :  { %v1830_v43 = vcombine.low %v1821_v25, %v1828_v14  ;;  %v4803_v25 = vld [vmem:[%s8391_s0 + $0x3] ss:$8 sm:$0xf] }
 0x3c9   :  { %v4804_v14 = vld [vmem:[%s8391_s0 + $0x23] ss:$8 sm:$0xf] }
 0x3ca   :  { %v1844_v24 = vrot.slane %v1830_v43, %v6868_v59  ;;  %v4805_v43 = vld [vmem:[%s8391_s0 + $0x43] ss:$8 sm:$0xf] }
 0x3cc   :  { %v1845_v46 = vcombine.low %v1837_v3, %v1844_v24  ;;  %v4807_v3 = vld [vmem:[%s8391_s0 + $0x83] ss:$8 sm:$0xf] }
 0x3ce   :  { %1912 = vmatmul.mubr.f32.vlgmr.msra.gmra.mrb[6].mxu0 %v1845_v46  ;;  %1983 = vmatmul.mubr.f32.vlgmr.msra.gmra.mrb[6].mxu1 %v1845_v46 }
 0x3cf   :  { %5222 = vmatpush1.bf16.msra.mxu0 %v6563_v9  ;;  %5254 = vmatpush1.bf16.msra.mxu1 %v6575_v13 }
 0x3d0   :  { %5224 = vmatprep.subr.bf16.mxu0 %v6588_v17  ;;  %5256 = vmatprep.subr.bf16.mxu1 %v6590_v18 }
 0x3d1   :  { %2471 = vmatprep.mubr.f32.mxu0 %v8437_v28  ;;  %2542 = vmatprep.mubr.f32.mxu1 %v8437_v28 }
 0x3d3   :  { %5226 = vmatpush1.bf16.msra.mxu0 %v6602_v22  ;;  %5258 = vmatpush1.bf16.msra.mxu1 %v6615_v26 }
 0x3d4   :  { %5228 = vmatprep.subr.bf16.mxu0 %v6617_v27  ;;  %5260 = vmatprep.subr.bf16.mxu1 %v6628_v31 }
 0x3d7   :  { %5230 = vmatpush1.bf16.msra.mxu0 %v6640_v35  ;;  %5262 = vmatpush1.bf16.msra.mxu1 %v6653_v39 }
 0x3d8   :  { %5232 = vmatprep.subr.bf16.mxu0 %v6655_v40  ;;  %5264 = vmatprep.subr.bf16.mxu1 %v6667_v44 }
 0x3db   :  { %5234 = vmatpush1.bf16.msra.mxu0 %v6688_v51  ;;  %5266 = vmatpush1.bf16.msra.mxu1 %v6692_v52 }
 0x3dc   :  { %5236 = vmatprep.subr.bf16.mxu0 %v6694_v53  ;;  %5268 = vmatprep.subr.bf16.mxu1 %v6706_v57 }
 0x3df   :  { %5238 = vmatpush1.bf16.msra.mxu0 %v6724_v63  ;;  %5270 = vmatpush1.bf16.msra.mxu1 %v6728_v0 }
 0x3e0   :  { %5240 = vmatprep.subr.bf16.mxu0 %v6730_v1  ;;  %5272 = vmatprep.subr.bf16.mxu1 %v8462_v6 }
 0x3e3   :  { %5242 = vmatpush1.bf16.msra.mxu0 %v8463_v21  ;;  %5274 = vmatpush1.bf16.msra.mxu1 %v8464_v48 }
 0x3e4   :  { %5244 = vmatprep.subr.bf16.mxu0 %v8465_v42  ;;  %5276 = vmatprep.subr.bf16.mxu1 %v8466_v10 }
 0x3e7   :  { %5246 = vmatpush1.bf16.msra.mxu0 %v8467_v23  ;;  %5278 = vmatpush1.bf16.msra.mxu1 %v8468_v34 }
 0x3e8   :  { %5248 = vmatprep.subr.bf16.mxu0 %v8469_v30  ;;  %5280 = vmatprep.subr.bf16.mxu1 %v8470_v58 }
 0x3eb   :  { %5250 = vmatpush1.bf16.msra.mxu0 %v8471_v47  ;;  %5282 = vmatpush1.bf16.msra.mxu1 %v8472_v11 }
 0x3ec   :  { %5284 = vmatprep.subr.bf16.mxu0 %v8473_v61  ;;  %5316 = vmatprep.subr.bf16.mxu1 %v8474_v38 }
 0x4a1   :  { %v1913_v49 = vpop.f32.mrb[6].mxu0  ;;  %v1984_v36 = vpop.f32.mrb[6].mxu1 }
 0x4a2   :  { %v1915_v56 = vpop.f32.mrb[7].mxu0  ;;  %v1986_v19 = vpop.f32.mrb[7].mxu1 }
 0x4a3   :  { %v1993_v41 = vcombine.low %v1913_v49, %v1915_v56  ;;  %v1994_v33 = vcombine.high %v1913_v49, %v1915_v56  ;;  %v1995_v5 = vcombine.low %v1984_v36, %v1986_v19  ;;  %v1996_v55 = vcombine.high %v1984_v36, %v1986_v19  ;;  %v4806_v56 = vld [vmem:[%s8391_s0 + $0x63] ss:$8 sm:$0xf] }
 0x4a4   :  { %v4808_v19 = vld [vmem:[%s8391_s0 + $0xa3] ss:$8 sm:$0xf] }
 0x4a5   :  { %v2003_v45 = vrot.slane %v1993_v41, %v6868_v59  ;;  %v2010_v7 = vrot.slane %v1994_v33, %v6868_v59  ;;  %v2017_v60 = vrot.slane %v1995_v5, %v6868_v59  ;;  %v2024_v20 = vrot.slane %v1996_v55, %v6868_v59  ;;  %v4809_v41 = vld [vmem:[%s8391_s0 + $0xc3] ss:$8 sm:$0xf] }
 0x4a7   :  { %v2025_v2 = vcombine.low %v2003_v45, %v2017_v60  ;;  %v2026_v37 = vcombine.high %v2003_v45, %v2017_v60  ;;  %v2027_v12 = vcombine.low %v2010_v7, %v2024_v20  ;;  %v2028_v8 = vcombine.high %v2010_v7, %v2024_v20  ;;  %v4810_v7 = vld [vmem:[%s8391_s0 + $0xe3] ss:$8 sm:$0xf] }
 0x4a9   :  { %v2035_v24 = vrot.slane %v2025_v2, %v6868_v59  ;;  %v2042_v46 = vrot.slane %v2027_v12, %v6868_v59  ;;  %v2049_v49 = vrot.slane %v2026_v37, %v6868_v59  ;;  %v2056_v36 = vrot.slane %v2028_v8, %v6868_v59 }
 0x4ab   :  { %v2057_v33 = vcombine.high %v2035_v24, %v2035_v24  ;;  %v2058_v5 = vcombine.high %v2042_v46, %v2042_v46  ;;  %v2059_v55 = vcombine.high %v2049_v49, %v2049_v49  ;;  %v2060_v45 = vcombine.high %v2056_v36, %v2056_v36 }
 0x4ac   :  { %v7503_v60 = vadd.f32 %v4803_v25, %v2035_v24  ;;  %v7505_v20 = vadd.f32 %v4804_v14, %v2049_v49  ;;  %v7507_v2 = vadd.f32 %v4807_v3, %v2042_v46  ;;  %v7513_v8 = vadd.f32 %v4808_v19, %v2056_v36 }
 0x4ad   :  { %v7509_v37 = vadd.f32 %v4805_v43, %v2057_v33  ;;  %v7511_v12 = vadd.f32 %v4806_v56, %v2059_v55  ;;  %v7515_v38 = vadd.f32 %v4809_v41, %v2058_v5  ;;  %v7519_v47 = vadd.f32 %v4810_v7, %v2060_v45 }
 0x4ae   :  { %v4811_v61 = vmul.f32 -1.442695, %v7503_v60  ;;  %v4812_v11 = vmul.f32 -1.442695, %v7505_v20  ;;  %v4815_v43 = vmul.f32 -1.442695, %v7507_v2 }
 0x4af   :  { %v4813_v25 = vmul.f32 -1.442695, %v7509_v37  ;;  %v4814_v14 = vmul.f32 -1.442695, %v7511_v12  ;;  %v2133_v3 = vrot.slane %v7503_v60, 1  ;;  %v2134_v46 = vrot.slane %v7505_v20, 1 }
 0x4b0   :  { %5862 = vpow2.f32 %v4811_v61  ;;  %v4816_v24 = vmul.f32 -1.442695, %v7513_v8  ;;  %v4817_v49 = vmul.f32 -1.442695, %v7515_v38  ;;  %v2135_v36 = vrot.slane %v7509_v37, 1 }
 0x4b1   :  { %5864 = vpow2.f32 %v4812_v11  ;;  %v4818_v56 = vmul.f32 -1.442695, %v7519_v47  ;;  %v2136_v19 = vrot.slane %v7511_v12, 1  ;;  %v2137_v61 = vrot.slane %v7507_v2, 1 }
 0x4b2   :  { %5866 = vpow2.f32 %v4813_v25  ;;  %v4819_v41 = vmul.f32 -1.442695, %v2133_v3  ;;  %v4820_v11 = vmul.f32 -1.442695, %v2134_v46  ;;  %v4821_v33 = vmul.f32 -1.442695, %v2135_v36 }
 0x4b3   :  { %5868 = vpow2.f32 %v4814_v14  ;;  %v4822_v5 = vmul.f32 -1.442695, %v2136_v19  ;;  %v4823_v55 = vmul.f32 -1.442695, %v2137_v61  ;;  %v2138_v3 = vrot.slane %v7513_v8, 1 }
 0x4b4   :  { %5870 = vpow2.f32 %v4815_v43  ;;  %v2140_v19 = vrot.slane %v7519_v47, 1  ;;  %v2228_v21 = vrot.slane %v7519_v47, 3 }
 0x4b5   :  { %5872 = vpow2.f32 %v4816_v24 }
 0x4b6   :  { %5874 = vpow2.f32 %v4817_v49  ;;  %v2139_v49 = vrot.slane %v7515_v38, 1 }
 0x4b7   :  { %5876 = vpow2.f32 %v4818_v56 }
 0x4b8   :  { %5878 = vpow2.f32 %v4819_v41 }
 0x4b9   :  { %5880 = vpow2.f32 %v4820_v11 }
 0x4ba   :  { %v5863_v45 = vpop.eup %5862  ;;  %5882 = vpow2.f32 %v4821_v33 }
 0x4bb   :  { %v5865_v7 = vpop.eup %5864  ;;  %v2101_v25 = vadd.f32 1.0, %v5863_v45  ;;  %5884 = vpow2.f32 %v4822_v5  ;;  %v4824_v5 = vmul.f32 -1.442695, %v2138_v3 }
 0x4bc   :  { %v5867_v14 = vpop.eup %5866  ;;  %v2102_v58 = vadd.f32 1.0, %v5865_v7  ;;  %5886 = vpow2.f32 %v4823_v55  ;;  %v4825_v7 = vmul.f32 -1.442695, %v2139_v49 }
 0x4bd   :  { %v5869_v43 = vpop.eup %5868  ;;  %v2103_v30 = vadd.f32 1.0, %v5867_v14  ;;  %5888 = vrcp.f32 %v2101_v25 }
 0x4be   :  { %v5871_v24 = vpop.eup %5870  ;;  %v2104_v46 = vadd.f32 1.0, %v5869_v43  ;;  %5890 = vrcp.f32 %v2102_v58  ;;  %v4826_v58 = vmul.f32 -1.442695, %v2140_v19  ;;  %v2197_v19 = vrot.slane %v7503_v60, 2 }
 0x4bf   :  { %v5873_v36 = vpop.eup %5872  ;;  %v2105_v56 = vadd.f32 1.0, %v5871_v24  ;;  %5892 = vrcp.f32 %v2103_v30 }
 0x4c0   :  { %v5875_v61 = vpop.eup %5874  ;;  %v2106_v41 = vadd.f32 1.0, %v5873_v36  ;;  %5894 = vrcp.f32 %v2104_v46 }
 0x4c1   :  { %v5877_v11 = vpop.eup %5876  ;;  %v2107_v33 = vadd.f32 1.0, %v5875_v61  ;;  %5896 = vrcp.f32 %v2105_v56 }
 0x4c2   :  { %v5879_v55 = vpop.eup %5878  ;;  %v2108_v45 = vadd.f32 1.0, %v5877_v11  ;;  %5898 = vrcp.f32 %v2106_v41  ;;  %v2198_v11 = vrot.slane %v7505_v20, 2 }
 0x4c3   :  { %v5881_v25 = vpop.eup %5880  ;;  %5900 = vrcp.f32 %v2107_v33  ;;  %v2173_v43 = vadd.f32 1.0, %v5879_v55 }
 0x4c4   :  { %v5883_v14 = vpop.eup %5882  ;;  %5902 = vrcp.f32 %v2108_v45  ;;  %v2174_v24 = vadd.f32 1.0, %v5881_v25 }
 0x4c5   :  { %v5885_v30 = vpop.eup %5884  ;;  %5904 = vpow2.f32 %v4824_v5  ;;  %v2175_v46 = vadd.f32 1.0, %v5883_v14  ;;  %v2199_v5 = vrot.slane %v7509_v37, 2 }
 0x4c6   :  { %v5887_v34 = vpop.eup %5886  ;;  %5906 = vpow2.f32 %v4825_v7  ;;  %v2176_v3 = vadd.f32 1.0, %v5885_v30  ;;  %v2201_v7 = vrot.slane %v7507_v2, 2  ;;  %v2221_v30 = vrot.slane %v7503_v60, 3 }
 0x4c7   :  { %v7535_v36 = vpop.eup %5888  ;;  %5908 = vpow2.f32 %v4826_v58  ;;  %v2177_v61 = vadd.f32 1.0, %v5887_v34  ;;  %v2200_v34 = vrot.slane %v7511_v12, 2  ;;  %v2224_v60 = vrot.slane %v7511_v12, 3 }
 0x4c8   :  { %v7537_v56 = vpop.eup %5890  ;;  %5910 = vrcp.f32 %v2173_v43 }
 0x4c9   :  { %v7539_v49 = vpop.eup %5892  ;;  %5912 = vrcp.f32 %v2174_v24  ;;  %v4830_v12 = vmul.f32 -1.442695, %v2224_v60 }
 0x4ca   :  { %v7542_v41 = vpop.eup %5894  ;;  %5914 = vrcp.f32 %v2175_v46 }
 0x4cb   :  { %v7545_v33 = vpop.eup %5896  ;;  %5916 = vrcp.f32 %v2176_v3  ;;  %v2202_v3 = vrot.slane %v7513_v8, 2 }
 0x4cc   :  { %v7548_v55 = vpop.eup %5898  ;;  %5918 = vrcp.f32 %v2177_v61  ;;  %v2222_v61 = vrot.slane %v7505_v20, 3  ;;  %v2226_v20 = vrot.slane %v7513_v8, 3 }
 0x4cd   :  { %v7551_v45 = vpop.eup %5900  ;;  %5920 = vtanh.f32 %v2197_v19  ;;  %v2203_v19 = vrot.slane %v7515_v38, 2 }
 0x4ce   :  { %v7554_v25 = vpop.eup %5902  ;;  %5922 = vtanh.f32 %v2198_v11  ;;  %v2223_v11 = vrot.slane %v7509_v37, 3  ;;  %v2227_v37 = vrot.slane %v7515_v38, 3 }
 0x4cf   :  { %v5905_v58 = vpop.eup %5904  ;;  %5924 = vtanh.f32 %v2199_v5 }
 0x4d0   :  { %v5907_v14 = vpop.eup %5906  ;;  %v2178_v43 = vadd.f32 1.0, %v5905_v58  ;;  %5926 = vtanh.f32 %v2200_v34  ;;  %v2204_v34 = vrot.slane %v7519_v47, 2  ;;  %v4829_v48 = vmul.f32 -1.442695, %v2223_v11 }
 0x4d1   :  { %v5909_v24 = vpop.eup %5908  ;;  %v2179_v46 = vadd.f32 1.0, %v5907_v14  ;;  %5928 = vtanh.f32 %v2201_v7  ;;  %v2225_v14 = vrot.slane %v7507_v2, 3  ;;  %v4827_v7 = vmul.f32 -1.442695, %v2221_v30 }
 0x4d2   :  { %v5911_v23 = vpop.eup %5910  ;;  %v2180_v10 = vadd.f32 1.0, %v5909_v24  ;;  %5930 = vrcp.f32 %v2178_v43  ;;  %v4828_v43 = vmul.f32 -1.442695, %v2222_v61  ;;  %v4834_v47 = vmul.f32 -1.442695, %v2228_v21 }
 0x4d3   :  { %v5913_v5 = vpop.eup %5912  ;;  %5932 = vrcp.f32 %v2179_v46  ;;  %v2285_v2 = vmul.f32 %v5911_v23, %v7375_v15 }
 0x4d4   :  { %v5915_v58 = vpop.eup %5914  ;;  %5934 = vrcp.f32 %v2180_v10  ;;  %v4831_v10 = vmul.f32 -1.442695, %v2225_v14  ;;  %v2286_v8 = vmul.f32 %v5913_v5, %v7378_v16 }
 0x4d5   :  { %v5917_v42 = vpop.eup %5916  ;;  %5936 = vtanh.f32 %v2202_v3  ;;  %v4832_v3 = vmul.f32 -1.442695, %v2226_v20  ;;  %v2287_v11 = vmul.f32 %v5915_v58, %v7381_v54 }
 0x4d6   :  { %v5919_v24 = vpop.eup %5918  ;;  %5938 = vtanh.f32 %v2203_v19  ;;  %v4833_v19 = vmul.f32 -1.442695, %v2227_v37  ;;  %v2288_v14 = vmul.f32 %v5917_v42, %v7383_v62 }
 0x4d7   :  { %v5921_v46 = vpop.eup %5920  ;;  %5940 = vtanh.f32 %v2204_v34  ;;  %v2289_v16 = vmul.f32 %v5919_v24, %v7385_v29 }
 0x4d8   :  { %v5923_v6 = vpop.eup %5922  ;;  %5942 = vpow2.f32 %v4827_v7  ;;  %v2293_v38 = vmul.f32 %v5921_v46, %v7535_v36 }
 0x4d9   :  { %v5925_v30 = vpop.eup %5924  ;;  %5944 = vpow2.f32 %v4828_v43  ;;  %v2294_v60 = vmul.f32 %v5923_v6, %v7537_v56 }
 0x4da   :  { %v5927_v61 = vpop.eup %5926  ;;  %5946 = vpow2.f32 %v4829_v48  ;;  %v2295_v23 = vmul.f32 %v5925_v30, %v7539_v49  ;;  %v7575_v5 = vadd.f32 %v2293_v38, %v2285_v2 }
 0x4db   :  { %v5929_v34 = vpop.eup %5928  ;;  %5948 = vpow2.f32 %v4830_v12  ;;  %v2296_v36 = vmul.f32 %v5927_v61, %v7542_v41  ;;  %v7578_v54 = vadd.f32 %v2294_v60, %v2286_v8 }
 0x4dc   :  { %v5931_v15 = vpop.eup %5930  ;;  %5950 = vpow2.f32 %v4831_v10  ;;  %v2297_v6 = vmul.f32 %v5929_v34, %v7545_v33  ;;  %v7581_v21 = vadd.f32 %v2295_v23, %v2287_v11 }
 0x4dd   :  { %v5933_v48 = vpop.eup %5932  ;;  %5952 = vpow2.f32 %v4832_v3  ;;  %v7583_v42 = vadd.f32 %v2296_v36, %v2288_v14  ;;  %v2290_v46 = vmul.f32 %v5931_v15, %v7398_v32 }
 0x4de   :  { %v5935_v58 = vpop.eup %5934  ;;  %5954 = vpow2.f32 %v4833_v19  ;;  %v7585_v29 = vadd.f32 %v2297_v6, %v2289_v16  ;;  %v2291_v2 = vmul.f32 %v5933_v48, %v7400_v4 }
 0x4df   :  { %v5937_v62 = vpop.eup %5936  ;;  %5956 = vpow2.f32 %v4834_v47  ;;  %v2292_v61 = vmul.f32 %v5935_v58, %v7402_v50 }
 0x4e0   :  { %v5939_v56 = vpop.eup %5938  ;;  %5958 = vtanh.f32 %v7575_v5  ;;  %v2298_v8 = vmul.f32 %v5937_v62, %v7548_v55 }
 0x4e1   :  { %v5941_v49 = vpop.eup %5940  ;;  %5960 = vtanh.f32 %v7578_v54  ;;  %v2299_v11 = vmul.f32 %v5939_v56, %v7551_v45 }
 0x4e2   :  { %v5943_v41 = vpop.eup %5942  ;;  %5962 = vtanh.f32 %v7581_v21  ;;  %v2300_v32 = vmul.f32 %v5941_v49, %v7554_v25  ;;  %v7598_v60 = vadd.f32 %v2298_v8, %v2290_v46 }
 0x4e3   :  { %v5945_v7 = vpop.eup %5944  ;;  %v2261_v20 = vadd.f32 1.0, %v5943_v41  ;;  %5964 = vtanh.f32 %v7583_v42  ;;  %v7600_v15 = vadd.f32 %v2299_v11, %v2291_v2 }
 0x4e4   :  { %v5947_v33 = vpop.eup %5946  ;;  %v2262_v43 = vadd.f32 1.0, %v5945_v7  ;;  %5966 = vtanh.f32 %v7585_v29  ;;  %v7602_v50 = vadd.f32 %v2300_v32, %v2292_v61 }
 0x4e5   :  { %v5949_v24 = vpop.eup %5948  ;;  %v2263_v37 = vadd.f32 1.0, %v5947_v33  ;;  %5968 = vrcp.f32 %v2261_v20 }
 0x4e6   :  { %v5951_v12 = vpop.eup %5950  ;;  %v2264_v10 = vadd.f32 1.0, %v5949_v24  ;;  %5970 = vrcp.f32 %v2262_v43 }
 0x4e7   :  { %v5953_v30 = vpop.eup %5952  ;;  %v2265_v3 = vadd.f32 1.0, %v5951_v12  ;;  %5972 = vrcp.f32 %v2263_v37 }
 0x4e8   :  { %v5955_v19 = vpop.eup %5954  ;;  %v2266_v38 = vadd.f32 1.0, %v5953_v30  ;;  %5974 = vrcp.f32 %v2264_v10 }
 0x4e9   :  { %v5957_v34 = vpop.eup %5956  ;;  %v2267_v47 = vadd.f32 1.0, %v5955_v19  ;;  %5976 = vrcp.f32 %v2265_v3 }
 0x4ea   :  { %v5959_v4 = vpop.eup %5958  ;;  %v2268_v14 = vadd.f32 1.0, %v5957_v34  ;;  %5978 = vrcp.f32 %v2266_v38 }
 0x4eb   :  { %v5961_v55 = vpop.eup %5960  ;;  %5980 = vrcp.f32 %v2267_v47 }
 0x4ec   :  { %v5963_v23 = vpop.eup %5962  ;;  %5982 = vrcp.f32 %v2268_v14 }
 0x4ed   :  { %v5965_v16 = vpop.eup %5964  ;;  %5984 = vtanh.f32 %v7598_v60 }
 0x4ee   :  { %v5967_v45 = vpop.eup %5966  ;;  %5986 = vtanh.f32 %v7600_v15 }
 0x4ef   :  { %v5969_v25 = vpop.eup %5968  ;;  %5988 = vtanh.f32 %v7602_v50 }
 0x4f0   :  { %v5971_v48 = vpop.eup %5970  ;;  %v2317_v36 = vmul.f32 %v5969_v25, %v5959_v4  ;;  %v8478_v25 = vld [vmem:[#allocation9_spill] sm:$0xff] }
 0x4f1   :  { %v5973_v58 = vpop.eup %5972  ;;  %v2318_v6 = vmul.f32 %v5971_v48, %v5961_v55  ;;  %v8479_v48 = vld [vmem:[#allocation10_spill] sm:$0xff] }
 0x4f2   :  { %v5975_v62 = vpop.eup %5974  ;;  %v2319_v56 = vmul.f32 %v5973_v58, %v5963_v23  ;;  %2325 = vst [vmem:[%s8393_s4 + $0x3] sm:$0x1] %v2317_v36  ;;  %v8475_v23 = vld [vmem:[#allocation6_spill] sm:$0xff]  ;;  %v8481_v58 = vld [vmem:[#allocation12_spill] sm:$0xff] }
 0x4f3   :  { %v5977_v49 = vpop.eup %5976  ;;  %v2320_v41 = vmul.f32 %v5975_v62, %v5965_v16  ;;  %2326 = vst [vmem:[%s8393_s4 + $0xb] sm:$0x1] %v2318_v6  ;;  %v2357_v7 = vcombine.low %v2317_v36, %v2318_v6  ;;  %v8476_v16 = vld [vmem:[#allocation7_spill] sm:$0xff]  ;;  %v8482_v6 = vld [vmem:[#allocation13_spill] sm:$0xff]  ;;  %v8483_v62 = vld [vmem:[#allocation14_spill] sm:$0xff] }
 0x4f4   :  { %v5979_v20 = vpop.eup %5978  ;;  %v2321_v33 = vmul.f32 %v5977_v49, %v5967_v45  ;;  %2327 = vst [vmem:[%s8393_s4 + $0x13] sm:$0x1] %v2319_v56  ;;  %v8477_v45 = vld [vmem:[#allocation8_spill] sm:$0xff]  ;;  %v8480_v36 = vld [vmem:[#allocation11_spill] sm:$0xff] }
 0x4f5   :  { %v5981_v43 = vpop.eup %5980  ;;  %2328 = vst [vmem:[%s8393_s4 + $0x1b] sm:$0x1] %v2320_v41  ;;  %v2358_v24 = vcombine.low %v2319_v56, %v2320_v41  ;;  %v2367_v12 = vrot.slane %v2357_v7, %v6868_v59  ;;  %v8484_v56 = vld [vmem:[#allocation15_spill] sm:$0xff]  ;;  %v8485_v49 = vld [vmem:[#allocation16_spill] sm:$0xff]  ;;  %v8487_v7 = vld [vmem:[#allocation5_spill] sm:$0xff] }
 0x4f6   :  { %v5983_v37 = vpop.eup %5982  ;;  %2329 = vst [vmem:[%s8393_s4 + $0x23] sm:$0x1] %v2321_v33  ;;  %v8486_v41 = vld [vmem:[#allocation4_spill] sm:$0xff] }
 0x4f7   :  { %v5985_v46 = vpop.eup %5984  ;;  %v2374_v10 = vrot.slane %v2358_v24, %v6868_v59 }
 0x4f8   :  { %v5987_v2 = vpop.eup %5986  ;;  %v2322_v30 = vmul.f32 %v5985_v46, %v5979_v20 }
 0x4f9   :  { %v5989_v3 = vpop.eup %5988  ;;  %v2323_v8 = vmul.f32 %v5987_v2, %v5981_v43  ;;  %v2389_v61 = vcombine.low %v2367_v12, %v2374_v10 }
 0x4fa   :  { %v2324_v19 = vmul.f32 %v5989_v3, %v5983_v37  ;;  %2330 = vst [vmem:[%s8393_s4 + $0x2b] sm:$0x1] %v2322_v30  ;;  %v2359_v38 = vcombine.low %v2321_v33, %v2322_v30 }
 0x4fb   :  { %2331 = vst [vmem:[%s8393_s4 + $0x33] sm:$0x1] %v2323_v8  ;;  %v2397_v4 = vrot.slane %v2389_v61, %v6868_v59 }
 0x4fc   :  { %2332 = vst [vmem:[%s8393_s4 + $0x3b] sm:$0x1] %v2324_v19  ;;  %v2360_v11 = vcombine.low %v2323_v8, %v2324_v19  ;;  %v2381_v34 = vrot.slane %v2359_v38, %v6868_v59 }
 0x4fe   :  { %v2388_v47 = vrot.slane %v2360_v11, %v6868_v59 }
 0x500   :  { %v2390_v32 = vcombine.low %v2381_v34, %v2388_v47  ;;  %v4835_v34 = vld [vmem:[%s8391_s0 + $0x4] ss:$8 sm:$0xf] }
 0x501   :  { %v4836_v47 = vld [vmem:[%s8391_s0 + $0x24] ss:$8 sm:$0xf] }
 0x502   :  { %v2404_v14 = vrot.slane %v2390_v32, %v6868_v59  ;;  %v4837_v32 = vld [vmem:[%s8391_s0 + $0x44] ss:$8 sm:$0xf] }
 0x504   :  { %v2405_v55 = vcombine.low %v2397_v4, %v2404_v14  ;;  %v4839_v4 = vld [vmem:[%s8391_s0 + $0x84] ss:$8 sm:$0xf] }
 0x506   :  { %2472 = vmatmul.mubr.f32.vlgmr.msra.gmra.mrb[8].mxu0 %v2405_v55  ;;  %2543 = vmatmul.mubr.f32.vlgmr.msra.gmra.mrb[8].mxu1 %v2405_v55 }
 0x507   :  { %5286 = vmatpush1.bf16.msra.mxu0 %v6563_v9  ;;  %5318 = vmatpush1.bf16.msra.mxu1 %v6575_v13 }
 0x508   :  { %5288 = vmatprep.subr.bf16.mxu0 %v6588_v17  ;;  %5320 = vmatprep.subr.bf16.mxu1 %v6590_v18 }
 0x509   :  { %3031 = vmatprep.mubr.f32.mxu0 %v8437_v28  ;;  %3102 = vmatprep.mubr.f32.mxu1 %v8437_v28 }
 0x50b   :  { %5290 = vmatpush1.bf16.msra.mxu0 %v6602_v22  ;;  %5322 = vmatpush1.bf16.msra.mxu1 %v6615_v26 }
 0x50c   :  { %5292 = vmatprep.subr.bf16.mxu0 %v6617_v27  ;;  %5324 = vmatprep.subr.bf16.mxu1 %v6628_v31 }
 0x50f   :  { %5294 = vmatpush1.bf16.msra.mxu0 %v6640_v35  ;;  %5326 = vmatpush1.bf16.msra.mxu1 %v6653_v39 }
 0x510   :  { %5296 = vmatprep.subr.bf16.mxu0 %v6655_v40  ;;  %5328 = vmatprep.subr.bf16.mxu1 %v6667_v44 }
 0x513   :  { %5298 = vmatpush1.bf16.msra.mxu0 %v6688_v51  ;;  %5330 = vmatpush1.bf16.msra.mxu1 %v6692_v52 }
 0x514   :  { %5300 = vmatprep.subr.bf16.mxu0 %v6694_v53  ;;  %5332 = vmatprep.subr.bf16.mxu1 %v6706_v57 }
 0x517   :  { %5302 = vmatpush1.bf16.msra.mxu0 %v6724_v63  ;;  %5334 = vmatpush1.bf16.msra.mxu1 %v6728_v0 }
 0x518   :  { %5304 = vmatprep.subr.bf16.mxu0 %v6730_v1  ;;  %5336 = vmatprep.subr.bf16.mxu1 %v8475_v23 }
 0x51b   :  { %5306 = vmatpush1.bf16.msra.mxu0 %v8476_v16  ;;  %5338 = vmatpush1.bf16.msra.mxu1 %v8477_v45 }
 0x51c   :  { %5308 = vmatprep.subr.bf16.mxu0 %v8478_v25  ;;  %5340 = vmatprep.subr.bf16.mxu1 %v8479_v48 }
 0x51f   :  { %5310 = vmatpush1.bf16.msra.mxu0 %v8480_v36  ;;  %5342 = vmatpush1.bf16.msra.mxu1 %v8481_v58 }
 0x520   :  { %5312 = vmatprep.subr.bf16.mxu0 %v8482_v6  ;;  %5344 = vmatprep.subr.bf16.mxu1 %v8483_v62 }
 0x523   :  { %5314 = vmatpush1.bf16.msra.mxu0 %v8484_v56  ;;  %5346 = vmatpush1.bf16.msra.mxu1 %v8485_v49 }
 0x524   :  { %5348 = vmatprep.subr.bf16.mxu0 %v8486_v41  ;;  %5380 = vmatprep.subr.bf16.mxu1 %v8487_v7 }
 0x5d9   :  { %v2473_v20 = vpop.f32.mrb[8].mxu0  ;;  %v2544_v33 = vpop.f32.mrb[8].mxu1 }
 0x5da   :  { %v2475_v43 = vpop.f32.mrb[9].mxu0  ;;  %v2546_v24 = vpop.f32.mrb[9].mxu1 }
 0x5db   :  { %v2553_v37 = vcombine.low %v2473_v20, %v2475_v43  ;;  %v2554_v46 = vcombine.high %v2473_v20, %v2475_v43  ;;  %v2555_v12 = vcombine.low %v2544_v33, %v2546_v24  ;;  %v2556_v10 = vcombine.high %v2544_v33, %v2546_v24  ;;  %v4838_v43 = vld [vmem:[%s8391_s0 + $0x64] ss:$8 sm:$0xf] }
 0x5dc   :  { %v4840_v24 = vld [vmem:[%s8391_s0 + $0xa4] ss:$8 sm:$0xf] }
 0x5dd   :  { %v2563_v2 = vrot.slane %v2553_v37, %v6868_v59  ;;  %v2570_v30 = vrot.slane %v2554_v46, %v6868_v59  ;;  %v2577_v3 = vrot.slane %v2555_v12, %v6868_v59  ;;  %v2584_v8 = vrot.slane %v2556_v10, %v6868_v59  ;;  %v4841_v37 = vld [vmem:[%s8391_s0 + $0xc4] ss:$8 sm:$0xf] }
 0x5df   :  { %v2585_v61 = vcombine.low %v2563_v2, %v2577_v3  ;;  %v2586_v19 = vcombine.high %v2563_v2, %v2577_v3  ;;  %v2587_v38 = vcombine.low %v2570_v30, %v2584_v8  ;;  %v2588_v11 = vcombine.high %v2570_v30, %v2584_v8  ;;  %v4842_v30 = vld [vmem:[%s8391_s0 + $0xe4] ss:$8 sm:$0xf] }
 0x5e1   :  { %v2595_v14 = vrot.slane %v2585_v61, %v6868_v59  ;;  %v2602_v55 = vrot.slane %v2587_v38, %v6868_v59  ;;  %v2609_v20 = vrot.slane %v2586_v19, %v6868_v59  ;;  %v2616_v33 = vrot.slane %v2588_v11, %v6868_v59 }
 0x5e3   :  { %v2617_v46 = vcombine.high %v2595_v14, %v2595_v14  ;;  %v2618_v12 = vcombine.high %v2602_v55, %v2602_v55  ;;  %v2619_v10 = vcombine.high %v2609_v20, %v2609_v20  ;;  %v2620_v2 = vcombine.high %v2616_v33, %v2616_v33 }
 0x5e4   :  { %v7703_v3 = vadd.f32 %v4835_v34, %v2595_v14  ;;  %v7705_v8 = vadd.f32 %v4836_v47, %v2609_v20  ;;  %v7707_v61 = vadd.f32 %v4839_v4, %v2602_v55  ;;  %v7713_v11 = vadd.f32 %v4840_v24, %v2616_v33 }
 0x5e5   :  { %v7709_v19 = vadd.f32 %v4837_v32, %v2617_v46  ;;  %v7711_v38 = vadd.f32 %v4838_v43, %v2619_v10  ;;  %v7715_v7 = vadd.f32 %v4841_v37, %v2618_v12  ;;  %v7719_v56 = vadd.f32 %v4842_v30, %v2620_v2 }
 0x5e6   :  { %v4843_v41 = vmul.f32 -1.442695, %v7703_v3  ;;  %v4844_v49 = vmul.f32 -1.442695, %v7705_v8  ;;  %v4847_v32 = vmul.f32 -1.442695, %v7707_v61 }
 0x5e7   :  { %v4845_v34 = vmul.f32 -1.442695, %v7709_v19  ;;  %v4846_v47 = vmul.f32 -1.442695, %v7711_v38  ;;  %v2693_v4 = vrot.slane %v7703_v3, 1  ;;  %v2694_v55 = vrot.slane %v7705_v8, 1 }
 0x5e8   :  { %5990 = vpow2.f32 %v4843_v41  ;;  %v4848_v14 = vmul.f32 -1.442695, %v7713_v11  ;;  %v4849_v20 = vmul.f32 -1.442695, %v7715_v7  ;;  %v2695_v33 = vrot.slane %v7709_v19, 1 }
 0x5e9   :  { %5992 = vpow2.f32 %v4844_v49  ;;  %v4850_v43 = vmul.f32 -1.442695, %v7719_v56  ;;  %v2696_v24 = vrot.slane %v7711_v38, 1  ;;  %v2697_v41 = vrot.slane %v7707_v61, 1 }
 0x5ea   :  { %5994 = vpow2.f32 %v4845_v34  ;;  %v4851_v37 = vmul.f32 -1.442695, %v2693_v4  ;;  %v4852_v49 = vmul.f32 -1.442695, %v2694_v55  ;;  %v4853_v46 = vmul.f32 -1.442695, %v2695_v33 }
 0x5eb   :  { %5996 = vpow2.f32 %v4846_v47  ;;  %v4854_v12 = vmul.f32 -1.442695, %v2696_v24  ;;  %v4855_v10 = vmul.f32 -1.442695, %v2697_v41  ;;  %v2698_v4 = vrot.slane %v7713_v11, 1 }
 0x5ec   :  { %5998 = vpow2.f32 %v4847_v32  ;;  %v2700_v24 = vrot.slane %v7719_v56, 1  ;;  %v2788_v16 = vrot.slane %v7719_v56, 3 }
 0x5ed   :  { %6000 = vpow2.f32 %v4848_v14 }
 0x5ee   :  { %6002 = vpow2.f32 %v4849_v20  ;;  %v2699_v20 = vrot.slane %v7715_v7, 1 }
 0x5ef   :  { %6004 = vpow2.f32 %v4850_v43 }
 0x5f0   :  { %6006 = vpow2.f32 %v4851_v37 }
 0x5f1   :  { %6008 = vpow2.f32 %v4852_v49 }
 0x5f2   :  { %v5991_v2 = vpop.eup %5990  ;;  %6010 = vpow2.f32 %v4853_v46 }
 0x5f3   :  { %v5993_v30 = vpop.eup %5992  ;;  %v2661_v34 = vadd.f32 1.0, %v5991_v2  ;;  %6012 = vpow2.f32 %v4854_v12  ;;  %v4856_v12 = vmul.f32 -1.442695, %v2698_v4 }
 0x5f4   :  { %v5995_v47 = vpop.eup %5994  ;;  %v2662_v62 = vadd.f32 1.0, %v5993_v30  ;;  %6014 = vpow2.f32 %v4855_v10  ;;  %v4857_v30 = vmul.f32 -1.442695, %v2699_v20 }
 0x5f5   :  { %v5997_v32 = vpop.eup %5996  ;;  %v2663_v6 = vadd.f32 1.0, %v5995_v47  ;;  %6016 = vrcp.f32 %v2661_v34 }
 0x5f6   :  { %v5999_v14 = vpop.eup %5998  ;;  %v2664_v55 = vadd.f32 1.0, %v5997_v32  ;;  %6018 = vrcp.f32 %v2662_v62  ;;  %v4858_v62 = vmul.f32 -1.442695, %v2700_v24  ;;  %v2757_v24 = vrot.slane %v7703_v3, 2 }
 0x5f7   :  { %v6001_v33 = vpop.eup %6000  ;;  %v2665_v43 = vadd.f32 1.0, %v5999_v14  ;;  %6020 = vrcp.f32 %v2663_v6 }
 0x5f8   :  { %v6003_v41 = vpop.eup %6002  ;;  %v2666_v37 = vadd.f32 1.0, %v6001_v33  ;;  %6022 = vrcp.f32 %v2664_v55 }
 0x5f9   :  { %v6005_v49 = vpop.eup %6004  ;;  %v2667_v46 = vadd.f32 1.0, %v6003_v41  ;;  %6024 = vrcp.f32 %v2665_v43 }
 0x5fa   :  { %v6007_v10 = vpop.eup %6006  ;;  %v2668_v2 = vadd.f32 1.0, %v6005_v49  ;;  %6026 = vrcp.f32 %v2666_v37  ;;  %v2758_v49 = vrot.slane %v7705_v8, 2 }
 0x5fb   :  { %v6009_v34 = vpop.eup %6008  ;;  %6028 = vrcp.f32 %v2667_v46  ;;  %v2733_v32 = vadd.f32 1.0, %v6007_v10 }
 0x5fc   :  { %v6011_v47 = vpop.eup %6010  ;;  %6030 = vrcp.f32 %v2668_v2  ;;  %v2734_v14 = vadd.f32 1.0, %v6009_v34 }
 0x5fd   :  { %v6013_v6 = vpop.eup %6012  ;;  %6032 = vpow2.f32 %v4856_v12  ;;  %v2735_v55 = vadd.f32 1.0, %v6011_v47  ;;  %v2759_v12 = vrot.slane %v7709_v19, 2 }
 0x5fe   :  { %v6015_v58 = vpop.eup %6014  ;;  %6034 = vpow2.f32 %v4857_v30  ;;  %v2736_v4 = vadd.f32 1.0, %v6013_v6  ;;  %v2761_v30 = vrot.slane %v7707_v61, 2  ;;  %v2781_v6 = vrot.slane %v7703_v3, 3 }
 0x5ff   :  { %v7735_v33 = vpop.eup %6016  ;;  %6036 = vpow2.f32 %v4858_v62  ;;  %v2737_v41 = vadd.f32 1.0, %v6015_v58  ;;  %v2760_v58 = vrot.slane %v7711_v38, 2  ;;  %v2784_v3 = vrot.slane %v7711_v38, 3 }
 0x600   :  { %v7737_v43 = vpop.eup %6018  ;;  %6038 = vrcp.f32 %v2733_v32 }
 0x601   :  { %v7739_v20 = vpop.eup %6020  ;;  %6040 = vrcp.f32 %v2734_v14  ;;  %v4862_v38 = vmul.f32 -1.442695, %v2784_v3 }
 0x602   :  { %v7742_v37 = vpop.eup %6022  ;;  %6042 = vrcp.f32 %v2735_v55 }
 0x603   :  { %v7745_v46 = vpop.eup %6024  ;;  %6044 = vrcp.f32 %v2736_v4  ;;  %v2762_v4 = vrot.slane %v7713_v11, 2 }
 0x604   :  { %v7748_v10 = vpop.eup %6026  ;;  %6046 = vrcp.f32 %v2737_v41  ;;  %v2782_v41 = vrot.slane %v7705_v8, 3  ;;  %v2786_v8 = vrot.slane %v7713_v11, 3 }
 0x605   :  { %v7751_v2 = vpop.eup %6028  ;;  %6048 = vtanh.f32 %v2757_v24  ;;  %v2763_v24 = vrot.slane %v7715_v7, 2 }
 0x606   :  { %v7754_v34 = vpop.eup %6030  ;;  %6050 = vtanh.f32 %v2758_v49  ;;  %v2783_v49 = vrot.slane %v7709_v19, 3  ;;  %v2787_v19 = vrot.slane %v7715_v7, 3 }
 0x607   :  { %v6033_v62 = vpop.eup %6032  ;;  %6052 = vtanh.f32 %v2759_v12 }
 0x608   :  { %v6035_v47 = vpop.eup %6034  ;;  %v2738_v32 = vadd.f32 1.0, %v6033_v62  ;;  %6054 = vtanh.f32 %v2760_v58  ;;  %v2764_v58 = vrot.slane %v7719_v56, 2  ;;  %v4861_v45 = vmul.f32 -1.442695, %v2783_v49 }
 0x609   :  { %v6037_v14 = vpop.eup %6036  ;;  %v2739_v55 = vadd.f32 1.0, %v6035_v47  ;;  %6056 = vtanh.f32 %v2761_v30  ;;  %v2785_v47 = vrot.slane %v7707_v61, 3  ;;  %v4859_v30 = vmul.f32 -1.442695, %v2781_v6 }
 0x60a   :  { %v6039_v36 = vpop.eup %6038  ;;  %v2740_v48 = vadd.f32 1.0, %v6037_v14  ;;  %6058 = vrcp.f32 %v2738_v32  ;;  %v4860_v32 = vmul.f32 -1.442695, %v2782_v41  ;;  %v4866_v56 = vmul.f32 -1.442695, %v2788_v16 }
 0x60b   :  { %v6041_v12 = vpop.eup %6040  ;;  %6060 = vrcp.f32 %v2739_v55  ;;  %v2845_v61 = vmul.f32 %v6039_v36, %v7575_v5 }
 0x60c   :  { %v6043_v62 = vpop.eup %6042  ;;  %6062 = vrcp.f32 %v2740_v48  ;;  %v4863_v48 = vmul.f32 -1.442695, %v2785_v47  ;;  %v2846_v11 = vmul.f32 %v6041_v12, %v7578_v54 }
 0x60d   :  { %v6045_v25 = vpop.eup %6044  ;;  %6064 = vtanh.f32 %v2762_v4  ;;  %v4864_v4 = vmul.f32 -1.442695, %v2786_v8  ;;  %v2847_v49 = vmul.f32 %v6043_v62, %v7581_v21 }
 0x60e   :  { %v6047_v14 = vpop.eup %6046  ;;  %6066 = vtanh.f32 %v2763_v24  ;;  %v4865_v24 = vmul.f32 -1.442695, %v2787_v19  ;;  %v2848_v47 = vmul.f32 %v6045_v25, %v7583_v42 }
 0x60f   :  { %v6049_v55 = vpop.eup %6048  ;;  %6068 = vtanh.f32 %v2764_v58  ;;  %v2849_v54 = vmul.f32 %v6047_v14, %v7585_v29 }
 0x610   :  { %v6051_v23 = vpop.eup %6050  ;;  %6070 = vpow2.f32 %v4859_v30  ;;  %v2853_v7 = vmul.f32 %v6049_v55, %v7735_v33 }
 0x611   :  { %v6053_v6 = vpop.eup %6052  ;;  %6072 = vpow2.f32 %v4860_v32  ;;  %v2854_v3 = vmul.f32 %v6051_v23, %v7737_v43 }
 0x612   :  { %v6055_v41 = vpop.eup %6054  ;;  %6074 = vpow2.f32 %v4861_v45  ;;  %v2855_v36 = vmul.f32 %v6053_v6, %v7739_v20  ;;  %v7775_v12 = vadd.f32 %v2853_v7, %v2845_v61 }
 0x613   :  { %v6057_v58 = vpop.eup %6056  ;;  %6076 = vpow2.f32 %v4862_v38  ;;  %v2856_v33 = vmul.f32 %v6055_v41, %v7742_v37  ;;  %v7778_v21 = vadd.f32 %v2854_v3, %v2846_v11 }
 0x614   :  { %v6059_v5 = vpop.eup %6058  ;;  %6078 = vpow2.f32 %v4863_v48  ;;  %v2857_v23 = vmul.f32 %v6057_v58, %v7745_v46  ;;  %v7781_v16 = vadd.f32 %v2855_v36, %v2847_v49 }
 0x615   :  { %v6061_v45 = vpop.eup %6060  ;;  %6080 = vpow2.f32 %v4864_v4  ;;  %v7783_v25 = vadd.f32 %v2856_v33, %v2848_v47  ;;  %v2850_v55 = vmul.f32 %v6059_v5, %v7598_v60 }
 0x616   :  { %v6063_v62 = vpop.eup %6062  ;;  %6082 = vpow2.f32 %v4865_v24  ;;  %v7785_v29 = vadd.f32 %v2857_v23, %v2849_v54  ;;  %v2851_v61 = vmul.f32 %v6061_v45, %v7600_v15 }
 0x617   :  { %v6065_v42 = vpop.eup %6064  ;;  %6084 = vpow2.f32 %v4866_v56  ;;  %v2852_v41 = vmul.f32 %v6063_v62, %v7602_v50 }
 0x618   :  { %v6067_v43 = vpop.eup %6066  ;;  %6086 = vtanh.f32 %v7775_v12  ;;  %v2858_v11 = vmul.f32 %v6065_v42, %v7748_v10 }
 0x619   :  { %v6069_v20 = vpop.eup %6068  ;;  %6088 = vtanh.f32 %v7778_v21  ;;  %v2859_v49 = vmul.f32 %v6067_v43, %v7751_v2 }
 0x61a   :  { %v6071_v37 = vpop.eup %6070  ;;  %6090 = vtanh.f32 %v7781_v16  ;;  %v2860_v60 = vmul.f32 %v6069_v20, %v7754_v34  ;;  %v7798_v3 = vadd.f32 %v2858_v11, %v2850_v55 }
 0x61b   :  { %v6073_v30 = vpop.eup %6072  ;;  %v2821_v8 = vadd.f32 1.0, %v6071_v37  ;;  %6092 = vtanh.f32 %v7783_v25  ;;  %v7800_v5 = vadd.f32 %v2859_v49, %v2851_v61 }
 0x61c   :  { %v6075_v46 = vpop.eup %6074  ;;  %v2822_v32 = vadd.f32 1.0, %v6073_v30  ;;  %6094 = vtanh.f32 %v7785_v29  ;;  %v7802_v50 = vadd.f32 %v2860_v60, %v2852_v41 }
 0x61d   :  { %v6077_v14 = vpop.eup %6076  ;;  %v2823_v19 = vadd.f32 1.0, %v6075_v46  ;;  %6096 = vrcp.f32 %v2821_v8 }
 0x61e   :  { %v6079_v38 = vpop.eup %6078  ;;  %v2824_v48 = vadd.f32 1.0, %v6077_v14  ;;  %6098 = vrcp.f32 %v2822_v32 }
 0x61f   :  { %v6081_v6 = vpop.eup %6080  ;;  %v2825_v4 = vadd.f32 1.0, %v6079_v38  ;;  %6100 = vrcp.f32 %v2823_v19 }
 0x620   :  { %v6083_v24 = vpop.eup %6082  ;;  %v2826_v7 = vadd.f32 1.0, %v6081_v6  ;;  %6102 = vrcp.f32 %v2824_v48 }
 0x621   :  { %v6085_v58 = vpop.eup %6084  ;;  %v2827_v56 = vadd.f32 1.0, %v6083_v24  ;;  %6104 = vrcp.f32 %v2825_v4 }
 0x622   :  { %v6087_v15 = vpop.eup %6086  ;;  %v2828_v47 = vadd.f32 1.0, %v6085_v58  ;;  %6106 = vrcp.f32 %v2826_v7 }
 0x623   :  { %v6089_v10 = vpop.eup %6088  ;;  %6108 = vrcp.f32 %v2827_v56 }
 0x624   :  { %v6091_v36 = vpop.eup %6090  ;;  %6110 = vrcp.f32 %v2828_v47 }
 0x625   :  { %v6093_v54 = vpop.eup %6092  ;;  %6112 = vtanh.f32 %v7798_v3 }
 0x626   :  { %v6095_v2 = vpop.eup %6094  ;;  %6114 = vtanh.f32 %v7800_v5 }
 0x627   :  { %v6097_v34 = vpop.eup %6096  ;;  %6116 = vtanh.f32 %v7802_v50 }
 0x628   :  { %v6099_v45 = vpop.eup %6098  ;;  %v2877_v33 = vmul.f32 %v6097_v34, %v6087_v15  ;;  %v8491_v34 = vld [vmem:[#allocation9_spill] sm:$0xff] }
 0x629   :  { %v6101_v62 = vpop.eup %6100  ;;  %v2878_v23 = vmul.f32 %v6099_v45, %v6089_v10  ;;  %v8492_v45 = vld [vmem:[#allocation10_spill] sm:$0xff] }
 0x62a   :  { %v6103_v42 = vpop.eup %6102  ;;  %v2879_v43 = vmul.f32 %v6101_v62, %v6091_v36  ;;  %2885 = vst [vmem:[%s8393_s4 + $0x4] sm:$0x1] %v2877_v33  ;;  %v8488_v36 = vld [vmem:[#allocation6_spill] sm:$0xff]  ;;  %v8494_v62 = vld [vmem:[#allocation12_spill] sm:$0xff] }
 0x62b   :  { %v6105_v20 = vpop.eup %6104  ;;  %v2880_v37 = vmul.f32 %v6103_v42, %v6093_v54  ;;  %2886 = vst [vmem:[%s8393_s4 + $0xc] sm:$0x1] %v2878_v23  ;;  %v2917_v30 = vcombine.low %v2877_v33, %v2878_v23  ;;  %v8489_v54 = vld [vmem:[#allocation7_spill] sm:$0xff]  ;;  %v8495_v23 = vld [vmem:[#allocation13_spill] sm:$0xff]  ;;  %v8496_v42 = vld [vmem:[#allocation14_spill] sm:$0xff] }
 0x62c   :  { %v6107_v8 = vpop.eup %6106  ;;  %v2881_v46 = vmul.f32 %v6105_v20, %v6095_v2  ;;  %2887 = vst [vmem:[%s8393_s4 + $0x14] sm:$0x1] %v2879_v43  ;;  %v8490_v2 = vld [vmem:[#allocation8_spill] sm:$0xff]  ;;  %v8493_v33 = vld [vmem:[#allocation11_spill] sm:$0xff] }
 0x62d   :  { %v6109_v32 = vpop.eup %6108  ;;  %2888 = vst [vmem:[%s8393_s4 + $0x1c] sm:$0x1] %v2880_v37  ;;  %v2918_v14 = vcombine.low %v2879_v43, %v2880_v37  ;;  %v2927_v38 = vrot.slane %v2917_v30, %v6868_v59  ;;  %v8497_v43 = vld [vmem:[#allocation15_spill] sm:$0xff]  ;;  %v8498_v20 = vld [vmem:[#allocation16_spill] sm:$0xff]  ;;  %v8500_v30 = vld [vmem:[#allocation5_spill] sm:$0xff] }
 0x62e   :  { %v6111_v19 = vpop.eup %6110  ;;  %2889 = vst [vmem:[%s8393_s4 + $0x24] sm:$0x1] %v2881_v46  ;;  %v8499_v37 = vld [vmem:[#allocation4_spill] sm:$0xff] }
 0x62f   :  { %v6113_v55 = vpop.eup %6112  ;;  %v2934_v48 = vrot.slane %v2918_v14, %v6868_v59 }
 0x630   :  { %v6115_v61 = vpop.eup %6114  ;;  %v2882_v6 = vmul.f32 %v6113_v55, %v6107_v8 }
 0x631   :  { %v6117_v4 = vpop.eup %6116  ;;  %v2883_v11 = vmul.f32 %v6115_v61, %v6109_v32  ;;  %v2949_v41 = vcombine.low %v2927_v38, %v2934_v48 }
 0x632   :  { %v2884_v24 = vmul.f32 %v6117_v4, %v6111_v19  ;;  %2890 = vst [vmem:[%s8393_s4 + $0x2c] sm:$0x1] %v2882_v6  ;;  %v2919_v7 = vcombine.low %v2881_v46, %v2882_v6 }
 0x633   :  { %2891 = vst [vmem:[%s8393_s4 + $0x34] sm:$0x1] %v2883_v11  ;;  %v2957_v15 = vrot.slane %v2949_v41, %v6868_v59 }
 0x634   :  { %2892 = vst [vmem:[%s8393_s4 + $0x3c] sm:$0x1] %v2884_v24  ;;  %v2920_v49 = vcombine.low %v2883_v11, %v2884_v24  ;;  %v2941_v58 = vrot.slane %v2919_v7, %v6868_v59 }
 0x636   :  { %v2948_v56 = vrot.slane %v2920_v49, %v6868_v59 }
 0x638   :  { %v2950_v60 = vcombine.low %v2941_v58, %v2948_v56  ;;  %v4867_v58 = vld [vmem:[%s8391_s0 + $0x5] ss:$8 sm:$0xf] }
 0x639   :  { %v4868_v56 = vld [vmem:[%s8391_s0 + $0x25] ss:$8 sm:$0xf] }
 0x63a   :  { %v2964_v47 = vrot.slane %v2950_v60, %v6868_v59  ;;  %v4869_v60 = vld [vmem:[%s8391_s0 + $0x45] ss:$8 sm:$0xf] }
 0x63c   :  { %v2965_v10 = vcombine.low %v2957_v15, %v2964_v47  ;;  %v4871_v15 = vld [vmem:[%s8391_s0 + $0x85] ss:$8 sm:$0xf] }
 0x63e   :  { %3032 = vmatmul.mubr.f32.vlgmr.msra.gmra.mrb[10].mxu0 %v2965_v10  ;;  %3103 = vmatmul.mubr.f32.vlgmr.msra.gmra.mrb[10].mxu1 %v2965_v10 }
 0x63f   :  { %5350 = vmatpush1.bf16.msra.mxu0 %v6563_v9  ;;  %5382 = vmatpush1.bf16.msra.mxu1 %v6575_v13 }
 0x640   :  { %5352 = vmatprep.subr.bf16.mxu0 %v6588_v17  ;;  %5384 = vmatprep.subr.bf16.mxu1 %v6590_v18 }
 0x641   :  { %3591 = vmatprep.mubr.f32.mxu0 %v8437_v28  ;;  %3662 = vmatprep.mubr.f32.mxu1 %v8437_v28 }
 0x643   :  { %5354 = vmatpush1.bf16.msra.mxu0 %v6602_v22  ;;  %5386 = vmatpush1.bf16.msra.mxu1 %v6615_v26 }
 0x644   :  { %5356 = vmatprep.subr.bf16.mxu0 %v6617_v27  ;;  %5388 = vmatprep.subr.bf16.mxu1 %v6628_v31 }
 0x647   :  { %5358 = vmatpush1.bf16.msra.mxu0 %v6640_v35  ;;  %5390 = vmatpush1.bf16.msra.mxu1 %v6653_v39 }
 0x648   :  { %5360 = vmatprep.subr.bf16.mxu0 %v6655_v40  ;;  %5392 = vmatprep.subr.bf16.mxu1 %v6667_v44 }
 0x64b   :  { %5362 = vmatpush1.bf16.msra.mxu0 %v6688_v51  ;;  %5394 = vmatpush1.bf16.msra.mxu1 %v6692_v52 }
 0x64c   :  { %5364 = vmatprep.subr.bf16.mxu0 %v6694_v53  ;;  %5396 = vmatprep.subr.bf16.mxu1 %v6706_v57 }
 0x64f   :  { %5366 = vmatpush1.bf16.msra.mxu0 %v6724_v63  ;;  %5398 = vmatpush1.bf16.msra.mxu1 %v6728_v0 }
 0x650   :  { %5368 = vmatprep.subr.bf16.mxu0 %v6730_v1  ;;  %5400 = vmatprep.subr.bf16.mxu1 %v8488_v36 }
 0x653   :  { %5370 = vmatpush1.bf16.msra.mxu0 %v8489_v54  ;;  %5402 = vmatpush1.bf16.msra.mxu1 %v8490_v2 }
 0x654   :  { %5372 = vmatprep.subr.bf16.mxu0 %v8491_v34  ;;  %5404 = vmatprep.subr.bf16.mxu1 %v8492_v45 }
 0x657   :  { %5374 = vmatpush1.bf16.msra.mxu0 %v8493_v33  ;;  %5406 = vmatpush1.bf16.msra.mxu1 %v8494_v62 }
 0x658   :  { %5376 = vmatprep.subr.bf16.mxu0 %v8495_v23  ;;  %5408 = vmatprep.subr.bf16.mxu1 %v8496_v42 }
 0x65b   :  { %5378 = vmatpush1.bf16.msra.mxu0 %v8497_v43  ;;  %5410 = vmatpush1.bf16.msra.mxu1 %v8498_v20 }
 0x65c   :  { %5412 = vmatprep.subr.bf16.mxu0 %v8499_v37  ;;  %5444 = vmatprep.subr.bf16.mxu1 %v8500_v30 }
 0x711   :  { %v3033_v8 = vpop.f32.mrb[10].mxu0  ;;  %v3104_v46 = vpop.f32.mrb[10].mxu1 }
 0x712   :  { %v3035_v32 = vpop.f32.mrb[11].mxu0  ;;  %v3106_v14 = vpop.f32.mrb[11].mxu1 }
 0x713   :  { %v3113_v19 = vcombine.low %v3033_v8, %v3035_v32  ;;  %v3114_v55 = vcombine.high %v3033_v8, %v3035_v32  ;;  %v3115_v38 = vcombine.low %v3104_v46, %v3106_v14  ;;  %v3116_v48 = vcombine.high %v3104_v46, %v3106_v14  ;;  %v4870_v8 = vld [vmem:[%s8391_s0 + $0x65] ss:$8 sm:$0xf] }
 0x714   :  { %v4872_v46 = vld [vmem:[%s8391_s0 + $0xa5] ss:$8 sm:$0xf] }
 0x715   :  { %v3123_v61 = vrot.slane %v3113_v19, %v6868_v59  ;;  %v3130_v6 = vrot.slane %v3114_v55, %v6868_v59  ;;  %v3137_v4 = vrot.slane %v3115_v38, %v6868_v59  ;;  %v3144_v11 = vrot.slane %v3116_v48, %v6868_v59  ;;  %v4873_v32 = vld [vmem:[%s8391_s0 + $0xc5] ss:$8 sm:$0xf] }
 0x716   :  { %v4874_v48 = vld [vmem:[%s8391_s0 + $0xe5] ss:$8 sm:$0xf] }
 0x717   :  { %v3145_v41 = vcombine.low %v3123_v61, %v3137_v4  ;;  %v3146_v24 = vcombine.high %v3123_v61, %v3137_v4  ;;  %v3147_v7 = vcombine.low %v3130_v6, %v3144_v11  ;;  %v3148_v49 = vcombine.high %v3130_v6, %v3144_v11 }
 0x719   :  { %v3155_v47 = vrot.slane %v3145_v41, %v6868_v59  ;;  %v3162_v10 = vrot.slane %v3147_v7, %v6868_v59  ;;  %v3169_v37 = vrot.slane %v3146_v24, %v6868_v59  ;;  %v3176_v30 = vrot.slane %v3148_v49, %v6868_v59 }
 0x71b   :  { %v3177_v14 = vcombine.high %v3155_v47, %v3155_v47  ;;  %v3178_v19 = vcombine.high %v3162_v10, %v3162_v10  ;;  %v3179_v55 = vcombine.high %v3169_v37, %v3169_v37  ;;  %v3180_v38 = vcombine.high %v3176_v30, %v3176_v30 }
 0x71c   :  { %v7903_v61 = vadd.f32 %v4867_v58, %v3155_v47  ;;  %v7905_v6 = vadd.f32 %v4868_v56, %v3169_v37  ;;  %v7907_v4 = vadd.f32 %v4871_v15, %v3162_v10  ;;  %v7913_v24 = vadd.f32 %v4872_v46, %v3176_v30 }
 0x71d   :  { %v7909_v11 = vadd.f32 %v4869_v60, %v3177_v14  ;;  %v7911_v41 = vadd.f32 %v4870_v8, %v3179_v55  ;;  %v7915_v7 = vadd.f32 %v4873_v32, %v3178_v19  ;;  %v7919_v43 = vadd.f32 %v4874_v48, %v3180_v38 }
 0x71e   :  { %v4875_v49 = vmul.f32 -1.442695, %v7903_v61  ;;  %v4876_v20 = vmul.f32 -1.442695, %v7905_v6  ;;  %v4879_v60 = vmul.f32 -1.442695, %v7907_v4 }
 0x71f   :  { %v4877_v58 = vmul.f32 -1.442695, %v7909_v11  ;;  %v4878_v56 = vmul.f32 -1.442695, %v7911_v41  ;;  %v3253_v15 = vrot.slane %v7903_v61, 1  ;;  %v3254_v10 = vrot.slane %v7905_v6, 1 }
 0x720   :  { %6118 = vpow2.f32 %v4875_v49  ;;  %v4880_v47 = vmul.f32 -1.442695, %v7913_v24  ;;  %v4881_v37 = vmul.f32 -1.442695, %v7915_v7  ;;  %v3255_v30 = vrot.slane %v7909_v11, 1 }
 0x721   :  { %6120 = vpow2.f32 %v4876_v20  ;;  %v4882_v8 = vmul.f32 -1.442695, %v7919_v43  ;;  %v3256_v46 = vrot.slane %v7911_v41, 1  ;;  %v3257_v32 = vrot.slane %v7907_v4, 1 }
 0x722   :  { %6122 = vpow2.f32 %v4877_v58  ;;  %v4883_v14 = vmul.f32 -1.442695, %v3253_v15  ;;  %v4884_v20 = vmul.f32 -1.442695, %v3254_v10  ;;  %v4885_v19 = vmul.f32 -1.442695, %v3255_v30 }
 0x723   :  { %6124 = vpow2.f32 %v4878_v56  ;;  %v4886_v55 = vmul.f32 -1.442695, %v3256_v46  ;;  %v4887_v38 = vmul.f32 -1.442695, %v3257_v32  ;;  %v3258_v15 = vrot.slane %v7913_v24, 1 }
 0x724   :  { %6126 = vpow2.f32 %v4879_v60  ;;  %v3260_v46 = vrot.slane %v7919_v43, 1  ;;  %v3348_v54 = vrot.slane %v7919_v43, 3 }
 0x725   :  { %6128 = vpow2.f32 %v4880_v47 }
 0x726   :  { %6130 = vpow2.f32 %v4881_v37  ;;  %v3259_v37 = vrot.slane %v7915_v7, 1 }
 0x727   :  { %6132 = vpow2.f32 %v4882_v8 }
 0x728   :  { %6134 = vpow2.f32 %v4883_v14 }
 0x729   :  { %6136 = vpow2.f32 %v4884_v20 }
 0x72a   :  { %v6119_v48 = vpop.eup %6118  ;;  %6138 = vpow2.f32 %v4885_v19 }
 0x72b   :  { %v6121_v49 = vpop.eup %6120  ;;  %v3221_v58 = vadd.f32 1.0, %v6119_v48  ;;  %6140 = vpow2.f32 %v4886_v55  ;;  %v4888_v55 = vmul.f32 -1.442695, %v3258_v15 }
 0x72c   :  { %v6123_v56 = vpop.eup %6122  ;;  %v3222_v42 = vadd.f32 1.0, %v6121_v49  ;;  %6142 = vpow2.f32 %v4887_v38  ;;  %v4889_v49 = vmul.f32 -1.442695, %v3259_v37 }
 0x72d   :  { %v6125_v60 = vpop.eup %6124  ;;  %v3223_v23 = vadd.f32 1.0, %v6123_v56  ;;  %6144 = vrcp.f32 %v3221_v58 }
 0x72e   :  { %v6127_v47 = vpop.eup %6126  ;;  %v3224_v10 = vadd.f32 1.0, %v6125_v60  ;;  %6146 = vrcp.f32 %v3222_v42  ;;  %v4890_v42 = vmul.f32 -1.442695, %v3260_v46  ;;  %v3317_v46 = vrot.slane %v7903_v61, 2 }
 0x72f   :  { %v6129_v30 = vpop.eup %6128  ;;  %v3225_v8 = vadd.f32 1.0, %v6127_v47  ;;  %6148 = vrcp.f32 %v3223_v23 }
 0x730   :  { %v6131_v32 = vpop.eup %6130  ;;  %v3226_v14 = vadd.f32 1.0, %v6129_v30  ;;  %6150 = vrcp.f32 %v3224_v10 }
 0x731   :  { %v6133_v20 = vpop.eup %6132  ;;  %v3227_v19 = vadd.f32 1.0, %v6131_v32  ;;  %6152 = vrcp.f32 %v3225_v8 }
 0x732   :  { %v6135_v38 = vpop.eup %6134  ;;  %v3228_v48 = vadd.f32 1.0, %v6133_v20  ;;  %6154 = vrcp.f32 %v3226_v14  ;;  %v3318_v20 = vrot.slane %v7905_v6, 2 }
 0x733   :  { %v6137_v58 = vpop.eup %6136  ;;  %6156 = vrcp.f32 %v3227_v19  ;;  %v3293_v60 = vadd.f32 1.0, %v6135_v38 }
 0x734   :  { %v6139_v56 = vpop.eup %6138  ;;  %6158 = vrcp.f32 %v3228_v48  ;;  %v3294_v47 = vadd.f32 1.0, %v6137_v58 }
 0x735   :  { %v6141_v23 = vpop.eup %6140  ;;  %6160 = vpow2.f32 %v4888_v55  ;;  %v3295_v10 = vadd.f32 1.0, %v6139_v56  ;;  %v3319_v55 = vrot.slane %v7909_v11, 2 }
 0x736   :  { %v6143_v62 = vpop.eup %6142  ;;  %6162 = vpow2.f32 %v4889_v49  ;;  %v3296_v15 = vadd.f32 1.0, %v6141_v23  ;;  %v3321_v49 = vrot.slane %v7907_v4, 2  ;;  %v3341_v23 = vrot.slane %v7903_v61, 3 }
 0x737   :  { %v7935_v30 = vpop.eup %6144  ;;  %6164 = vpow2.f32 %v4890_v42  ;;  %v3297_v32 = vadd.f32 1.0, %v6143_v62  ;;  %v3320_v62 = vrot.slane %v7911_v41, 2  ;;  %v3344_v61 = vrot.slane %v7911_v41, 3 }
 0x738   :  { %v7937_v8 = vpop.eup %6146  ;;  %6166 = vrcp.f32 %v3293_v60 }
 0x739   :  { %v7939_v37 = vpop.eup %6148  ;;  %6168 = vrcp.f32 %v3294_v47  ;;  %v4894_v41 = vmul.f32 -1.442695, %v3344_v61 }
 0x73a   :  { %v7942_v14 = vpop.eup %6150  ;;  %6170 = vrcp.f32 %v3295_v10 }
 0x73b   :  { %v7945_v19 = vpop.eup %6152  ;;  %6172 = vrcp.f32 %v3296_v15  ;;  %v3322_v15 = vrot.slane %v7913_v24, 2 }
 0x73c   :  { %v7948_v38 = vpop.eup %6154  ;;  %6174 = vrcp.f32 %v3297_v32  ;;  %v3342_v32 = vrot.slane %v7905_v6, 3  ;;  %v3346_v6 = vrot.slane %v7913_v24, 3 }
 0x73d   :  { %v7951_v48 = vpop.eup %6156  ;;  %6176 = vtanh.f32 %v3317_v46  ;;  %v3323_v46 = vrot.slane %v7915_v7, 2 }
 0x73e   :  { %v7954_v58 = vpop.eup %6158  ;;  %6178 = vtanh.f32 %v3318_v20  ;;  %v3343_v20 = vrot.slane %v7909_v11, 3  ;;  %v3347_v11 = vrot.slane %v7915_v7, 3 }
 0x73f   :  { %v6161_v42 = vpop.eup %6160  ;;  %6180 = vtanh.f32 %v3319_v55 }
 0x740   :  { %v6163_v56 = vpop.eup %6162  ;;  %v3298_v60 = vadd.f32 1.0, %v6161_v42  ;;  %6182 = vtanh.f32 %v3320_v62  ;;  %v3324_v62 = vrot.slane %v7919_v43, 2  ;;  %v4893_v2 = vmul.f32 -1.442695, %v3343_v20 }
 0x741   :  { %v6165_v47 = vpop.eup %6164  ;;  %v3299_v10 = vadd.f32 1.0, %v6163_v56  ;;  %6184 = vtanh.f32 %v3321_v49  ;;  %v3345_v56 = vrot.slane %v7907_v4, 3  ;;  %v4891_v49 = vmul.f32 -1.442695, %v3341_v23 }
 0x742   :  { %v6167_v33 = vpop.eup %6166  ;;  %v3300_v45 = vadd.f32 1.0, %v6165_v47  ;;  %6186 = vrcp.f32 %v3298_v60  ;;  %v4892_v60 = vmul.f32 -1.442695, %v3342_v32  ;;  %v4898_v43 = vmul.f32 -1.442695, %v3348_v54 }
 0x743   :  { %v6169_v55 = vpop.eup %6168  ;;  %6188 = vrcp.f32 %v3299_v10  ;;  %v3405_v4 = vmul.f32 %v6167_v33, %v7775_v12 }
 0x744   :  { %v6171_v42 = vpop.eup %6170  ;;  %6190 = vrcp.f32 %v3300_v45  ;;  %v4895_v45 = vmul.f32 -1.442695, %v3345_v56  ;;  %v3406_v24 = vmul.f32 %v6169_v55, %v7778_v21 }
 0x745   :  { %v6173_v34 = vpop.eup %6172  ;;  %6192 = vtanh.f32 %v3322_v15  ;;  %v4896_v15 = vmul.f32 -1.442695, %v3346_v6  ;;  %v3407_v20 = vmul.f32 %v6171_v42, %v7781_v16 }
 0x746   :  { %v6175_v47 = vpop.eup %6174  ;;  %6194 = vtanh.f32 %v3323_v46  ;;  %v4897_v46 = vmul.f32 -1.442695, %v3347_v11  ;;  %v3408_v56 = vmul.f32 %v6173_v34, %v7783_v25 }
 0x747   :  { %v6177_v10 = vpop.eup %6176  ;;  %6196 = vtanh.f32 %v3324_v62  ;;  %v3409_v21 = vmul.f32 %v6175_v47, %v7785_v29 }
 0x748   :  { %v6179_v36 = vpop.eup %6178  ;;  %6198 = vpow2.f32 %v4891_v49  ;;  %v3413_v7 = vmul.f32 %v6177_v10, %v7935_v30 }
 0x749   :  { %v6181_v23 = vpop.eup %6180  ;;  %6200 = vpow2.f32 %v4892_v60  ;;  %v3414_v61 = vmul.f32 %v6179_v36, %v7937_v8 }
 0x74a   :  { %v6183_v32 = vpop.eup %6182  ;;  %6202 = vpow2.f32 %v4893_v2  ;;  %v3415_v33 = vmul.f32 %v6181_v23, %v7939_v37  ;;  %v7975_v55 = vadd.f32 %v3413_v7, %v3405_v4 }
 0x74b   :  { %v6185_v62 = vpop.eup %6184  ;;  %6204 = vpow2.f32 %v4894_v41  ;;  %v3416_v30 = vmul.f32 %v6183_v32, %v7942_v14  ;;  %v7978_v16 = vadd.f32 %v3414_v61, %v3406_v24 }
 0x74c   :  { %v6187_v12 = vpop.eup %6186  ;;  %6206 = vpow2.f32 %v4895_v45  ;;  %v3417_v36 = vmul.f32 %v6185_v62, %v7945_v19  ;;  %v7981_v54 = vadd.f32 %v3415_v33, %v3407_v20 }
 0x74d   :  { %v6189_v2 = vpop.eup %6188  ;;  %6208 = vpow2.f32 %v4896_v15  ;;  %v7983_v34 = vadd.f32 %v3416_v30, %v3408_v56  ;;  %v3410_v10 = vmul.f32 %v6187_v12, %v7798_v3 }
 0x74e   :  { %v6191_v42 = vpop.eup %6190  ;;  %6210 = vpow2.f32 %v4897_v46  ;;  %v7985_v29 = vadd.f32 %v3417_v36, %v3409_v21  ;;  %v3411_v4 = vmul.f32 %v6189_v2, %v7800_v5 }
 0x74f   :  { %v6193_v25 = vpop.eup %6192  ;;  %6212 = vpow2.f32 %v4898_v43  ;;  %v3412_v32 = vmul.f32 %v6191_v42, %v7802_v50 }
 0x750   :  { %v6195_v8 = vpop.eup %6194  ;;  %6214 = vtanh.f32 %v7975_v55  ;;  %v3418_v24 = vmul.f32 %v6193_v25, %v7948_v38 }
 0x751   :  { %v6197_v37 = vpop.eup %6196  ;;  %6216 = vtanh.f32 %v7978_v16  ;;  %v3419_v20 = vmul.f32 %v6195_v8, %v7951_v48 }
 0x752   :  { %v6199_v14 = vpop.eup %6198  ;;  %6218 = vtanh.f32 %v7981_v54  ;;  %v3420_v3 = vmul.f32 %v6197_v37, %v7954_v58  ;;  %v7998_v61 = vadd.f32 %v3418_v24, %v3410_v10 }
 0x753   :  { %v6201_v49 = vpop.eup %6200  ;;  %v3381_v6 = vadd.f32 1.0, %v6199_v14  ;;  %6220 = vtanh.f32 %v7983_v34  ;;  %v8000_v12 = vadd.f32 %v3419_v20, %v3411_v4 }
 0x754   :  { %v6203_v19 = vpop.eup %6202  ;;  %v3382_v60 = vadd.f32 1.0, %v6201_v49  ;;  %6222 = vtanh.f32 %v7985_v29  ;;  %v8002_v50 = vadd.f32 %v3420_v3, %v3412_v32 }
 0x755   :  { %v6205_v47 = vpop.eup %6204  ;;  %v3383_v11 = vadd.f32 1.0, %v6203_v19  ;;  %6224 = vrcp.f32 %v3381_v6 }
 0x756   :  { %v6207_v41 = vpop.eup %6206  ;;  %v3384_v45 = vadd.f32 1.0, %v6205_v47  ;;  %6226 = vrcp.f32 %v3382_v60 }
 0x757   :  { %v6209_v23 = vpop.eup %6208  ;;  %v3385_v15 = vadd.f32 1.0, %v6207_v41  ;;  %6228 = vrcp.f32 %v3383_v11 }
 0x758   :  { %v6211_v46 = vpop.eup %6210  ;;  %v3386_v7 = vadd.f32 1.0, %v6209_v23  ;;  %6230 = vrcp.f32 %v3384_v45 }
 0x759   :  { %v6213_v62 = vpop.eup %6212  ;;  %v3387_v43 = vadd.f32 1.0, %v6211_v46  ;;  %6232 = vrcp.f32 %v3385_v15 }
 0x75a   :  { %v6215_v5 = vpop.eup %6214  ;;  %v3388_v56 = vadd.f32 1.0, %v6213_v62  ;;  %6234 = vrcp.f32 %v3386_v7 }
 0x75b   :  { %v6217_v38 = vpop.eup %6216  ;;  %6236 = vrcp.f32 %v3387_v43 }
 0x75c   :  { %v6219_v33 = vpop.eup %6218  ;;  %6238 = vrcp.f32 %v3388_v56 }
 0x75d   :  { %v6221_v21 = vpop.eup %6220  ;;  %6240 = vtanh.f32 %v7998_v61 }
 0x75e   :  { %v6223_v48 = vpop.eup %6222  ;;  %6242 = vtanh.f32 %v8000_v12 }
 0x75f   :  { %v6225_v58 = vpop.eup %6224  ;;  %6244 = vtanh.f32 %v8002_v50 }
 0x760   :  { %v6227_v2 = vpop.eup %6226  ;;  %v3437_v30 = vmul.f32 %v6225_v58, %v6215_v5 }
 0x761   :  { %v6229_v42 = vpop.eup %6228  ;;  %v3438_v36 = vmul.f32 %v6227_v2, %v6217_v38 }
 0x762   :  { %v6231_v25 = vpop.eup %6230  ;;  %v3439_v8 = vmul.f32 %v6229_v42, %v6219_v33  ;;  %3445 = vst [vmem:[%s8393_s4 + $0x5] sm:$0x1] %v3437_v30 }
 0x763   :  { %v6233_v37 = vpop.eup %6232  ;;  %v3440_v14 = vmul.f32 %v6231_v25, %v6221_v21  ;;  %3446 = vst [vmem:[%s8393_s4 + $0xd] sm:$0x1] %v3438_v36  ;;  %v3477_v49 = vcombine.low %v3437_v30, %v3438_v36  ;;  %v4899_v36 = vld [vmem:[%s8391_s0 + $0x6] ss:$8 sm:$0xf] }
 0x764   :  { %v6235_v6 = vpop.eup %6234  ;;  %v3441_v19 = vmul.f32 %v6233_v37, %v6223_v48  ;;  %3447 = vst [vmem:[%s8393_s4 + $0x15] sm:$0x1] %v3439_v8  ;;  %v4900_v25 = vld [vmem:[%s8391_s0 + $0x26] ss:$8 sm:$0xf] }
 0x765   :  { %v6237_v60 = vpop.eup %6236  ;;  %3448 = vst [vmem:[%s8393_s4 + $0x1d] sm:$0x1] %v3440_v14  ;;  %v3478_v47 = vcombine.low %v3439_v8, %v3440_v14  ;;  %v3487_v41 = vrot.slane %v3477_v49, %v6868_v59  ;;  %v4901_v8 = vld [vmem:[%s8391_s0 + $0x46] ss:$8 sm:$0xf] }
 0x766   :  { %v6239_v11 = vpop.eup %6238  ;;  %3449 = vst [vmem:[%s8393_s4 + $0x25] sm:$0x1] %v3441_v19  ;;  %v4903_v37 = vld [vmem:[%s8391_s0 + $0x86] ss:$8 sm:$0xf] }
 0x767   :  { %v6241_v10 = vpop.eup %6240  ;;  %v3494_v45 = vrot.slane %v3478_v47, %v6868_v59  ;;  %v4904_v47 = vld [vmem:[%s8391_s0 + $0xa6] ss:$8 sm:$0xf] }
 0x768   :  { %v6243_v4 = vpop.eup %6242  ;;  %v3442_v23 = vmul.f32 %v6241_v10, %v6235_v6 }
 0x769   :  { %v6245_v15 = vpop.eup %6244  ;;  %v3443_v24 = vmul.f32 %v6243_v4, %v6237_v60  ;;  %v3509_v32 = vcombine.low %v3487_v41, %v3494_v45  ;;  %v4902_v60 = vld [vmem:[%s8391_s0 + $0x66] ss:$8 sm:$0xf] }
 0x76a   :  { %v3444_v46 = vmul.f32 %v6245_v15, %v6239_v11  ;;  %3450 = vst [vmem:[%s8393_s4 + $0x2d] sm:$0x1] %v3442_v23  ;;  %v3479_v7 = vcombine.low %v3441_v19, %v3442_v23  ;;  %v4905_v11 = vld [vmem:[%s8391_s0 + $0xc6] ss:$8 sm:$0xf] }
 0x76b   :  { %3451 = vst [vmem:[%s8393_s4 + $0x35] sm:$0x1] %v3443_v24  ;;  %v3517_v5 = vrot.slane %v3509_v32, %v6868_v59  ;;  %v4906_v23 = vld [vmem:[%s8391_s0 + $0xe6] ss:$8 sm:$0xf] }
 0x76c   :  { %3452 = vst [vmem:[%s8393_s4 + $0x3d] sm:$0x1] %v3444_v46  ;;  %v3480_v20 = vcombine.low %v3443_v24, %v3444_v46  ;;  %v3501_v62 = vrot.slane %v3479_v7, %v6868_v59 }
 0x76e   :  { %v3508_v43 = vrot.slane %v3480_v20, %v6868_v59 }
 0x770   :  { %v3510_v3 = vcombine.low %v3501_v62, %v3508_v43 }
 0x772   :  { %v3524_v56 = vrot.slane %v3510_v3, %v6868_v59 }
 0x774   :  { %v3525_v38 = vcombine.low %v3517_v5, %v3524_v56 }
 0x776   :  { %3592 = vmatmul.mubr.f32.vlgmr.msra.gmra.mrb[12].mxu0 %v3525_v38  ;;  %3663 = vmatmul.mubr.f32.vlgmr.msra.gmra.mrb[12].mxu1 %v3525_v38 }
 0x777   :  { %5414 = vmatpush1.bf16.msra.mxu0 %v6563_v9  ;;  %5446 = vmatpush1.bf16.msra.mxu1 %v6575_v13  ;;  %v8501_v9 = vld [vmem:[#allocation6_spill] sm:$0xff]  ;;  %v8502_v13 = vld [vmem:[#allocation7_spill] sm:$0xff] }
 0x778   :  { %5416 = vmatprep.subr.bf16.mxu0 %v6588_v17  ;;  %5448 = vmatprep.subr.bf16.mxu1 %v6590_v18  ;;  %v8503_v17 = vld [vmem:[#allocation8_spill] sm:$0xff]  ;;  %v8504_v18 = vld [vmem:[#allocation9_spill] sm:$0xff] }
 0x779   :  { %4151 = vmatprep.mubr.f32.mxu0 %v8437_v28  ;;  %4222 = vmatprep.mubr.f32.mxu1 %v8437_v28 }
 0x77b   :  { %5418 = vmatpush1.bf16.msra.mxu0 %v6602_v22  ;;  %5450 = vmatpush1.bf16.msra.mxu1 %v6615_v26  ;;  %v8505_v22 = vld [vmem:[#allocation10_spill] sm:$0xff]  ;;  %v8506_v26 = vld [vmem:[#allocation11_spill] sm:$0xff] }
 0x77c   :  { %5420 = vmatprep.subr.bf16.mxu0 %v6617_v27  ;;  %5452 = vmatprep.subr.bf16.mxu1 %v6628_v31  ;;  %v8507_v27 = vld [vmem:[#allocation12_spill] sm:$0xff]  ;;  %v8508_v31 = vld [vmem:[#allocation13_spill] sm:$0xff] }
 0x77f   :  { %5422 = vmatpush1.bf16.msra.mxu0 %v6640_v35  ;;  %5454 = vmatpush1.bf16.msra.mxu1 %v6653_v39  ;;  %v8509_v35 = vld [vmem:[#allocation14_spill] sm:$0xff]  ;;  %v8510_v39 = vld [vmem:[#allocation15_spill] sm:$0xff] }
 0x780   :  { %5424 = vmatprep.subr.bf16.mxu0 %v6655_v40  ;;  %5456 = vmatprep.subr.bf16.mxu1 %v6667_v44  ;;  %v8511_v40 = vld [vmem:[#allocation16_spill] sm:$0xff] }
 0x783   :  { %5426 = vmatpush1.bf16.msra.mxu0 %v6688_v51  ;;  %5458 = vmatpush1.bf16.msra.mxu1 %v6692_v52 }
 0x784   :  { %5428 = vmatprep.subr.bf16.mxu0 %v6694_v53  ;;  %5460 = vmatprep.subr.bf16.mxu1 %v6706_v57 }
 0x787   :  { %5430 = vmatpush1.bf16.msra.mxu0 %v6724_v63  ;;  %5462 = vmatpush1.bf16.msra.mxu1 %v6728_v0 }
 0x788   :  { %5432 = vmatprep.subr.bf16.mxu0 %v6730_v1  ;;  %5464 = vmatprep.subr.bf16.mxu1 %v8501_v9 }
 0x78b   :  { %5434 = vmatpush1.bf16.msra.mxu0 %v8502_v13  ;;  %5466 = vmatpush1.bf16.msra.mxu1 %v8503_v17 }
 0x78c   :  { %5436 = vmatprep.subr.bf16.mxu0 %v8504_v18  ;;  %5468 = vmatprep.subr.bf16.mxu1 %v8505_v22 }
 0x78f   :  { %5438 = vmatpush1.bf16.msra.mxu0 %v8506_v26  ;;  %5470 = vmatpush1.bf16.msra.mxu1 %v8507_v27 }
 0x790   :  { %5440 = vmatprep.subr.bf16.mxu0 %v8508_v31  ;;  %5472 = vmatprep.subr.bf16.mxu1 %v8509_v35 }
 0x793   :  { %5442 = vmatpush1.bf16.msra.mxu0 %v8510_v39  ;;  %5474 = vmatpush1.bf16.msra.mxu1 %v8511_v40 }
 0x849   :  { %v3593_v44 = vpop.f32.mrb[12].mxu0  ;;  %v3664_v51 = vpop.f32.mrb[12].mxu1 }
 0x84a   :  { %v3595_v52 = vpop.f32.mrb[13].mxu0  ;;  %v3666_v53 = vpop.f32.mrb[13].mxu1 }
 0x84b   :  { %v3673_v57 = vcombine.low %v3593_v44, %v3595_v52  ;;  %v3674_v63 = vcombine.high %v3593_v44, %v3595_v52  ;;  %v3675_v0 = vcombine.low %v3664_v51, %v3666_v53  ;;  %v3676_v1 = vcombine.high %v3664_v51, %v3666_v53 }
 0x84d   :  { %v3683_v28 = vrot.slane %v3673_v57, %v6868_v59  ;;  %v3690_v33 = vrot.slane %v3674_v63, %v6868_v59  ;;  %v3697_v21 = vrot.slane %v3675_v0, %v6868_v59  ;;  %v3704_v48 = vrot.slane %v3676_v1, %v6868_v59 }
 0x84f   :  { %v3705_v58 = vcombine.low %v3683_v28, %v3697_v21  ;;  %v3706_v2 = vcombine.high %v3683_v28, %v3697_v21  ;;  %v3707_v30 = vcombine.low %v3690_v33, %v3704_v48  ;;  %v3708_v42 = vcombine.high %v3690_v33, %v3704_v48 }
 0x851   :  { %v3715_v14 = vrot.slane %v3705_v58, %v6868_v59  ;;  %v3722_v49 = vrot.slane %v3707_v30, %v6868_v59  ;;  %v3729_v6 = vrot.slane %v3706_v2, %v6868_v59  ;;  %v3736_v19 = vrot.slane %v3708_v42, %v6868_v59 }
 0x853   :  { %v3737_v10 = vcombine.high %v3715_v14, %v3715_v14  ;;  %v3738_v41 = vcombine.high %v3722_v49, %v3722_v49  ;;  %v3739_v45 = vcombine.high %v3729_v6, %v3729_v6  ;;  %v3740_v4 = vcombine.high %v3736_v19, %v3736_v19 }
 0x854   :  { %v8101_v15 = vadd.f32 %v4899_v36, %v3715_v14  ;;  %v8103_v24 = vadd.f32 %v4900_v25, %v3729_v6  ;;  %v8105_v32 = vadd.f32 %v4903_v37, %v3722_v49  ;;  %v8111_v20 = vadd.f32 %v4904_v47, %v3736_v19 }
 0x855   :  { %v8107_v46 = vadd.f32 %v4901_v8, %v3737_v10  ;;  %v8109_v7 = vadd.f32 %v4902_v60, %v3739_v45  ;;  %v8113_v62 = vadd.f32 %v4905_v11, %v3738_v41  ;;  %v8117_v5 = vadd.f32 %v4906_v23, %v3740_v4 }
 0x856   :  { %v4907_v43 = vmul.f32 -1.442695, %v8101_v15  ;;  %v4908_v3 = vmul.f32 -1.442695, %v8103_v24  ;;  %v4911_v9 = vmul.f32 -1.442695, %v8105_v32 }
 0x857   :  { %v4909_v56 = vmul.f32 -1.442695, %v8107_v46  ;;  %v4910_v38 = vmul.f32 -1.442695, %v8109_v7  ;;  %v3813_v13 = vrot.slane %v8101_v15, 1  ;;  %v3814_v18 = vrot.slane %v8103_v24, 1 }
 0x858   :  { %6246 = vpow2.f32 %v4907_v43  ;;  %v4912_v17 = vmul.f32 -1.442695, %v8111_v20  ;;  %v4913_v22 = vmul.f32 -1.442695, %v8113_v62  ;;  %v3815_v26 = vrot.slane %v8107_v46, 1 }
 0x859   :  { %6248 = vpow2.f32 %v4908_v3  ;;  %v4914_v27 = vmul.f32 -1.442695, %v8117_v5  ;;  %v3816_v31 = vrot.slane %v8109_v7, 1  ;;  %v3817_v35 = vrot.slane %v8105_v32, 1 }
 0x85a   :  { %6250 = vpow2.f32 %v4909_v56  ;;  %v4915_v39 = vmul.f32 -1.442695, %v3813_v13  ;;  %v4916_v40 = vmul.f32 -1.442695, %v3814_v18  ;;  %v4917_v44 = vmul.f32 -1.442695, %v3815_v26 }
 0x85b   :  { %6252 = vpow2.f32 %v4910_v38  ;;  %v4918_v51 = vmul.f32 -1.442695, %v3816_v31  ;;  %v4919_v52 = vmul.f32 -1.442695, %v3817_v35  ;;  %v3818_v21 = vrot.slane %v8111_v20, 1 }
 0x85c   :  { %6254 = vpow2.f32 %v4911_v9  ;;  %v3819_v2 = vrot.slane %v8113_v62, 1  ;;  %v3820_v36 = vrot.slane %v8117_v5, 1  ;;  %v3880_v35 = vrot.slane %v8109_v7, 2 }
 0x85d   :  { %6256 = vpow2.f32 %v4912_v17  ;;  %v4920_v49 = vmul.f32 -1.442695, %v3818_v21  ;;  %v3877_v17 = vrot.slane %v8101_v15, 2 }
 0x85e   :  { %6258 = vpow2.f32 %v4913_v22  ;;  %v4921_v60 = vmul.f32 -1.442695, %v3819_v2  ;;  %v4922_v11 = vmul.f32 -1.442695, %v3820_v36  ;;  %v3878_v22 = vrot.slane %v8103_v24, 2 }
 0x85f   :  { %6260 = vpow2.f32 %v4914_v27  ;;  %v3879_v27 = vrot.slane %v8107_v46, 2  ;;  %v3905_v36 = vrot.slane %v8105_v32, 3 }
 0x860   :  { %6262 = vpow2.f32 %v4915_v39 }
 0x861   :  { %6264 = vpow2.f32 %v4916_v40  ;;  %v3881_v40 = vrot.slane %v8105_v32, 2 }
 0x862   :  { %v6247_v53 = vpop.eup %6246  ;;  %6266 = vpow2.f32 %v4917_v44 }
 0x863   :  { %v6249_v57 = vpop.eup %6248  ;;  %v3781_v63 = vadd.f32 1.0, %v6247_v53  ;;  %6268 = vpow2.f32 %v4918_v51 }
 0x864   :  { %v6251_v0 = vpop.eup %6250  ;;  %v3782_v1 = vadd.f32 1.0, %v6249_v57  ;;  %6270 = vpow2.f32 %v4919_v52  ;;  %v3901_v57 = vrot.slane %v8101_v15, 3  ;;  %v3904_v15 = vrot.slane %v8109_v7, 3 }
 0x865   :  { %v6253_v28 = vpop.eup %6252  ;;  %v3783_v33 = vadd.f32 1.0, %v6251_v0  ;;  %6272 = vrcp.f32 %v3781_v63 }
 0x866   :  { %v6255_v48 = vpop.eup %6254  ;;  %v3784_v58 = vadd.f32 1.0, %v6253_v28  ;;  %6274 = vrcp.f32 %v3782_v1  ;;  %v3882_v1 = vrot.slane %v8111_v20, 2  ;;  %v3902_v28 = vrot.slane %v8103_v24, 3 }
 0x867   :  { %v6257_v30 = vpop.eup %6256  ;;  %v3785_v42 = vadd.f32 1.0, %v6255_v48  ;;  %6276 = vrcp.f32 %v3783_v33  ;;  %v3883_v48 = vrot.slane %v8113_v62, 2  ;;  %v3906_v24 = vrot.slane %v8111_v20, 3 }
 0x868   :  { %v6259_v25 = vpop.eup %6258  ;;  %v3786_v8 = vadd.f32 1.0, %v6257_v30  ;;  %6278 = vrcp.f32 %v3784_v58  ;;  %v3903_v58 = vrot.slane %v8107_v46, 3  ;;  %v3884_v30 = vrot.slane %v8117_v5, 2 }
 0x869   :  { %v6261_v37 = vpop.eup %6260  ;;  %v3787_v14 = vadd.f32 1.0, %v6259_v25  ;;  %6280 = vrcp.f32 %v3785_v42  ;;  %v4923_v25 = vmul.f32 -1.442695, %v3901_v57  ;;  %v3907_v46 = vrot.slane %v8113_v62, 3 }
 0x86a   :  { %v6263_v6 = vpop.eup %6262  ;;  %v3788_v19 = vadd.f32 1.0, %v6261_v37  ;;  %6282 = vrcp.f32 %v3786_v8  ;;  %v4924_v37 = vmul.f32 -1.442695, %v3902_v28  ;;  %v4926_v7 = vmul.f32 -1.442695, %v3904_v15 }
 0x86b   :  { %v6265_v47 = vpop.eup %6264  ;;  %6284 = vrcp.f32 %v3787_v14  ;;  %v3853_v41 = vadd.f32 1.0, %v6263_v6 }
 0x86c   :  { %v6267_v10 = vpop.eup %6266  ;;  %6286 = vrcp.f32 %v3788_v19  ;;  %v3854_v4 = vadd.f32 1.0, %v6265_v47  ;;  %v3908_v19 = vrot.slane %v8117_v5, 3  ;;  %v4927_v47 = vmul.f32 -1.442695, %v3905_v36 }
 0x86d   :  { %v6269_v45 = vpop.eup %6268  ;;  %6288 = vpow2.f32 %v4920_v49  ;;  %v3855_v43 = vadd.f32 1.0, %v6267_v10  ;;  %v4925_v49 = vmul.f32 -1.442695, %v3903_v58  ;;  %v4928_v10 = vmul.f32 -1.442695, %v3906_v24 }
 0x86e   :  { %v6271_v23 = vpop.eup %6270  ;;  %6290 = vpow2.f32 %v4921_v60  ;;  %v3856_v56 = vadd.f32 1.0, %v6269_v45  ;;  %v4929_v45 = vmul.f32 -1.442695, %v3907_v46  ;;  %v4930_v5 = vmul.f32 -1.442695, %v3908_v19 }
 0x86f   :  { %v8133_v3 = vpop.eup %6272  ;;  %6292 = vpow2.f32 %v4922_v11  ;;  %v3857_v9 = vadd.f32 1.0, %v6271_v23 }
 0x870   :  { %v8135_v38 = vpop.eup %6274  ;;  %6294 = vrcp.f32 %v3853_v41 }
 0x871   :  { %v8137_v13 = vpop.eup %6276  ;;  %6296 = vrcp.f32 %v3854_v4 }
 0x872   :  { %v8140_v18 = vpop.eup %6278  ;;  %6298 = vrcp.f32 %v3855_v43 }
 0x873   :  { %v8143_v26 = vpop.eup %6280  ;;  %6300 = vrcp.f32 %v3856_v56 }
 0x874   :  { %v8146_v31 = vpop.eup %6282  ;;  %6302 = vrcp.f32 %v3857_v9 }
 0x875   :  { %v8149_v39 = vpop.eup %6284  ;;  %6304 = vtanh.f32 %v3877_v17 }
 0x876   :  { %v8152_v44 = vpop.eup %6286  ;;  %6306 = vtanh.f32 %v3878_v22 }
 0x877   :  { %v6289_v51 = vpop.eup %6288  ;;  %6308 = vtanh.f32 %v3879_v27 }
 0x878   :  { %v6291_v52 = vpop.eup %6290  ;;  %v3858_v53 = vadd.f32 1.0, %v6289_v51  ;;  %6310 = vtanh.f32 %v3880_v35 }
 0x879   :  { %v6293_v63 = vpop.eup %6292  ;;  %v3859_v0 = vadd.f32 1.0, %v6291_v52  ;;  %6312 = vtanh.f32 %v3881_v40 }
 0x87a   :  { %v6295_v33 = vpop.eup %6294  ;;  %v3860_v21 = vadd.f32 1.0, %v6293_v63  ;;  %6314 = vrcp.f32 %v3858_v53 }
 0x87b   :  { %v6297_v2 = vpop.eup %6296  ;;  %6316 = vrcp.f32 %v3859_v0  ;;  %v3965_v32 = vmul.f32 %v6295_v33, %v7975_v55 }
 0x87c   :  { %v6299_v42 = vpop.eup %6298  ;;  %6318 = vrcp.f32 %v3860_v21  ;;  %v3966_v20 = vmul.f32 %v6297_v2, %v7978_v16 }
 0x87d   :  { %v6301_v8 = vpop.eup %6300  ;;  %6320 = vtanh.f32 %v3882_v1  ;;  %v3967_v4 = vmul.f32 %v6299_v42, %v7981_v54 }
 0x87e   :  { %v6303_v14 = vpop.eup %6302  ;;  %6322 = vtanh.f32 %v3883_v48  ;;  %v3968_v56 = vmul.f32 %v6301_v8, %v7983_v34 }
 0x87f   :  { %v6305_v6 = vpop.eup %6304  ;;  %6324 = vtanh.f32 %v3884_v30  ;;  %v3969_v16 = vmul.f32 %v6303_v14, %v7985_v29 }
 0x880   :  { %v6307_v60 = vpop.eup %6306  ;;  %6326 = vpow2.f32 %v4923_v25  ;;  %v3973_v62 = vmul.f32 %v6305_v6, %v8133_v3 }
 0x881   :  { %v6309_v11 = vpop.eup %6308  ;;  %6328 = vpow2.f32 %v4924_v37  ;;  %v3974_v43 = vmul.f32 %v6307_v60, %v8135_v38 }
 0x882   :  { %v6311_v41 = vpop.eup %6310  ;;  %6330 = vpow2.f32 %v4925_v49  ;;  %v3975_v9 = vmul.f32 %v6309_v11, %v8137_v13  ;;  %v8173_v17 = vadd.f32 %v3973_v62, %v3965_v32 }
 0x883   :  { %v6313_v23 = vpop.eup %6312  ;;  %6332 = vpow2.f32 %v4926_v7  ;;  %v3976_v3 = vmul.f32 %v6311_v41, %v8140_v18  ;;  %v8176_v54 = vadd.f32 %v3974_v43, %v3966_v20 }
 0x884   :  { %v6315_v55 = vpop.eup %6314  ;;  %6334 = vpow2.f32 %v4927_v47  ;;  %v3977_v38 = vmul.f32 %v6313_v23, %v8143_v26  ;;  %v8179_v35 = vadd.f32 %v3975_v9, %v3967_v4 }
 0x885   :  { %v6317_v22 = vpop.eup %6316  ;;  %6336 = vpow2.f32 %v4928_v10  ;;  %v8181_v40 = vadd.f32 %v3976_v3, %v3968_v56  ;;  %v3970_v1 = vmul.f32 %v6315_v55, %v7998_v61 }
 0x886   :  { %v6319_v27 = vpop.eup %6318  ;;  %6338 = vpow2.f32 %v4929_v45  ;;  %v8183_v29 = vadd.f32 %v3977_v38, %v3969_v16  ;;  %v3971_v21 = vmul.f32 %v6317_v22, %v8000_v12 }
 0x887   :  { %v6321_v34 = vpop.eup %6320  ;;  %6340 = vpow2.f32 %v4930_v5  ;;  %v3972_v30 = vmul.f32 %v6319_v27, %v8002_v50 }
 0x888   :  { %v6323_v13 = vpop.eup %6322  ;;  %6342 = vtanh.f32 %v8173_v17  ;;  %v3978_v2 = vmul.f32 %v6321_v34, %v8146_v31 }
 0x889   :  { %v6325_v51 = vpop.eup %6324  ;;  %6344 = vtanh.f32 %v8176_v54  ;;  %v3979_v36 = vmul.f32 %v6323_v13, %v8149_v39 }
 0x88a   :  { %v6327_v18 = vpop.eup %6326  ;;  %6346 = vtanh.f32 %v8179_v35  ;;  %v3980_v61 = vmul.f32 %v6325_v51, %v8152_v44  ;;  %v8196_v24 = vadd.f32 %v3978_v2, %v3970_v1 }
 0x88b   :  { %v6329_v52 = vpop.eup %6328  ;;  %v3941_v53 = vadd.f32 1.0, %v6327_v18  ;;  %6348 = vtanh.f32 %v8181_v40  ;;  %v8198_v14 = vadd.f32 %v3979_v36, %v3971_v21 }
 0x88c   :  { %v6331_v26 = vpop.eup %6330  ;;  %v3942_v57 = vadd.f32 1.0, %v6329_v52  ;;  %6350 = vtanh.f32 %v8183_v29  ;;  %v8200_v50 = vadd.f32 %v3980_v61, %v3972_v30  ;;  %v4931_v61 = vld [vmem:[%s8391_s0 + $0x7] ss:$8 sm:$0xf] }
 0x88d   :  { %v6333_v63 = vpop.eup %6332  ;;  %v3943_v0 = vadd.f32 1.0, %v6331_v26  ;;  %6352 = vrcp.f32 %v3941_v53 }
 0x88e   :  { %v6335_v28 = vpop.eup %6334  ;;  %v3944_v33 = vadd.f32 1.0, %v6333_v63  ;;  %6354 = vrcp.f32 %v3942_v57 }
 0x88f   :  { %v6337_v48 = vpop.eup %6336  ;;  %v3945_v58 = vadd.f32 1.0, %v6335_v28  ;;  %6356 = vrcp.f32 %v3943_v0 }
 0x890   :  { %v6339_v15 = vpop.eup %6338  ;;  %v3946_v42 = vadd.f32 1.0, %v6337_v48  ;;  %6358 = vrcp.f32 %v3944_v33 }
 0x891   :  { %v6341_v25 = vpop.eup %6340  ;;  %v3947_v8 = vadd.f32 1.0, %v6339_v15  ;;  %6360 = vrcp.f32 %v3945_v58 }
 0x892   :  { %v6343_v12 = vpop.eup %6342  ;;  %v3948_v37 = vadd.f32 1.0, %v6341_v25  ;;  %6362 = vrcp.f32 %v3946_v42 }
 0x893   :  { %v6345_v31 = vpop.eup %6344  ;;  %6364 = vrcp.f32 %v3947_v8 }
 0x894   :  { %v6347_v46 = vpop.eup %6346  ;;  %6366 = vrcp.f32 %v3948_v37  ;;  %v4933_v37 = vld [vmem:[%s8391_s0 + $0x47] ss:$8 sm:$0xf] }
 0x895   :  { %v6349_v49 = vpop.eup %6348  ;;  %6368 = vtanh.f32 %v8196_v24 }
 0x896   :  { %v6351_v39 = vpop.eup %6350  ;;  %6370 = vtanh.f32 %v8198_v14 }
 0x897   :  { %v6353_v44 = vpop.eup %6352  ;;  %6372 = vtanh.f32 %v8200_v50 }
 0x898   :  { %v6355_v6 = vpop.eup %6354  ;;  %v3997_v19 = vmul.f32 %v6353_v44, %v6343_v12  ;;  %v4932_v12 = vld [vmem:[%s8391_s0 + $0x27] ss:$8 sm:$0xf] }
 0x899   :  { %v6357_v7 = vpop.eup %6356  ;;  %v3998_v60 = vmul.f32 %v6355_v6, %v6345_v31  ;;  %v4935_v31 = vld [vmem:[%s8391_s0 + $0x87] ss:$8 sm:$0xf] }
 0x89a   :  { %v6359_v47 = vpop.eup %6358  ;;  %v3999_v32 = vmul.f32 %v6357_v7, %v6347_v46  ;;  %4005 = vst [vmem:[%s8393_s4 + $0x6] sm:$0x1] %v3997_v19  ;;  %v4934_v6 = vld [vmem:[%s8391_s0 + $0x67] ss:$8 sm:$0xf] }
 0x89b   :  { %v6361_v11 = vpop.eup %6360  ;;  %v4000_v10 = vmul.f32 %v6359_v47, %v6349_v49  ;;  %4006 = vst [vmem:[%s8393_s4 + $0xe] sm:$0x1] %v3998_v60  ;;  %v4037_v20 = vcombine.low %v3997_v19, %v3998_v60  ;;  %v4936_v19 = vld [vmem:[%s8391_s0 + $0xa7] ss:$8 sm:$0xf] }
 0x89c   :  { %v6363_v41 = vpop.eup %6362  ;;  %v4001_v45 = vmul.f32 %v6361_v11, %v6351_v39  ;;  %4007 = vst [vmem:[%s8393_s4 + $0x16] sm:$0x1] %v3999_v32  ;;  %v4937_v7 = vld [vmem:[%s8391_s0 + $0xc7] ss:$8 sm:$0xf] }
 0x89d   :  { %v6365_v62 = vpop.eup %6364  ;;  %4008 = vst [vmem:[%s8393_s4 + $0x1e] sm:$0x1] %v4000_v10  ;;  %v4038_v4 = vcombine.low %v3999_v32, %v4000_v10  ;;  %v4047_v43 = vrot.slane %v4037_v20, %v6868_v59  ;;  %v4938_v10 = vld [vmem:[%s8391_s0 + $0xe7] ss:$8 sm:$0xf] }
 0x89e   :  { %v6367_v23 = vpop.eup %6366  ;;  %4009 = vst [vmem:[%s8393_s4 + $0x26] sm:$0x1] %v4001_v45 }
 0x89f   :  { %v6369_v5 = vpop.eup %6368  ;;  %v4054_v56 = vrot.slane %v4038_v4, %v6868_v59 }
 0x8a0   :  { %v6371_v55 = vpop.eup %6370  ;;  %v4002_v9 = vmul.f32 %v6369_v5, %v6363_v41 }
 0x8a1   :  { %v6373_v16 = vpop.eup %6372  ;;  %v4003_v22 = vmul.f32 %v6371_v55, %v6365_v62  ;;  %v4069_v3 = vcombine.low %v4047_v43, %v4054_v56 }
 0x8a2   :  { %v4004_v27 = vmul.f32 %v6373_v16, %v6367_v23  ;;  %4010 = vst [vmem:[%s8393_s4 + $0x2e] sm:$0x1] %v4002_v9  ;;  %v4039_v38 = vcombine.low %v4001_v45, %v4002_v9 }
 0x8a3   :  { %4011 = vst [vmem:[%s8393_s4 + $0x36] sm:$0x1] %v4003_v22  ;;  %v4077_v52 = vrot.slane %v4069_v3, %v6868_v59 }
 0x8a4   :  { %4012 = vst [vmem:[%s8393_s4 + $0x3e] sm:$0x1] %v4004_v27  ;;  %v4040_v34 = vcombine.low %v4003_v22, %v4004_v27  ;;  %v4061_v13 = vrot.slane %v4039_v38, %v6868_v59 }
 0x8a6   :  { %v4068_v51 = vrot.slane %v4040_v34, %v6868_v59 }
 0x8a8   :  { %v4070_v18 = vcombine.low %v4061_v13, %v4068_v51 }
 0x8aa   :  { %v4084_v53 = vrot.slane %v4070_v18, %v6868_v59 }
 0x8ac   :  { %v4085_v26 = vcombine.low %v4077_v52, %v4084_v53 }
 0x8ae   :  { %4152 = vmatmul.mubr.f32.vlgmr.msra.gmra.mrb[14].mxu0 %v4085_v26  ;;  %4223 = vmatmul.mubr.f32.vlgmr.msra.gmra.mrb[14].mxu1 %v4085_v26 }
 0x981   :  { %v4153_v57 = vpop.f32.mrb[14].mxu0  ;;  %v4224_v63 = vpop.f32.mrb[14].mxu1 }
 0x982   :  { %v4155_v0 = vpop.f32.mrb[15].mxu0  ;;  %v4226_v1 = vpop.f32.mrb[15].mxu1 }
 0x983   :  { %v4233_v28 = vcombine.low %v4153_v57, %v4155_v0  ;;  %v4234_v33 = vcombine.high %v4153_v57, %v4155_v0  ;;  %v4235_v21 = vcombine.low %v4224_v63, %v4226_v1  ;;  %v4236_v48 = vcombine.high %v4224_v63, %v4226_v1 }
 0x985   :  { %v4243_v58 = vrot.slane %v4233_v28, %v6868_v59  ;;  %v4250_v2 = vrot.slane %v4234_v33, %v6868_v59  ;;  %v4257_v30 = vrot.slane %v4235_v21, %v6868_v59  ;;  %v4264_v15 = vrot.slane %v4236_v48, %v6868_v59 }
 0x987   :  { %v4265_v42 = vcombine.low %v4243_v58, %v4257_v30  ;;  %v4266_v36 = vcombine.high %v4243_v58, %v4257_v30  ;;  %v4267_v25 = vcombine.low %v4250_v2, %v4264_v15  ;;  %v4268_v8 = vcombine.high %v4250_v2, %v4264_v15 }
 0x989   :  { %v4275_v46 = vrot.slane %v4265_v42, %v6868_v59  ;;  %v4282_v49 = vrot.slane %v4267_v25, %v6868_v59  ;;  %v4289_v39 = vrot.slane %v4266_v36, %v6868_v59  ;;  %v4296_v44 = vrot.slane %v4268_v8, %v6868_v59 }
 0x98b   :  { %v4297_v60 = vcombine.high %v4275_v46, %v4275_v46  ;;  %v4298_v47 = vcombine.high %v4282_v49, %v4282_v49  ;;  %v4299_v32 = vcombine.high %v4289_v39, %v4289_v39  ;;  %v4300_v11 = vcombine.high %v4296_v44, %v4296_v44 }
 0x98c   :  { %v8267_v20 = vadd.f32 %v4931_v61, %v4275_v46  ;;  %v8269_v41 = vadd.f32 %v4932_v12, %v4289_v39  ;;  %v8271_v45 = vadd.f32 %v4935_v31, %v4282_v49  ;;  %v8277_v23 = vadd.f32 %v4936_v19, %v4296_v44 }
 0x98d   :  { %v8273_v62 = vadd.f32 %v4933_v37, %v4297_v60  ;;  %v8275_v4 = vadd.f32 %v4934_v6, %v4299_v32  ;;  %v8279_v5 = vadd.f32 %v4937_v7, %v4298_v47  ;;  %v8283_v55 = vadd.f32 %v4938_v10, %v4300_v11 }
 0x98e   :  { %v4939_v43 = vmul.f32 -1.442695, %v8267_v20  ;;  %v4940_v56 = vmul.f32 -1.442695, %v8269_v41  ;;  %v4943_v22 = vmul.f32 -1.442695, %v8271_v45 }
 0x98f   :  { %v4941_v9 = vmul.f32 -1.442695, %v8273_v62  ;;  %v4942_v16 = vmul.f32 -1.442695, %v8275_v4  ;;  %v4373_v3 = vrot.slane %v8267_v20, 1  ;;  %v4374_v38 = vrot.slane %v8269_v41, 1 }
 0x990   :  { %6374 = vpow2.f32 %v4939_v43  ;;  %v4944_v27 = vmul.f32 -1.442695, %v8277_v23  ;;  %v4945_v34 = vmul.f32 -1.442695, %v8279_v5  ;;  %v4375_v13 = vrot.slane %v8273_v62, 1 }
 0x991   :  { %6376 = vpow2.f32 %v4940_v56  ;;  %v4946_v51 = vmul.f32 -1.442695, %v8283_v55  ;;  %v4376_v18 = vrot.slane %v8275_v4, 1  ;;  %v4377_v52 = vrot.slane %v8271_v45, 1 }
 0x992   :  { %6378 = vpow2.f32 %v4941_v9  ;;  %v4947_v53 = vmul.f32 -1.442695, %v4373_v3  ;;  %v4948_v26 = vmul.f32 -1.442695, %v4374_v38  ;;  %v4949_v57 = vmul.f32 -1.442695, %v4375_v13 }
 0x993   :  { %6380 = vpow2.f32 %v4942_v16  ;;  %v4950_v63 = vmul.f32 -1.442695, %v4376_v18  ;;  %v4951_v0 = vmul.f32 -1.442695, %v4377_v52  ;;  %v4378_v30 = vrot.slane %v8277_v23, 1 }
 0x994   :  { %6382 = vpow2.f32 %v4943_v22  ;;  %v4379_v36 = vrot.slane %v8279_v5, 1  ;;  %v4380_v61 = vrot.slane %v8283_v55, 1  ;;  %v4440_v52 = vrot.slane %v8275_v4, 2 }
 0x995   :  { %6384 = vpow2.f32 %v4944_v27  ;;  %v4952_v49 = vmul.f32 -1.442695, %v4378_v30  ;;  %v4437_v27 = vrot.slane %v8267_v20, 2 }
 0x996   :  { %6386 = vpow2.f32 %v4945_v34  ;;  %v4953_v6 = vmul.f32 -1.442695, %v4379_v36  ;;  %v4954_v7 = vmul.f32 -1.442695, %v4380_v61  ;;  %v4438_v34 = vrot.slane %v8269_v41, 2 }
 0x997   :  { %6388 = vpow2.f32 %v4946_v51  ;;  %v4439_v51 = vrot.slane %v8273_v62, 2  ;;  %v4465_v61 = vrot.slane %v8271_v45, 3 }
 0x998   :  { %6390 = vpow2.f32 %v4947_v53 }
 0x999   :  { %6392 = vpow2.f32 %v4948_v26  ;;  %v4441_v26 = vrot.slane %v8271_v45, 2 }
 0x99a   :  { %v6375_v1 = vpop.eup %6374  ;;  %6394 = vpow2.f32 %v4949_v57 }
 0x99b   :  { %v6377_v28 = vpop.eup %6376  ;;  %v4341_v33 = vadd.f32 1.0, %v6375_v1  ;;  %6396 = vpow2.f32 %v4950_v63 }
 0x99c   :  { %v6379_v21 = vpop.eup %6378  ;;  %v4342_v48 = vadd.f32 1.0, %v6377_v28  ;;  %6398 = vpow2.f32 %v4951_v0  ;;  %v4461_v28 = vrot.slane %v8267_v20, 3  ;;  %v4464_v20 = vrot.slane %v8275_v4, 3 }
 0x99d   :  { %v6381_v58 = vpop.eup %6380  ;;  %v4343_v2 = vadd.f32 1.0, %v6379_v21  ;;  %6400 = vrcp.f32 %v4341_v33  ;;  %v4468_v4 = vrot.slane %v8283_v55, 3 }
 0x99e   :  { %v6383_v15 = vpop.eup %6382  ;;  %v4344_v42 = vadd.f32 1.0, %v6381_v58  ;;  %6402 = vrcp.f32 %v4342_v48  ;;  %v4442_v48 = vrot.slane %v8277_v23, 2  ;;  %v4462_v58 = vrot.slane %v8269_v41, 3 }
 0x99f   :  { %v6385_v25 = vpop.eup %6384  ;;  %v4345_v8 = vadd.f32 1.0, %v6383_v15  ;;  %6404 = vrcp.f32 %v4343_v2  ;;  %v4443_v15 = vrot.slane %v8279_v5, 2  ;;  %v4466_v41 = vrot.slane %v8277_v23, 3 }
 0x9a0   :  { %v6387_v12 = vpop.eup %6386  ;;  %v4346_v37 = vadd.f32 1.0, %v6385_v25  ;;  %6406 = vrcp.f32 %v4344_v42  ;;  %v4463_v42 = vrot.slane %v8273_v62, 3  ;;  %v4444_v25 = vrot.slane %v8283_v55, 2 }
 0x9a1   :  { %v6389_v31 = vpop.eup %6388  ;;  %v4347_v46 = vadd.f32 1.0, %v6387_v12  ;;  %6408 = vrcp.f32 %v4345_v8  ;;  %v4955_v12 = vmul.f32 -1.442695, %v4461_v28  ;;  %v4467_v62 = vrot.slane %v8279_v5, 3 }
 0x9a2   :  { %v6391_v39 = vpop.eup %6390  ;;  %v4348_v44 = vadd.f32 1.0, %v6389_v31  ;;  %6410 = vrcp.f32 %v4346_v37  ;;  %v4956_v31 = vmul.f32 -1.442695, %v4462_v58  ;;  %v4960_v5 = vmul.f32 -1.442695, %v4466_v41 }
 0x9a3   :  { %v6393_v19 = vpop.eup %6392  ;;  %6412 = vrcp.f32 %v4347_v46  ;;  %v4413_v47 = vadd.f32 1.0, %v6391_v39  ;;  %v4961_v55 = vmul.f32 -1.442695, %v4467_v62 }
 0x9a4   :  { %v6395_v60 = vpop.eup %6394  ;;  %6414 = vrcp.f32 %v4348_v44  ;;  %v4414_v11 = vadd.f32 1.0, %v6393_v19 }
 0x9a5   :  { %v6397_v32 = vpop.eup %6396  ;;  %6416 = vpow2.f32 %v4952_v49  ;;  %v4415_v43 = vadd.f32 1.0, %v6395_v60  ;;  %v4957_v49 = vmul.f32 -1.442695, %v4463_v42 }
 0x9a6   :  { %v6399_v10 = vpop.eup %6398  ;;  %6418 = vpow2.f32 %v4953_v6  ;;  %v4416_v9 = vadd.f32 1.0, %v6397_v32  ;;  %v4958_v6 = vmul.f32 -1.442695, %v4464_v20 }
 0x9a7   :  { %v8299_v56 = vpop.eup %6400  ;;  %6420 = vpow2.f32 %v4954_v7  ;;  %v4417_v22 = vadd.f32 1.0, %v6399_v10  ;;  %v4959_v7 = vmul.f32 -1.442695, %v4465_v61 }
 0x9a8   :  { %v8301_v16 = vpop.eup %6402  ;;  %6422 = vrcp.f32 %v4413_v47 }
 0x9a9   :  { %v8303_v3 = vpop.eup %6404  ;;  %6424 = vrcp.f32 %v4414_v11 }
 0x9aa   :  { %v8306_v38 = vpop.eup %6406  ;;  %6426 = vrcp.f32 %v4415_v43 }
 0x9ab   :  { %v8309_v13 = vpop.eup %6408  ;;  %6428 = vrcp.f32 %v4416_v9  ;;  %v4962_v9 = vmul.f32 -1.442695, %v4468_v4 }
 0x9ac   :  { %v8312_v18 = vpop.eup %6410  ;;  %6430 = vrcp.f32 %v4417_v22 }
 0x9ad   :  { %v8315_v53 = vpop.eup %6412  ;;  %6432 = vtanh.f32 %v4437_v27 }
 0x9ae   :  { %v8318_v57 = vpop.eup %6414  ;;  %6434 = vtanh.f32 %v4438_v34 }
 0x9af   :  { %v6417_v63 = vpop.eup %6416  ;;  %6436 = vtanh.f32 %v4439_v51 }
 0x9b0   :  { %v6419_v0 = vpop.eup %6418  ;;  %v4418_v1 = vadd.f32 1.0, %v6417_v63  ;;  %6438 = vtanh.f32 %v4440_v52 }
 0x9b1   :  { %v6421_v33 = vpop.eup %6420  ;;  %v4419_v21 = vadd.f32 1.0, %v6419_v0  ;;  %6440 = vtanh.f32 %v4441_v26 }
 0x9b2   :  { %v6423_v2 = vpop.eup %6422  ;;  %v4420_v30 = vadd.f32 1.0, %v6421_v33  ;;  %6442 = vrcp.f32 %v4418_v1 }
 0x9b3   :  { %v6425_v36 = vpop.eup %6424  ;;  %6444 = vrcp.f32 %v4419_v21  ;;  %v4525_v39 = vmul.f32 %v6423_v2, %v8173_v17 }
 0x9b4   :  { %v6427_v8 = vpop.eup %6426  ;;  %6446 = vrcp.f32 %v4420_v30  ;;  %v4526_v45 = vmul.f32 %v6425_v36, %v8176_v54 }
 0x9b5   :  { %v6429_v37 = vpop.eup %6428  ;;  %6448 = vtanh.f32 %v4442_v48  ;;  %v4527_v23 = vmul.f32 %v6427_v8, %v8179_v35 }
 0x9b6   :  { %v6431_v46 = vpop.eup %6430  ;;  %6450 = vtanh.f32 %v4443_v15  ;;  %v4528_v32 = vmul.f32 %v6429_v37, %v8181_v40 }
 0x9b7   :  { %v6433_v44 = vpop.eup %6432  ;;  %6452 = vtanh.f32 %v4444_v25  ;;  %v4529_v27 = vmul.f32 %v6431_v46, %v8183_v29 }
 0x9b8   :  { %v6435_v19 = vpop.eup %6434  ;;  %6454 = vpow2.f32 %v4955_v12  ;;  %v4533_v60 = vmul.f32 %v6433_v44, %v8299_v56 }
 0x9b9   :  { %v6437_v47 = vpop.eup %6436  ;;  %6456 = vpow2.f32 %v4956_v31  ;;  %v4534_v17 = vmul.f32 %v6435_v19, %v8301_v16 }
 0x9ba   :  { %v6439_v11 = vpop.eup %6438  ;;  %6458 = vpow2.f32 %v4957_v49  ;;  %v4535_v10 = vmul.f32 %v6437_v47, %v8303_v3  ;;  %v4541_v54 = vadd.f32 %v4533_v60, %v4525_v39 }
 0x9bb   :  { %v6441_v43 = vpop.eup %6440  ;;  %6460 = vpow2.f32 %v4958_v6  ;;  %v4536_v35 = vmul.f32 %v6439_v11, %v8306_v38  ;;  %v4542_v22 = vadd.f32 %v4534_v17, %v4526_v45 }
 0x9bc   :  { %v6443_v56 = vpop.eup %6442  ;;  %6462 = vpow2.f32 %v4959_v7  ;;  %v4543_v34 = vadd.f32 %v4535_v10, %v4527_v23  ;;  %v4537_v26 = vmul.f32 %v6441_v43, %v8309_v13 }
 0x9bd   :  { %v6445_v40 = vpop.eup %6444  ;;  %6464 = vpow2.f32 %v4960_v5  ;;  %v4544_v16 = vadd.f32 %v4536_v35, %v4528_v32  ;;  %v4640_v51 = vcombine.low %v4541_v54, %v4542_v22  ;;  %v4530_v3 = vmul.f32 %v6443_v56, %v8196_v24 }
 0x9be   :  { %v6447_v52 = vpop.eup %6446  ;;  %6466 = vpow2.f32 %v4961_v55  ;;  %v4531_v38 = vmul.f32 %v6445_v40, %v8198_v14  ;;  %v4545_v33 = vadd.f32 %v4537_v26, %v4529_v27 }
 0x9bf   :  { %v6449_v63 = vpop.eup %6448  ;;  %6468 = vpow2.f32 %v4962_v9  ;;  %v4641_v0 = vcombine.low %v4543_v34, %v4544_v16  ;;  %v4532_v28 = vmul.f32 %v6447_v52, %v8200_v50  ;;  %v4650_v24 = vrot.slane %v4640_v51, %v6868_v59 }
 0x9c0   :  { %v6451_v1 = vpop.eup %6450  ;;  %v4538_v29 = vmul.f32 %v6449_v63, %v8312_v18  ;;  %6470 = vtanh.f32 %v4541_v54 }
 0x9c1   :  { %v6453_v21 = vpop.eup %6452  ;;  %v4539_v48 = vmul.f32 %v6451_v1, %v8315_v53  ;;  %6472 = vtanh.f32 %v4542_v22  ;;  %v4657_v13 = vrot.slane %v4641_v0, %v6868_v59 }
 0x9c2   :  { %v6455_v58 = vpop.eup %6454  ;;  %v4540_v2 = vmul.f32 %v6453_v21, %v8318_v57  ;;  %v4546_v14 = vadd.f32 %v4538_v29, %v4530_v3  ;;  %6474 = vtanh.f32 %v4543_v34 }
 0x9c3   :  { %v6457_v30 = vpop.eup %6456  ;;  %v4501_v15 = vadd.f32 1.0, %v6455_v58  ;;  %v4547_v50 = vadd.f32 %v4539_v48, %v4531_v38  ;;  %6476 = vtanh.f32 %v4544_v16  ;;  %v4672_v18 = vcombine.low %v4650_v24, %v4657_v13 }
 0x9c4   :  { %v6459_v42 = vpop.eup %6458  ;;  %v4502_v36 = vadd.f32 1.0, %v6457_v30  ;;  %v4548_v25 = vadd.f32 %v4540_v2, %v4532_v28  ;;  %6478 = vtanh.f32 %v4545_v33  ;;  %v4642_v53 = vcombine.low %v4545_v33, %v4546_v14 }
 0x9c5   :  { %v6461_v20 = vpop.eup %6460  ;;  %v4503_v8 = vadd.f32 1.0, %v6459_v42  ;;  %6480 = vrcp.f32 %v4501_v15  ;;  %v4680_v19 = vrot.slane %v4672_v18, %v6868_v59 }
 0x9c6   :  { %v6463_v61 = vpop.eup %6462  ;;  %v4504_v12 = vadd.f32 1.0, %v6461_v20  ;;  %6482 = vrcp.f32 %v4502_v36  ;;  %v4643_v37 = vcombine.low %v4547_v50, %v4548_v25  ;;  %v4664_v62 = vrot.slane %v4642_v53, %v6868_v59 }
 0x9c7   :  { %v6465_v57 = vpop.eup %6464  ;;  %v4505_v41 = vadd.f32 1.0, %v6463_v61  ;;  %6484 = vrcp.f32 %v4503_v8 }
 0x9c8   :  { %v6467_v31 = vpop.eup %6466  ;;  %v4506_v46 = vadd.f32 1.0, %v6465_v57  ;;  %6486 = vrcp.f32 %v4504_v12  ;;  %v4671_v49 = vrot.slane %v4643_v37, %v6868_v59 }
 0x9c9   :  { %v6469_v39 = vpop.eup %6468  ;;  %v4507_v44 = vadd.f32 1.0, %v6467_v31  ;;  %6488 = vrcp.f32 %v4505_v41 }
 0x9ca   :  { %v6471_v4 = vpop.eup %6470  ;;  %v4508_v6 = vadd.f32 1.0, %v6469_v39  ;;  %6490 = vrcp.f32 %v4506_v46  ;;  %v4673_v45 = vcombine.low %v4664_v62, %v4671_v49 }
 0x9cb   :  { %v6473_v7 = vpop.eup %6472  ;;  %6492 = vrcp.f32 %v4507_v44 }
 0x9cc   :  { %v6475_v23 = vpop.eup %6474  ;;  %6494 = vrcp.f32 %v4508_v6  ;;  %v4687_v60 = vrot.slane %v4673_v45, %v6868_v59 }
 0x9cd   :  { %v6477_v47 = vpop.eup %6476  ;;  %6496 = vtanh.f32 %v4546_v14 }
 0x9ce   :  { %v6479_v5 = vpop.eup %6478  ;;  %6498 = vtanh.f32 %v4547_v50  ;;  %v4688_v32 = vcombine.low %v4680_v19, %v4687_v60 }
 0x9cf   :  { %v6481_v17 = vpop.eup %6480  ;;  %6500 = vtanh.f32 %v4548_v25 }
 0x9d0   :  { %v6483_v11 = vpop.eup %6482  ;;  %v4557_v55 = vmul.f32 %v6481_v17, %v6471_v4  ;;  %4695 = vst [vmem:[%s8394_s6] sm:$0xff] %v4688_v32 }
 0x9d1   :  { %v6485_v10 = vpop.eup %6484  ;;  %v4558_v54 = vmul.f32 %v6483_v11, %v6473_v7 }
 0x9d2   :  { %v6487_v43 = vpop.eup %6486  ;;  %v4559_v9 = vmul.f32 %v6485_v10, %v6475_v23  ;;  %4565 = vst [vmem:[%s8393_s4 + $0x7] sm:$0x1] %v4557_v55 }
 0x9d3   :  { %v6489_v35 = vpop.eup %6488  ;;  %v4560_v22 = vmul.f32 %v6487_v43, %v6477_v47  ;;  %4566 = vst [vmem:[%s8393_s4 + $0xf] sm:$0x1] %v4558_v54  ;;  %v4581_v56 = vcombine.low %v4557_v55, %v4558_v54 }
 0x9d4   :  { %v6491_v27 = vpop.eup %6490  ;;  %v4561_v34 = vmul.f32 %v6489_v35, %v6479_v5  ;;  %4567 = vst [vmem:[%s8393_s4 + $0x17] sm:$0x1] %v4559_v9 }
 0x9d5   :  { %v6493_v40 = vpop.eup %6492  ;;  %4568 = vst [vmem:[%s8393_s4 + $0x1f] sm:$0x1] %v4560_v22  ;;  %v4582_v16 = vcombine.low %v4559_v9, %v4560_v22  ;;  %v4591_v3 = vrot.slane %v4581_v56, %v6868_v59 }
 0x9d6   :  { %v6495_v51 = vpop.eup %6494  ;;  %4569 = vst [vmem:[%s8393_s4 + $0x27] sm:$0x1] %v4561_v34 }
 0x9d7   :  { %v6497_v52 = vpop.eup %6496  ;;  %v4598_v26 = vrot.slane %v4582_v16, %v6868_v59 }
 0x9d8   :  { %v6499_v63 = vpop.eup %6498  ;;  %v4562_v38 = vmul.f32 %v6497_v52, %v6491_v27 }
 0x9d9   :  { %v6501_v0 = vpop.eup %6500  ;;  %v4563_v1 = vmul.f32 %v6499_v63, %v6493_v40  ;;  %v4613_v28 = vcombine.low %v4591_v3, %v4598_v26 }
 0x9da   :  { %v4564_v29 = vmul.f32 %v6501_v0, %v6495_v51  ;;  %4570 = vst [vmem:[%s8393_s4 + $0x2f] sm:$0x1] %v4562_v38  ;;  %v4583_v33 = vcombine.low %v4561_v34, %v4562_v38 }
 0x9db   :  { %4571 = vst [vmem:[%s8393_s4 + $0x37] sm:$0x1] %v4563_v1  ;;  %v4621_v58 = vrot.slane %v4613_v28, %v6868_v59 }
 0x9dc   :  { %4572 = vst [vmem:[%s8393_s4 + $0x3f] sm:$0x1] %v4564_v29  ;;  %v4584_v21 = vcombine.low %v4563_v1, %v4564_v29  ;;  %v4605_v48 = vrot.slane %v4583_v33, %v6868_v59 }
 0x9de   :  { %v4612_v24 = vrot.slane %v4584_v21, %v6868_v59 }
 0x9e0   :  { %v4614_v13 = vcombine.low %v4605_v48, %v4612_v24 }
 0x9e2   :  { %v4628_v2 = vrot.slane %v4614_v13, %v6868_v59 }
 0x9e4   :  { %v4629_v14 = vcombine.low %v4621_v58, %v4628_v2 }
 0x9e6   :  { %4694 = vst [vmem:[%s8395_s5] sm:$0xff] %v4629_v14 }

</bundles_post_ra>
